<compile_context>
chip_gen: v5e
topology: v5e:2x2
jax: 0.10.0
libtpu: 0.0.40
codegen_flags: <defaults>
</compile_context>

<pallas_src>
import functools

import jax
import jax.numpy as jnp
from jax.experimental import pallas as pl
from jax.experimental.pallas import tpu as pltpu


# ---------------------------------------------------------------------------
# Fused ResBlock kernel
# ---------------------------------------------------------------------------
def _make_resblock_kernel(stride, ho, wo, cin, cout, has_proj):
    s = stride
    m = ho * wo

    def body(xph_ref, w1_ref, b1_ref, w2_ref, b2_ref, wsc_ref, bsc_ref,
             out_ref, mid_ref):
        # ---- conv1: 3x3, stride s (BN1 scale pre-folded into w1) + bias + ReLU
        acc = jnp.zeros((m, cout), jnp.float32)
        for kh in range(3):
            for kw in range(3):
                p = (kh % s) * s + (kw % s)           # polyphase plane index
                a, b = kh // s, kw // s               # offsets inside the plane
                tap = xph_ref[p, a:a + ho, b:b + wo, :]        # (ho, wo, cin) bf16
                acc = acc + jnp.dot(tap.reshape(m, cin), w1_ref[kh, kw],
                                    preferred_element_type=jnp.float32)
        mid = jnp.maximum(acc + b1_ref[...], 0.0)              # f32 epilogue

        # Stage the zero-padded conv1 output in a VMEM scratch so that conv2's
        # taps are plain contiguous slices (never leaves VMEM).
        mid_ref[...] = jnp.zeros_like(mid_ref)
        mid_ref[1:1 + ho, 1:1 + wo, :] = (
            mid.reshape(ho, wo, cout).astype(mid_ref.dtype))

        # ---- conv2: 3x3, stride 1 (BN2 scale pre-folded into w2) + bias
        acc2 = jnp.zeros((m, cout), jnp.float32)
        for kh in range(3):
            for kw in range(3):
                tap = mid_ref[kh:kh + ho, kw:kw + wo, :]       # (ho, wo, cout) bf16
                acc2 = acc2 + jnp.dot(tap.reshape(m, cout), w2_ref[kh, kw],
                                      preferred_element_type=jnp.float32)
        out = acc2 + b2_ref[...]

        # ---- shortcut: 1x1 stride-s projection + BN, or identity
        p0 = (1 % s) * s + (1 % s)
        a0 = 1 // s
        sc_tap = xph_ref[p0, a0:a0 + ho, a0:a0 + wo, :]        # (ho, wo, cin)
        if has_proj:
            sc = (jnp.dot(sc_tap.reshape(m, cin), wsc_ref[...],
                          preferred_element_type=jnp.float32) + bsc_ref[...])
        else:
            sc = sc_tap.reshape(m, cin).astype(jnp.float32)

        # residual add + final ReLU in f32; cast to bf16 only on the store
        out_ref[...] = (jnp.maximum(out + sc, 0.0)
                        .reshape(ho, wo, cout).astype(out_ref.dtype))

    if has_proj:
        def kernel(xph_ref, w1_ref, b1_ref, w2_ref, b2_ref, wsc_ref, bsc_ref,
                   out_ref, mid_ref):
            body(xph_ref, w1_ref, b1_ref, w2_ref, b2_ref, wsc_ref, bsc_ref,
                 out_ref, mid_ref)
    else:
        def kernel(xph_ref, w1_ref, b1_ref, w2_ref, b2_ref, out_ref, mid_ref):
            body(xph_ref, w1_ref, b1_ref, w2_ref, b2_ref, None, None,
                 out_ref, mid_ref)
    return kernel


# ---------------------------------------------------------------------------
# Wrapper: layout plumbing + pallas_call
# ---------------------------------------------------------------------------
def _phase_split(x_nhwc, stride, pad):
    """Zero-pad spatially and split into stride*stride polyphase planes so that
    any conv tap at this stride is a contiguous slice inside the kernel.
    Returns (N * stride*stride, Hq, Wq, C) -- same byte count as the input."""
    xp = jnp.pad(x_nhwc, ((0, 0), (pad, pad), (pad, pad), (0, 0)))
    n, hp, wp, c = xp.shape
    hq = -(-hp // stride)
    wq = -(-wp // stride)
    planes = []
    for pr in range(stride):
        for pc in range(stride):
            plane = xp[:, pr::stride, pc::stride, :]
            plane = jnp.pad(plane, ((0, 0), (0, hq - plane.shape[1]),
                                    (0, wq - plane.shape[2]), (0, 0)))
            planes.append(plane)
    xs = jnp.stack(planes, axis=1)                 # (N, s*s, Hq, Wq, C)
    return xs.reshape(n * stride * stride, hq, wq, c)


def res_block_forward(params, x_nchw):
    """PyTorch-layout ResBlock forward: (N, Cin, H, W) -> (N, Cout, Ho, Wo)."""
    stride = params["stride"]
    has_proj = "wsc" in params
    w1, b1 = params["w1"], params["b1"]
    w2, b2 = params["w2"], params["b2"]
    cout = w1.shape[-1]

    x = jnp.transpose(x_nchw, (0, 2, 3, 1))        # NCHW -> NHWC
    n, h, w, cin = x.shape
    ho = (h + 2 - 3) // stride + 1
    wo = (w + 2 - 3) // stride + 1
    ss = stride * stride

    xph = _phase_split(x.astype(jnp.bfloat16), stride, pad=1)
    _, hq, wq, _ = xph.shape

    args = [xph, w1, b1, w2, b2]
    in_specs = [
        # per-image bundle of polyphase planes
        pl.BlockSpec((ss, hq, wq, cin), lambda i: (i, 0, 0, 0)),
        # weights / biases: constant index_map -> resident in VMEM across grid
        pl.BlockSpec((3, 3, cin, cout), lambda i: (0, 0, 0, 0)),
        pl.BlockSpec((1, cout), lambda i: (0, 0)),
        pl.BlockSpec((3, 3, cout, cout), lambda i: (0, 0, 0, 0)),
        pl.BlockSpec((1, cout), lambda i: (0, 0)),
    ]
    if has_proj:
        args += [params["wsc"], params["bsc"]]
        in_specs += [
            pl.BlockSpec((cin, cout), lambda i: (0, 0)),
            pl.BlockSpec((1, cout), lambda i: (0, 0)),
        ]

    kernel = _make_resblock_kernel(stride, ho, wo, cin, cout, has_proj)

    out = pl.pallas_call(
        kernel,
        grid=(n,),                                 # batch axis -> both TCs on v7x
        out_shape=jax.ShapeDtypeStruct((n, ho, wo, cout), jnp.bfloat16),
        in_specs=in_specs,
        out_specs=pl.BlockSpec((None, ho, wo, cout), lambda i: (i, 0, 0, 0)),
        scratch_shapes=[pltpu.VMEM((ho + 2, wo + 2, cout), jnp.bfloat16)],
        compiler_params=pltpu.CompilerParams(
            dimension_semantics=("parallel",)),
    )(*args)
    return jnp.transpose(out, (0, 3, 1, 2))        # NHWC -> NCHW


# ---------------------------------------------------------------------------
# Deterministic parameters (Conv2d bias=False, BatchNorm2d eval-mode folded)
# ---------------------------------------------------------------------------
def make_resblock_params(key, cin, cout, stride, eps=1e-5):
    keys = iter(jax.random.split(key, 16))

    def conv_w(kh, kw, ci, co):
        std = (2.0 / (kh * kw * ci)) ** 0.5
        return jax.random.normal(next(keys), (kh, kw, ci, co), jnp.float32) * std

    def bn(c):
        gamma = jax.random.uniform(next(keys), (c,), jnp.float32, 0.5, 1.5)
        beta = jax.random.normal(next(keys), (c,), jnp.float32) * 0.1
        mean = jax.random.normal(next(keys), (c,), jnp.float32) * 0.1
        var = jax.random.uniform(next(keys), (c,), jnp.float32, 0.5, 1.5)
        scale = gamma / jnp.sqrt(var + eps)
        return scale, beta - mean * scale

    w1 = conv_w(3, 3, cin, cout)
    s1, b1 = bn(cout)
    w2 = conv_w(3, 3, cout, cout)
    s2, b2 = bn(cout)
    w1f, w2f = w1 * s1, w2 * s2                    # fold BN scale into weights
    params = {
        "stride": stride,
        "w1": w1f.astype(jnp.bfloat16), "b1": b1.reshape(1, cout),
        "w2": w2f.astype(jnp.bfloat16), "b2": b2.reshape(1, cout),
        "w1_f32": w1f, "w2_f32": w2f,              # f32 copies for the reference
    }
    if stride != 1 or cin != cout:                 # same condition as PyTorch
        wsc = conv_w(1, 1, cin, cout)
        ssc, bsc = bn(cout)
        wscf = wsc * ssc
        params["wsc"] = wscf.reshape(cin, cout).astype(jnp.bfloat16)
        params["bsc"] = bsc.reshape(1, cout)
        params["wsc_f32"] = wscf
    return params


# ---------------------------------------------------------------------------
# Pure-JAX f32 reference (lax.conv) with the same folded parameters
# ---------------------------------------------------------------------------
def res_block_reference(params, x_nchw):
    x = jnp.transpose(x_nchw, (0, 2, 3, 1)).astype(jnp.float32)
    s = params["stride"]

    def conv(v, wgt, stride, pad):
        return jax.lax.conv_general_dilated(
            v, wgt, window_strides=(stride, stride),
            padding=((pad, pad), (pad, pad)),
            dimension_numbers=("NHWC", "HWIO", "NHWC"))

    out = jax.nn.relu(conv(x, params["w1_f32"], s, 1) + params["b1"])
    out = conv(out, params["w2_f32"], 1, 1) + params["b2"]
    if "wsc_f32" in params:
        sc = conv(x, params["wsc_f32"], s, 0) + params["bsc"]
    else:
        sc = x
    return jnp.transpose(jax.nn.relu(out + sc), (0, 3, 1, 2))


if __name__ == "__main__":
    kp1, kx1, kp2, kx2 = jax.random.split(jax.random.PRNGKey(0), 4)

    # Config 1: downsampling block with projection shortcut (64 -> 128, stride 2)
    params1 = make_resblock_params(kp1, cin=64, cout=128, stride=2)
    x1 = jax.random.normal(kx1, (2, 64, 16, 16), jnp.float32)
    out1 = jax.block_until_ready(
        jax.jit(functools.partial(res_block_forward, params1))(x1))
    assert out1.shape == (2, 128, 8, 8)
    ref1 = res_block_reference(params1, x1)
    err1 = (jnp.linalg.norm(out1.astype(jnp.float32) - ref1)
            / jnp.linalg.norm(ref1))
    assert bool(jnp.isfinite(err1)) and float(err1) < 5e-2, f"rel err {err1}"

    # Config 2: identity-shortcut block (128 -> 128, stride 1)
    params2 = make_resblock_params(kp2, cin=128, cout=128, stride=1)
    x2 = jax.random.normal(kx2, (2, 128, 16, 16), jnp.float32)
    out2 = jax.block_until_ready(
        jax.jit(functools.partial(res_block_forward, params2))(x2))
    assert out2.shape == (2, 128, 16, 16)
    ref2 = res_block_reference(params2, x2)
    err2 = (jnp.linalg.norm(out2.astype(jnp.float32) - ref2)
            / jnp.linalg.norm(ref2))
    assert bool(jnp.isfinite(err2)) and float(err2) < 5e-2, f"rel err {err2}"

    print("KERNEL_OK")
</pallas_src>

<mosaic_0001>
module attributes {stable_mosaic.version = 11 : i64} {
  func.func @kernel(%arg0: i32, %arg1: memref<4x9x9x64xbf16, #tpu.memory_space<vmem>>, %arg2: memref<3x3x64x128xbf16, #tpu.memory_space<vmem>>, %arg3: memref<1x128xf32, #tpu.memory_space<vmem>>, %arg4: memref<3x3x128x128xbf16, #tpu.memory_space<vmem>>, %arg5: memref<1x128xf32, #tpu.memory_space<vmem>>, %arg6: memref<64x128xbf16, #tpu.memory_space<vmem>>, %arg7: memref<1x128xf32, #tpu.memory_space<vmem>>, %arg8: memref<1x8x8x128xbf16, #tpu.memory_space<vmem>>, %arg9: memref<10x10x128xbf16, #tpu.memory_space<vmem>>) attributes {dimension_semantics = [#tpu.dimension_semantics<parallel>], iteration_bounds = array<i64: 2>, scalar_prefetch = 0 : i64, scratch_operands = 1 : i64, tpu.core_type = #tpu.core_type<tc>, window_params = [{transform_indices = @transform_0, window_bounds = array<i64: 4, 9, 9, 64>}, {pipeline_mode = #tpu.pipeline_mode<synchronous>, transform_indices = @transform_1, window_bounds = array<i64: 3, 3, 64, 128>}, {pipeline_mode = #tpu.pipeline_mode<synchronous>, transform_indices = @transform_2, window_bounds = array<i64: 1, 128>}, {pipeline_mode = #tpu.pipeline_mode<synchronous>, transform_indices = @transform_3, window_bounds = array<i64: 3, 3, 128, 128>}, {pipeline_mode = #tpu.pipeline_mode<synchronous>, transform_indices = @transform_4, window_bounds = array<i64: 1, 128>}, {pipeline_mode = #tpu.pipeline_mode<synchronous>, transform_indices = @transform_5, window_bounds = array<i64: 64, 128>}, {pipeline_mode = #tpu.pipeline_mode<synchronous>, transform_indices = @transform_6, window_bounds = array<i64: 1, 128>}, {transform_indices = @transform_7, window_bounds = array<i64: 1, 8, 8, 128>}]} {
    %cst = arith.constant 0.000000e+00 : f32
    %0 = vector.broadcast %cst : f32 to vector<64x128xf32>
    %c0 = arith.constant 0 : index
    %c0_0 = arith.constant 0 : index
    %c0_1 = arith.constant 0 : index
    %c0_2 = arith.constant 0 : index
    %1 = vector.load %arg1[%c0, %c0_0, %c0_1, %c0_2] : memref<4x9x9x64xbf16, #tpu.memory_space<vmem>>, vector<1x8x8x64xbf16>
    %2 = vector.shape_cast %1 : vector<1x8x8x64xbf16> to vector<8x8x64xbf16>
    %3 = vector.shape_cast %2 : vector<8x8x64xbf16> to vector<64x64xbf16>
    %c0_3 = arith.constant 0 : index
    %c0_4 = arith.constant 0 : index
    %c0_5 = arith.constant 0 : index
    %c0_6 = arith.constant 0 : index
    %4 = vector.load %arg2[%c0_3, %c0_4, %c0_5, %c0_6] : memref<3x3x64x128xbf16, #tpu.memory_space<vmem>>, vector<1x1x64x128xbf16>
    %5 = vector.shape_cast %4 : vector<1x1x64x128xbf16> to vector<64x128xbf16>
    %cst_7 = arith.constant dense<0.000000e+00> : vector<64x128xf32>
    %6 = tpu.matmul %3, %5, %cst_7 {dimension_numbers = #tpu.dot_dimension_numbers<[1], [0], [0], [1], [0, 0, 1, 1], [], []>} : vector<64x64xbf16>, vector<64x128xbf16>, vector<64x128xf32> -> vector<64x128xf32>
    %7 = arith.addf %0, %6 : vector<64x128xf32>
    %c1 = arith.constant 1 : index
    %c0_8 = arith.constant 0 : index
    %c0_9 = arith.constant 0 : index
    %c0_10 = arith.constant 0 : index
    %8 = vector.load %arg1[%c1, %c0_8, %c0_9, %c0_10] : memref<4x9x9x64xbf16, #tpu.memory_space<vmem>>, vector<1x8x8x64xbf16>
    %9 = vector.shape_cast %8 : vector<1x8x8x64xbf16> to vector<8x8x64xbf16>
    %10 = vector.shape_cast %9 : vector<8x8x64xbf16> to vector<64x64xbf16>
    %c0_11 = arith.constant 0 : index
    %c1_12 = arith.constant 1 : index
    %c0_13 = arith.constant 0 : index
    %c0_14 = arith.constant 0 : index
    %11 = vector.load %arg2[%c0_11, %c1_12, %c0_13, %c0_14] : memref<3x3x64x128xbf16, #tpu.memory_space<vmem>>, vector<1x1x64x128xbf16>
    %12 = vector.shape_cast %11 : vector<1x1x64x128xbf16> to vector<64x128xbf16>
    %cst_15 = arith.constant dense<0.000000e+00> : vector<64x128xf32>
    %13 = tpu.matmul %10, %12, %cst_15 {dimension_numbers = #tpu.dot_dimension_numbers<[1], [0], [0], [1], [0, 0, 1, 1], [], []>} : vector<64x64xbf16>, vector<64x128xbf16>, vector<64x128xf32> -> vector<64x128xf32>
    %14 = arith.addf %7, %13 : vector<64x128xf32>
    %c0_16 = arith.constant 0 : index
    %c0_17 = arith.constant 0 : index
    %c1_18 = arith.constant 1 : index
    %c0_19 = arith.constant 0 : index
    %15 = vector.load %arg1[%c0_16, %c0_17, %c1_18, %c0_19] : memref<4x9x9x64xbf16, #tpu.memory_space<vmem>>, vector<1x8x8x64xbf16>
    %16 = vector.shape_cast %15 : vector<1x8x8x64xbf16> to vector<8x8x64xbf16>
    %17 = vector.shape_cast %16 : vector<8x8x64xbf16> to vector<64x64xbf16>
    %c0_20 = arith.constant 0 : index
    %c2 = arith.constant 2 : index
    %c0_21 = arith.constant 0 : index
    %c0_22 = arith.constant 0 : index
    %18 = vector.load %arg2[%c0_20, %c2, %c0_21, %c0_22] : memref<3x3x64x128xbf16, #tpu.memory_space<vmem>>, vector<1x1x64x128xbf16>
    %19 = vector.shape_cast %18 : vector<1x1x64x128xbf16> to vector<64x128xbf16>
    %cst_23 = arith.constant dense<0.000000e+00> : vector<64x128xf32>
    %20 = tpu.matmul %17, %19, %cst_23 {dimension_numbers = #tpu.dot_dimension_numbers<[1], [0], [0], [1], [0, 0, 1, 1], [], []>} : vector<64x64xbf16>, vector<64x128xbf16>, vector<64x128xf32> -> vector<64x128xf32>
    %21 = arith.addf %14, %20 : vector<64x128xf32>
    %c2_24 = arith.constant 2 : index
    %c0_25 = arith.constant 0 : index
    %c0_26 = arith.constant 0 : index
    %c0_27 = arith.constant 0 : index
    %22 = vector.load %arg1[%c2_24, %c0_25, %c0_26, %c0_27] : memref<4x9x9x64xbf16, #tpu.memory_space<vmem>>, vector<1x8x8x64xbf16>
    %23 = vector.shape_cast %22 : vector<1x8x8x64xbf16> to vector<8x8x64xbf16>
    %24 = vector.shape_cast %23 : vector<8x8x64xbf16> to vector<64x64xbf16>
    %c1_28 = arith.constant 1 : index
    %c0_29 = arith.constant 0 : index
    %c0_30 = arith.constant 0 : index
    %c0_31 = arith.constant 0 : index
    %25 = vector.load %arg2[%c1_28, %c0_29, %c0_30, %c0_31] : memref<3x3x64x128xbf16, #tpu.memory_space<vmem>>, vector<1x1x64x128xbf16>
    %26 = vector.shape_cast %25 : vector<1x1x64x128xbf16> to vector<64x128xbf16>
    %cst_32 = arith.constant dense<0.000000e+00> : vector<64x128xf32>
    %27 = tpu.matmul %24, %26, %cst_32 {dimension_numbers = #tpu.dot_dimension_numbers<[1], [0], [0], [1], [0, 0, 1, 1], [], []>} : vector<64x64xbf16>, vector<64x128xbf16>, vector<64x128xf32> -> vector<64x128xf32>
    %28 = arith.addf %21, %27 : vector<64x128xf32>
    %c3 = arith.constant 3 : index
    %c0_33 = arith.constant 0 : index
    %c0_34 = arith.constant 0 : index
    %c0_35 = arith.constant 0 : index
    %29 = vector.load %arg1[%c3, %c0_33, %c0_34, %c0_35] : memref<4x9x9x64xbf16, #tpu.memory_space<vmem>>, vector<1x8x8x64xbf16>
    %30 = vector.shape_cast %29 : vector<1x8x8x64xbf16> to vector<8x8x64xbf16>
    %31 = vector.shape_cast %30 : vector<8x8x64xbf16> to vector<64x64xbf16>
    %c1_36 = arith.constant 1 : index
    %c1_37 = arith.constant 1 : index
    %c0_38 = arith.constant 0 : index
    %c0_39 = arith.constant 0 : index
    %32 = vector.load %arg2[%c1_36, %c1_37, %c0_38, %c0_39] : memref<3x3x64x128xbf16, #tpu.memory_space<vmem>>, vector<1x1x64x128xbf16>
    %33 = vector.shape_cast %32 : vector<1x1x64x128xbf16> to vector<64x128xbf16>
    %cst_40 = arith.constant dense<0.000000e+00> : vector<64x128xf32>
    %34 = tpu.matmul %31, %33, %cst_40 {dimension_numbers = #tpu.dot_dimension_numbers<[1], [0], [0], [1], [0, 0, 1, 1], [], []>} : vector<64x64xbf16>, vector<64x128xbf16>, vector<64x128xf32> -> vector<64x128xf32>
    %35 = arith.addf %28, %34 : vector<64x128xf32>
    %c2_41 = arith.constant 2 : index
    %c0_42 = arith.constant 0 : index
    %c1_43 = arith.constant 1 : index
    %c0_44 = arith.constant 0 : index
    %36 = vector.load %arg1[%c2_41, %c0_42, %c1_43, %c0_44] : memref<4x9x9x64xbf16, #tpu.memory_space<vmem>>, vector<1x8x8x64xbf16>
    %37 = vector.shape_cast %36 : vector<1x8x8x64xbf16> to vector<8x8x64xbf16>
    %38 = vector.shape_cast %37 : vector<8x8x64xbf16> to vector<64x64xbf16>
    %c1_45 = arith.constant 1 : index
    %c2_46 = arith.constant 2 : index
    %c0_47 = arith.constant 0 : index
    %c0_48 = arith.constant 0 : index
    %39 = vector.load %arg2[%c1_45, %c2_46, %c0_47, %c0_48] : memref<3x3x64x128xbf16, #tpu.memory_space<vmem>>, vector<1x1x64x128xbf16>
    %40 = vector.shape_cast %39 : vector<1x1x64x128xbf16> to vector<64x128xbf16>
    %cst_49 = arith.constant dense<0.000000e+00> : vector<64x128xf32>
    %41 = tpu.matmul %38, %40, %cst_49 {dimension_numbers = #tpu.dot_dimension_numbers<[1], [0], [0], [1], [0, 0, 1, 1], [], []>} : vector<64x64xbf16>, vector<64x128xbf16>, vector<64x128xf32> -> vector<64x128xf32>
    %42 = arith.addf %35, %41 : vector<64x128xf32>
    %c0_50 = arith.constant 0 : index
    %c1_51 = arith.constant 1 : index
    %c0_52 = arith.constant 0 : index
    %c0_53 = arith.constant 0 : index
    %43 = vector.load %arg1[%c0_50, %c1_51, %c0_52, %c0_53] : memref<4x9x9x64xbf16, #tpu.memory_space<vmem>>, vector<1x8x8x64xbf16>
    %44 = vector.shape_cast %43 : vector<1x8x8x64xbf16> to vector<8x8x64xbf16>
    %45 = vector.shape_cast %44 : vector<8x8x64xbf16> to vector<64x64xbf16>
    %c2_54 = arith.constant 2 : index
    %c0_55 = arith.constant 0 : index
    %c0_56 = arith.constant 0 : index
    %c0_57 = arith.constant 0 : index
    %46 = vector.load %arg2[%c2_54, %c0_55, %c0_56, %c0_57] : memref<3x3x64x128xbf16, #tpu.memory_space<vmem>>, vector<1x1x64x128xbf16>
    %47 = vector.shape_cast %46 : vector<1x1x64x128xbf16> to vector<64x128xbf16>
    %cst_58 = arith.constant dense<0.000000e+00> : vector<64x128xf32>
    %48 = tpu.matmul %45, %47, %cst_58 {dimension_numbers = #tpu.dot_dimension_numbers<[1], [0], [0], [1], [0, 0, 1, 1], [], []>} : vector<64x64xbf16>, vector<64x128xbf16>, vector<64x128xf32> -> vector<64x128xf32>
    %49 = arith.addf %42, %48 : vector<64x128xf32>
    %c1_59 = arith.constant 1 : index
    %c1_60 = arith.constant 1 : index
    %c0_61 = arith.constant 0 : index
    %c0_62 = arith.constant 0 : index
    %50 = vector.load %arg1[%c1_59, %c1_60, %c0_61, %c0_62] : memref<4x9x9x64xbf16, #tpu.memory_space<vmem>>, vector<1x8x8x64xbf16>
    %51 = vector.shape_cast %50 : vector<1x8x8x64xbf16> to vector<8x8x64xbf16>
    %52 = vector.shape_cast %51 : vector<8x8x64xbf16> to vector<64x64xbf16>
    %c2_63 = arith.constant 2 : index
    %c1_64 = arith.constant 1 : index
    %c0_65 = arith.constant 0 : index
    %c0_66 = arith.constant 0 : index
    %53 = vector.load %arg2[%c2_63, %c1_64, %c0_65, %c0_66] : memref<3x3x64x128xbf16, #tpu.memory_space<vmem>>, vector<1x1x64x128xbf16>
    %54 = vector.shape_cast %53 : vector<1x1x64x128xbf16> to vector<64x128xbf16>
    %cst_67 = arith.constant dense<0.000000e+00> : vector<64x128xf32>
    %55 = tpu.matmul %52, %54, %cst_67 {dimension_numbers = #tpu.dot_dimension_numbers<[1], [0], [0], [1], [0, 0, 1, 1], [], []>} : vector<64x64xbf16>, vector<64x128xbf16>, vector<64x128xf32> -> vector<64x128xf32>
    %56 = arith.addf %49, %55 : vector<64x128xf32>
    %c0_68 = arith.constant 0 : index
    %c1_69 = arith.constant 1 : index
    %c1_70 = arith.constant 1 : index
    %c0_71 = arith.constant 0 : index
    %57 = vector.load %arg1[%c0_68, %c1_69, %c1_70, %c0_71] : memref<4x9x9x64xbf16, #tpu.memory_space<vmem>>, vector<1x8x8x64xbf16>
    %58 = vector.shape_cast %57 : vector<1x8x8x64xbf16> to vector<8x8x64xbf16>
    %59 = vector.shape_cast %58 : vector<8x8x64xbf16> to vector<64x64xbf16>
    %c2_72 = arith.constant 2 : index
    %c2_73 = arith.constant 2 : index
    %c0_74 = arith.constant 0 : index
    %c0_75 = arith.constant 0 : index
    %60 = vector.load %arg2[%c2_72, %c2_73, %c0_74, %c0_75] : memref<3x3x64x128xbf16, #tpu.memory_space<vmem>>, vector<1x1x64x128xbf16>
    %61 = vector.shape_cast %60 : vector<1x1x64x128xbf16> to vector<64x128xbf16>
    %cst_76 = arith.constant dense<0.000000e+00> : vector<64x128xf32>
    %62 = tpu.matmul %59, %61, %cst_76 {dimension_numbers = #tpu.dot_dimension_numbers<[1], [0], [0], [1], [0, 0, 1, 1], [], []>} : vector<64x64xbf16>, vector<64x128xbf16>, vector<64x128xf32> -> vector<64x128xf32>
    %63 = arith.addf %56, %62 : vector<64x128xf32>
    %c0_77 = arith.constant 0 : index
    %c0_78 = arith.constant 0 : index
    %64 = vector.load %arg3[%c0_77, %c0_78] : memref<1x128xf32, #tpu.memory_space<vmem>>, vector<1x128xf32>
    %65 = vector.broadcast %64 : vector<1x128xf32> to vector<64x128xf32>
    %66 = arith.addf %63, %65 : vector<64x128xf32>
    %cst_79 = arith.constant 0.000000e+00 : f32
    %67 = vector.broadcast %cst_79 : f32 to vector<64x128xf32>
    %68 = arith.maximumf %66, %67 : vector<64x128xf32>
    %cst_80 = arith.constant 0.000000e+00 : bf16
    %69 = vector.broadcast %cst_80 : bf16 to vector<10x10x128xbf16>
    %c0_81 = arith.constant 0 : index
    %c0_82 = arith.constant 0 : index
    %c0_83 = arith.constant 0 : index
    %70 = vector.load %arg9[%c0_81, %c0_82, %c0_83] : memref<10x10x128xbf16, #tpu.memory_space<vmem>>, vector<10x10x128xbf16>
    tpu.vector_store %arg9[%c0_81, %c0_82, %c0_83], %69 {strides = array<i32>} : memref<10x10x128xbf16, #tpu.memory_space<vmem>>, vector<10x10x128xbf16>,
    %71 = vector.shape_cast %68 : vector<64x128xf32> to vector<8x8x128xf32>
    %72 = arith.truncf %71 : vector<8x8x128xf32> to vector<8x8x128xbf16>
    %c1_84 = arith.constant 1 : index
    %c1_85 = arith.constant 1 : index
    %c0_86 = arith.constant 0 : index
    %73 = vector.load %arg9[%c1_84, %c1_85, %c0_86] : memref<10x10x128xbf16, #tpu.memory_space<vmem>>, vector<8x8x128xbf16>
    tpu.vector_store %arg9[%c1_84, %c1_85, %c0_86], %72 {strides = array<i32>} : memref<10x10x128xbf16, #tpu.memory_space<vmem>>, vector<8x8x128xbf16>,
    %cst_87 = arith.constant 0.000000e+00 : f32
    %74 = vector.broadcast %cst_87 : f32 to vector<64x128xf32>
    %c0_88 = arith.constant 0 : index
    %c0_89 = arith.constant 0 : index
    %c0_90 = arith.constant 0 : index
    %75 = vector.load %arg9[%c0_88, %c0_89, %c0_90] : memref<10x10x128xbf16, #tpu.memory_space<vmem>>, vector<8x8x128xbf16>
    %76 = vector.shape_cast %75 : vector<8x8x128xbf16> to vector<64x128xbf16>
    %c0_91 = arith.constant 0 : index
    %c0_92 = arith.constant 0 : index
    %c0_93 = arith.constant 0 : index
    %c0_94 = arith.constant 0 : index
    %77 = vector.load %arg4[%c0_91, %c0_92, %c0_93, %c0_94] : memref<3x3x128x128xbf16, #tpu.memory_space<vmem>>, vector<1x1x128x128xbf16>
    %78 = vector.shape_cast %77 : vector<1x1x128x128xbf16> to vector<128x128xbf16>
    %cst_95 = arith.constant dense<0.000000e+00> : vector<64x128xf32>
    %79 = tpu.matmul %76, %78, %cst_95 {dimension_numbers = #tpu.dot_dimension_numbers<[1], [0], [0], [1], [0, 0, 1, 1], [], []>} : vector<64x128xbf16>, vector<128x128xbf16>, vector<64x128xf32> -> vector<64x128xf32>
    %80 = arith.addf %74, %79 : vector<64x128xf32>
    %c0_96 = arith.constant 0 : index
    %c1_97 = arith.constant 1 : index
    %c0_98 = arith.constant 0 : index
    %81 = vector.load %arg9[%c0_96, %c1_97, %c0_98] : memref<10x10x128xbf16, #tpu.memory_space<vmem>>, vector<8x8x128xbf16>
    %82 = vector.shape_cast %81 : vector<8x8x128xbf16> to vector<64x128xbf16>
    %c0_99 = arith.constant 0 : index
    %c1_100 = arith.constant 1 : index
    %c0_101 = arith.constant 0 : index
    %c0_102 = arith.constant 0 : index
    %83 = vector.load %arg4[%c0_99, %c1_100, %c0_101, %c0_102] : memref<3x3x128x128xbf16, #tpu.memory_space<vmem>>, vector<1x1x128x128xbf16>
    %84 = vector.shape_cast %83 : vector<1x1x128x128xbf16> to vector<128x128xbf16>
    %cst_103 = arith.constant dense<0.000000e+00> : vector<64x128xf32>
    %85 = tpu.matmul %82, %84, %cst_103 {dimension_numbers = #tpu.dot_dimension_numbers<[1], [0], [0], [1], [0, 0, 1, 1], [], []>} : vector<64x128xbf16>, vector<128x128xbf16>, vector<64x128xf32> -> vector<64x128xf32>
    %86 = arith.addf %80, %85 : vector<64x128xf32>
    %c0_104 = arith.constant 0 : index
    %c2_105 = arith.constant 2 : index
    %c0_106 = arith.constant 0 : index
    %87 = vector.load %arg9[%c0_104, %c2_105, %c0_106] : memref<10x10x128xbf16, #tpu.memory_space<vmem>>, vector<8x8x128xbf16>
    %88 = vector.shape_cast %87 : vector<8x8x128xbf16> to vector<64x128xbf16>
    %c0_107 = arith.constant 0 : index
    %c2_108 = arith.constant 2 : index
    %c0_109 = arith.constant 0 : index
    %c0_110 = arith.constant 0 : index
    %89 = vector.load %arg4[%c0_107, %c2_108, %c0_109, %c0_110] : memref<3x3x128x128xbf16, #tpu.memory_space<vmem>>, vector<1x1x128x128xbf16>
    %90 = vector.shape_cast %89 : vector<1x1x128x128xbf16> to vector<128x128xbf16>
    %cst_111 = arith.constant dense<0.000000e+00> : vector<64x128xf32>
    %91 = tpu.matmul %88, %90, %cst_111 {dimension_numbers = #tpu.dot_dimension_numbers<[1], [0], [0], [1], [0, 0, 1, 1], [], []>} : vector<64x128xbf16>, vector<128x128xbf16>, vector<64x128xf32> -> vector<64x128xf32>
    %92 = arith.addf %86, %91 : vector<64x128xf32>
    %c1_112 = arith.constant 1 : index
    %c0_113 = arith.constant 0 : index
    %c0_114 = arith.constant 0 : index
    %93 = vector.load %arg9[%c1_112, %c0_113, %c0_114] : memref<10x10x128xbf16, #tpu.memory_space<vmem>>, vector<8x8x128xbf16>
    %94 = vector.shape_cast %93 : vector<8x8x128xbf16> to vector<64x128xbf16>
    %c1_115 = arith.constant 1 : index
    %c0_116 = arith.constant 0 : index
    %c0_117 = arith.constant 0 : index
    %c0_118 = arith.constant 0 : index
    %95 = vector.load %arg4[%c1_115, %c0_116, %c0_117, %c0_118] : memref<3x3x128x128xbf16, #tpu.memory_space<vmem>>, vector<1x1x128x128xbf16>
    %96 = vector.shape_cast %95 : vector<1x1x128x128xbf16> to vector<128x128xbf16>
    %cst_119 = arith.constant dense<0.000000e+00> : vector<64x128xf32>
    %97 = tpu.matmul %94, %96, %cst_119 {dimension_numbers = #tpu.dot_dimension_numbers<[1], [0], [0], [1], [0, 0, 1, 1], [], []>} : vector<64x128xbf16>, vector<128x128xbf16>, vector<64x128xf32> -> vector<64x128xf32>
    %98 = arith.addf %92, %97 : vector<64x128xf32>
    %c1_120 = arith.constant 1 : index
    %c1_121 = arith.constant 1 : index
    %c0_122 = arith.constant 0 : index
    %99 = vector.load %arg9[%c1_120, %c1_121, %c0_122] : memref<10x10x128xbf16, #tpu.memory_space<vmem>>, vector<8x8x128xbf16>
    %100 = vector.shape_cast %99 : vector<8x8x128xbf16> to vector<64x128xbf16>
    %c1_123 = arith.constant 1 : index
    %c1_124 = arith.constant 1 : index
    %c0_125 = arith.constant 0 : index
    %c0_126 = arith.constant 0 : index
    %101 = vector.load %arg4[%c1_123, %c1_124, %c0_125, %c0_126] : memref<3x3x128x128xbf16, #tpu.memory_space<vmem>>, vector<1x1x128x128xbf16>
    %102 = vector.shape_cast %101 : vector<1x1x128x128xbf16> to vector<128x128xbf16>
    %cst_127 = arith.constant dense<0.000000e+00> : vector<64x128xf32>
    %103 = tpu.matmul %100, %102, %cst_127 {dimension_numbers = #tpu.dot_dimension_numbers<[1], [0], [0], [1], [0, 0, 1, 1], [], []>} : vector<64x128xbf16>, vector<128x128xbf16>, vector<64x128xf32> -> vector<64x128xf32>
    %104 = arith.addf %98, %103 : vector<64x128xf32>
    %c1_128 = arith.constant 1 : index
    %c2_129 = arith.constant 2 : index
    %c0_130 = arith.constant 0 : index
    %105 = vector.load %arg9[%c1_128, %c2_129, %c0_130] : memref<10x10x128xbf16, #tpu.memory_space<vmem>>, vector<8x8x128xbf16>
    %106 = vector.shape_cast %105 : vector<8x8x128xbf16> to vector<64x128xbf16>
    %c1_131 = arith.constant 1 : index
    %c2_132 = arith.constant 2 : index
    %c0_133 = arith.constant 0 : index
    %c0_134 = arith.constant 0 : index
    %107 = vector.load %arg4[%c1_131, %c2_132, %c0_133, %c0_134] : memref<3x3x128x128xbf16, #tpu.memory_space<vmem>>, vector<1x1x128x128xbf16>
    %108 = vector.shape_cast %107 : vector<1x1x128x128xbf16> to vector<128x128xbf16>
    %cst_135 = arith.constant dense<0.000000e+00> : vector<64x128xf32>
    %109 = tpu.matmul %106, %108, %cst_135 {dimension_numbers = #tpu.dot_dimension_numbers<[1], [0], [0], [1], [0, 0, 1, 1], [], []>} : vector<64x128xbf16>, vector<128x128xbf16>, vector<64x128xf32> -> vector<64x128xf32>
    %110 = arith.addf %104, %109 : vector<64x128xf32>
    %c2_136 = arith.constant 2 : index
    %c0_137 = arith.constant 0 : index
    %c0_138 = arith.constant 0 : index
    %111 = vector.load %arg9[%c2_136, %c0_137, %c0_138] : memref<10x10x128xbf16, #tpu.memory_space<vmem>>, vector<8x8x128xbf16>
    %112 = vector.shape_cast %111 : vector<8x8x128xbf16> to vector<64x128xbf16>
    %c2_139 = arith.constant 2 : index
    %c0_140 = arith.constant 0 : index
    %c0_141 = arith.constant 0 : index
    %c0_142 = arith.constant 0 : index
    %113 = vector.load %arg4[%c2_139, %c0_140, %c0_141, %c0_142] : memref<3x3x128x128xbf16, #tpu.memory_space<vmem>>, vector<1x1x128x128xbf16>
    %114 = vector.shape_cast %113 : vector<1x1x128x128xbf16> to vector<128x128xbf16>
    %cst_143 = arith.constant dense<0.000000e+00> : vector<64x128xf32>
    %115 = tpu.matmul %112, %114, %cst_143 {dimension_numbers = #tpu.dot_dimension_numbers<[1], [0], [0], [1], [0, 0, 1, 1], [], []>} : vector<64x128xbf16>, vector<128x128xbf16>, vector<64x128xf32> -> vector<64x128xf32>
    %116 = arith.addf %110, %115 : vector<64x128xf32>
    %c2_144 = arith.constant 2 : index
    %c1_145 = arith.constant 1 : index
    %c0_146 = arith.constant 0 : index
    %117 = vector.load %arg9[%c2_144, %c1_145, %c0_146] : memref<10x10x128xbf16, #tpu.memory_space<vmem>>, vector<8x8x128xbf16>
    %118 = vector.shape_cast %117 : vector<8x8x128xbf16> to vector<64x128xbf16>
    %c2_147 = arith.constant 2 : index
    %c1_148 = arith.constant 1 : index
    %c0_149 = arith.constant 0 : index
    %c0_150 = arith.constant 0 : index
    %119 = vector.load %arg4[%c2_147, %c1_148, %c0_149, %c0_150] : memref<3x3x128x128xbf16, #tpu.memory_space<vmem>>, vector<1x1x128x128xbf16>
    %120 = vector.shape_cast %119 : vector<1x1x128x128xbf16> to vector<128x128xbf16>
    %cst_151 = arith.constant dense<0.000000e+00> : vector<64x128xf32>
    %121 = tpu.matmul %118, %120, %cst_151 {dimension_numbers = #tpu.dot_dimension_numbers<[1], [0], [0], [1], [0, 0, 1, 1], [], []>} : vector<64x128xbf16>, vector<128x128xbf16>, vector<64x128xf32> -> vector<64x128xf32>
    %122 = arith.addf %116, %121 : vector<64x128xf32>
    %c2_152 = arith.constant 2 : index
    %c2_153 = arith.constant 2 : index
    %c0_154 = arith.constant 0 : index
    %123 = vector.load %arg9[%c2_152, %c2_153, %c0_154] : memref<10x10x128xbf16, #tpu.memory_space<vmem>>, vector<8x8x128xbf16>
    %124 = vector.shape_cast %123 : vector<8x8x128xbf16> to vector<64x128xbf16>
    %c2_155 = arith.constant 2 : index
    %c2_156 = arith.constant 2 : index
    %c0_157 = arith.constant 0 : index
    %c0_158 = arith.constant 0 : index
    %125 = vector.load %arg4[%c2_155, %c2_156, %c0_157, %c0_158] : memref<3x3x128x128xbf16, #tpu.memory_space<vmem>>, vector<1x1x128x128xbf16>
    %126 = vector.shape_cast %125 : vector<1x1x128x128xbf16> to vector<128x128xbf16>
    %cst_159 = arith.constant dense<0.000000e+00> : vector<64x128xf32>
    %127 = tpu.matmul %124, %126, %cst_159 {dimension_numbers = #tpu.dot_dimension_numbers<[1], [0], [0], [1], [0, 0, 1, 1], [], []>} : vector<64x128xbf16>, vector<128x128xbf16>, vector<64x128xf32> -> vector<64x128xf32>
    %128 = arith.addf %122, %127 : vector<64x128xf32>
    %c0_160 = arith.constant 0 : index
    %c0_161 = arith.constant 0 : index
    %129 = vector.load %arg5[%c0_160, %c0_161] : memref<1x128xf32, #tpu.memory_space<vmem>>, vector<1x128xf32>
    %130 = vector.broadcast %129 : vector<1x128xf32> to vector<64x128xf32>
    %131 = arith.addf %128, %130 : vector<64x128xf32>
    %c3_162 = arith.constant 3 : index
    %c0_163 = arith.constant 0 : index
    %c0_164 = arith.constant 0 : index
    %c0_165 = arith.constant 0 : index
    %132 = vector.load %arg1[%c3_162, %c0_163, %c0_164, %c0_165] : memref<4x9x9x64xbf16, #tpu.memory_space<vmem>>, vector<1x8x8x64xbf16>
    %133 = vector.shape_cast %132 : vector<1x8x8x64xbf16> to vector<8x8x64xbf16>
    %134 = vector.shape_cast %133 : vector<8x8x64xbf16> to vector<64x64xbf16>
    %c0_166 = arith.constant 0 : index
    %c0_167 = arith.constant 0 : index
    %135 = vector.load %arg6[%c0_166, %c0_167] : memref<64x128xbf16, #tpu.memory_space<vmem>>, vector<64x128xbf16>
    %cst_168 = arith.constant dense<0.000000e+00> : vector<64x128xf32>
    %136 = tpu.matmul %134, %135, %cst_168 {dimension_numbers = #tpu.dot_dimension_numbers<[1], [0], [0], [1], [0, 0, 1, 1], [], []>} : vector<64x64xbf16>, vector<64x128xbf16>, vector<64x128xf32> -> vector<64x128xf32>
    %c0_169 = arith.constant 0 : index
    %c0_170 = arith.constant 0 : index
    %137 = vector.load %arg7[%c0_169, %c0_170] : memref<1x128xf32, #tpu.memory_space<vmem>>, vector<1x128xf32>
    %138 = vector.broadcast %137 : vector<1x128xf32> to vector<64x128xf32>
    %139 = arith.addf %136, %138 : vector<64x128xf32>
    %140 = arith.addf %131, %139 : vector<64x128xf32>
    %cst_171 = arith.constant 0.000000e+00 : f32
    %141 = vector.broadcast %cst_171 : f32 to vector<64x128xf32>
    %142 = arith.maximumf %140, %141 : vector<64x128xf32>
    %143 = vector.shape_cast %142 : vector<64x128xf32> to vector<8x8x128xf32>
    %144 = arith.truncf %143 : vector<8x8x128xf32> to vector<8x8x128xbf16>
    %c0_172 = arith.constant 0 : index
    %c0_173 = arith.constant 0 : index
    %c0_174 = arith.constant 0 : index
    %c0_175 = arith.constant 0 : index
    %145 = vector.load %arg8[%c0_172, %c0_173, %c0_174, %c0_175] : memref<1x8x8x128xbf16, #tpu.memory_space<vmem>>, vector<1x8x8x128xbf16>
    %146 = vector.shape_cast %145 : vector<1x8x8x128xbf16> to vector<8x8x128xbf16>
    %147 = vector.shape_cast %144 : vector<8x8x128xbf16> to vector<1x8x8x128xbf16>
    tpu.vector_store %arg8[%c0_172, %c0_173, %c0_174, %c0_175], %147 {strides = array<i32>} : memref<1x8x8x128xbf16, #tpu.memory_space<vmem>>, vector<1x8x8x128xbf16>,
    return
  }
  func.func @transform_0(%arg0: i32) -> (i32, i32, i32, i32) {
    %c0_i32 = arith.constant 0 : i32
    %c0_i32_0 = arith.constant 0 : i32
    %c0_i32_1 = arith.constant 0 : i32
    %c0_i32_2 = arith.constant 0 : i32
    return %arg0, %c0_i32, %c0_i32_0, %c0_i32_1 : i32, i32, i32, i32
  }
  func.func @transform_1(%arg0: i32) -> (i32, i32, i32, i32) {
    %c0_i32 = arith.constant 0 : i32
    %c0_i32_0 = arith.constant 0 : i32
    %c0_i32_1 = arith.constant 0 : i32
    %c0_i32_2 = arith.constant 0 : i32
    %c0_i32_3 = arith.constant 0 : i32
    return %c0_i32, %c0_i32_0, %c0_i32_1, %c0_i32_2 : i32, i32, i32, i32
  }
  func.func @transform_2(%arg0: i32) -> (i32, i32) {
    %c0_i32 = arith.constant 0 : i32
    %c0_i32_0 = arith.constant 0 : i32
    %c0_i32_1 = arith.constant 0 : i32
    return %c0_i32, %c0_i32_0 : i32, i32
  }
  func.func @transform_3(%arg0: i32) -> (i32, i32, i32, i32) {
    %c0_i32 = arith.constant 0 : i32
    %c0_i32_0 = arith.constant 0 : i32
    %c0_i32_1 = arith.constant 0 : i32
    %c0_i32_2 = arith.constant 0 : i32
    %c0_i32_3 = arith.constant 0 : i32
    return %c0_i32, %c0_i32_0, %c0_i32_1, %c0_i32_2 : i32, i32, i32, i32
  }
  func.func @transform_4(%arg0: i32) -> (i32, i32) {
    %c0_i32 = arith.constant 0 : i32
    %c0_i32_0 = arith.constant 0 : i32
    %c0_i32_1 = arith.constant 0 : i32
    return %c0_i32, %c0_i32_0 : i32, i32
  }
  func.func @transform_5(%arg0: i32) -> (i32, i32) {
    %c0_i32 = arith.constant 0 : i32
    %c0_i32_0 = arith.constant 0 : i32
    %c0_i32_1 = arith.constant 0 : i32
    return %c0_i32, %c0_i32_0 : i32, i32
  }
  func.func @transform_6(%arg0: i32) -> (i32, i32) {
    %c0_i32 = arith.constant 0 : i32
    %c0_i32_0 = arith.constant 0 : i32
    %c0_i32_1 = arith.constant 0 : i32
    return %c0_i32, %c0_i32_0 : i32, i32
  }
  func.func @transform_7(%arg0: i32) -> (i32, i32, i32, i32) {
    %c0_i32 = arith.constant 0 : i32
    %c0_i32_0 = arith.constant 0 : i32
    %c0_i32_1 = arith.constant 0 : i32
    %c0_i32_2 = arith.constant 0 : i32
    return %arg0, %c0_i32, %c0_i32_0, %c0_i32_1 : i32, i32, i32, i32
  }
}

</mosaic_0001>

<bundles_post_ra>
// kernel: res_block_forward.1
= control target key start
LH: loop header
LB: loop body
LE: loop exit
PB: predicated region body
PF: predicated region fallthrough
CT: control target
= control target key end

     0   :  { %12 = vsyncpa [#allocation4], 0  ;;  %s6126_s0 = inlined_call_operand.vmem [shape: bf16[8,9,9,64], index: 0, kind: input, shape index: {}]   ;;  %s6127_s1 = inlined_call_operand.vmem [shape: bf16[3,3,64,128], index: 1, kind: input, shape index: {}]   ;;  %s6128_s2 = inlined_call_operand.vmem [shape: f32[1,128], index: 2, kind: input, shape index: {}]   ;;  %s6129_s3 = inlined_call_operand.vmem [shape: bf16[3,3,128,128], index: 3, kind: input, shape index: {}]   ;;  %s6130_s4 = inlined_call_operand.vmem [shape: f32[1,128], index: 4, kind: input, shape index: {}]   ;;  %s6131_s5 = inlined_call_operand.vmem [shape: bf16[64,128], index: 5, kind: input, shape index: {}]   ;;  %s6132_s6 = inlined_call_operand.vmem [shape: f32[1,128], index: 6, kind: input, shape index: {}]   ;;  %s6133_s7 = inlined_call_operand.hbm [shape: bf16[2,8,8,128], index: 7, kind: output, shape index: {}]  }
   0x1   :  { %14 = vsyncpa [#allocation4 + $0x1], 0  ;;  %s4949_s24 = smov 0   ;;  %s4951_s25 = smov 0  }
   0x2   :  { %s4953_s26 = smov 0   ;;  %s4955_s27 = smov 0  }
   0x3 LB: > { %s4970_s28 = sadd.s32 4294967295, %s4904_s27   ;;  %s3652_s29 = sadd.s32 4294967294, %s4904_s27   ;;  %s4904_s27 = sphi %s4955_s27, %s6147_s27   ;;  %s4900_s26 = sphi %s4953_s26, %s6146_s26   ;;  %s4896_s25 = sphi %s4951_s25, %s6145_s25   ;;  %s4892_s24 = sphi %s4949_s24, %s6144_s24  }
   0x4   : > { %s4974_s30 = sadd.s32 1, %s4904_s27   ;;  %s179_s8 = sadd.s32 1, %s4900_s26 }
   0x5   : > { %s176_s9 = ssub.s32 %s4904_s27, %s4974_s30  ;;  %p189_p0 = scmp.ne.s32.totalorder %s4900_s26, %s4896_s25 }
   0x6   : > { %p177_p1 = scmp.eq.s32.totalorder %s176_s9, 0  ;;  %p190_p2 = scmp.eq.s32.totalorder %s4970_s28, 1 }
   0x7   : > { %p195_p3 = scmp.ne.s32.totalorder %s4896_s25, %s4892_s24  ;;  %p196_p4 = scmp.eq.s32.totalorder %s3652_s29, 1 }
   0x8   : > { %s4985_s10 = scalar_select %p177_p1, %s4900_s26, %s179_s8  }
   0x9   : > { %p4987_p5 = por %p190_p2, %p189_p0  ;;  %p4991_p6 = por %p196_p4, %p195_p3 }
   0xa   : > { %p3655_p7 = scmp.ge.s32.totalorder %s4904_s27, 1  ;;  %p242_p8 = scmp.lt.s32.totalorder %s4904_s27, 3 }
   0xc   : > { %p243_p9 = pnand %p3655_p7, %p242_p8 }
   0xd   : > { %s3657_s17 = sshll.u32 (!%p243_p9), %s4970_s28, 2  ;;  %s272_s8 = sand.u32 (!%p243_p9), 1, %s4896_s25  }
   0xe   : > { %246 = sbr.rel (%p243_p9) target bundleno = 673 (0x2a1), region = 48  ;;  %p276_p10 = scmp.lt.s32.totalorder (!%p243_p9), %s3657_s17, 7 }
   0xf   : > { %s3656_s9 = sshll.u32 (!%p243_p9), %s272_s8, 5  ;;  %s4862_s29 = scalar_lea.hbm (!%p243_p9), %s6133_s7, 64 }
  0x10   : > { %s6062_s13 = scalar_lea.vmem (!%p243_p9), [#allocation3], %s3656_s9 }
  0x11   : > { %s3587_s19 = sshll.u32 (!%p243_p9), %s6062_s13, 4  ;;  %s3588_s19 = int_to_ptr.vmem [resolvable:$true] %s3587_s19 }
  0x13   : > { %v4623_v0 = vld [vmem:[%s6127_s1 + $0x38] sm:$0xff]  ;;  %v4622_v2 = vld [vmem:[%s6127_s1 + $0x30] sm:$0xff]  ;;  %s6149_s17 = smov (!%p276_p10, %s3657_s17), 7  ;;  %v4621_v6 = vld [vmem:[%s6127_s1 + $0x28] sm:$0xff]  ;;  %vm361_vm0 = vcmask 523264   ;;  %vm1730_vm4 = vcmask 1043456  }
  0x14   : > { %v4627_v1 = vld [vmem:[%s6127_s1 + $0x58] sm:$0xff]  ;;  %378 = vmatpush.bf16.msra.mxu0 %v4623_v0  ;;  %v4626_v3 = vld [vmem:[%s6127_s1 + $0x50] sm:$0xff]  ;;  %s4796_s14 = smul.u32 72, %s6149_s17  ;;  %v4625_v7 = vld [vmem:[%s6127_s1 + $0x48] sm:$0xff]  ;;  %vm504_vm1 = vsmask.f32 3328 }
  0x15   : > { %680 = vmatpush.bf16.msra.mxu2 %v4627_v1  ;;  %v4615_v4 = vld [vmem:[%s6127_s1 + $0x18] sm:$0xff]  ;;  %4788 = vmatpush.bf16.msra.mxu3 %v4627_v1  ;;  %v5016_v5 = vld [vmem:[%s6127_s1 + $0x10] sm:$0xff]  ;;  %vm505_vm2 = vsmask.f32 7440  ;;  %v5032_v8 = vld [vmem:[%s6127_s1 + $0x8] sm:$0xff]  ;;  %vm1736_vm6 = vcmask 1040384  }
  0x16   : > { %4784 = vmatpush.bf16.msra.mxu1 %v4615_v4  ;;  %s5027_s20 = scalar_lea.vmem %s6126_s0, %s4796_s14  ;;  %v4620_v9 = vld [vmem:[%s6127_s1 + $0x20] sm:$0xff]  ;;  %v4635_v22 = vld [vmem:[%s6127_s1 + $0x78] sm:$0xff]  ;;  %vm5062_vm3 = vmor %vm504_vm1, %vm505_vm2  ;;  %vm1731_vm5 = vsmask.f32 7938  ;;  %vm1737_vm7 = vsmask.f32 256 }
  0x17   : > { %v3677_v10 = vld [vmem:[%s5027_s20 + $0x48] sm:$0xf]  ;;  %v4616_v11 = vld [vmem:[%s5027_s20 + $0x4c] sm:$0xf0]  ;;  %v4624_v12 = vld [vmem:[%s6127_s1 + $0x40] sm:$0xff]  ;;  %vm2163_vm10 = vcmask 1042432  }
  0x18   : > { %379 = vmatpush.bf16.msra.mxu0 %v4622_v2  ;;  %v488_v13 = vld [vmem:[%s5027_s20] sm:$0xf]  ;;  %v489_v14 = vld [vmem:[%s5027_s20 + $0x4] sm:$0x1]  ;;  %v490_v15 = vld [vmem:[%s5027_s20 + $0x8] sm:$0xf]  ;;  %v3678_v24 = vor.u32 %v4616_v11, %v3677_v10 }
  0x19   : > { %681 = vmatpush.bf16.msra.mxu2 %v4626_v3  ;;  %4789 = vmatpush.bf16.msra.mxu3 %v4626_v3  ;;  %v491_v16 = vld [vmem:[%s5027_s20 + $0xc] sm:$0x1]  ;;  %v508_v17 = vshrl.u32 %v488_v13, 16  ;;  %v511_v18 = vshll.u32 %v488_v13, 16  ;;  %v517_v19 = vshll.u32 %v489_v14, 16  ;;  %v522_v20 = vshrl.u32 %v490_v15, 16  ;;  %vm5556_vm8 = vmand %vm1730_vm4, %vm1731_vm5 }
  0x1a   : > { %4785 = vmatpush.bf16.msra.mxu1 %v5016_v5  ;;  %v500_v21 = vld [vmem:[%s5027_s20 + $0x30] sm:$0xf]  ;;  %v5054_v23 = vld [vmem:[%s6127_s1] sm:$0xff]  ;;  %v525_v25 = vshll.u32 %v490_v15, 16  ;;  %v531_v26 = vshll.u32 %v491_v16, 16  ;;  %vm5565_vm9 = vmand %vm1736_vm6, %vm1737_vm7  ;;  %vm2164_vm11 = vcmask 1046532  }
  0x1b   : > { %v501_v27 = vld [vmem:[%s5027_s20 + $0x34] sm:$0x1]  ;;  %v502_v28 = vld [vmem:[%s5027_s20 + $0x38] sm:$0xf]  ;;  %v510_v29 = vrot.slane %v508_v17, 4  ;;  %v513_v30 = vrot.slane %v511_v18, 5  ;;  %vm5578_vm12 = vmor %vm2163_vm10, %vm2164_vm11 }
  0x1c   : > { %380 = vmatpush.bf16.msra.mxu0 %v4621_v6  ;;  %v519_v31 = vrot.slane %v517_v19, 5  ;;  %v524_v32 = vrot.slane %v522_v20, 4  ;;  %v503_v33 = vld [vmem:[%s5027_s20 + $0x3c] sm:$0x1]  ;;  %v527_v34 = vrot.slane %v525_v25, 5  ;;  %v533_v35 = vrot.slane %v531_v26, 5 }
  0x1d   : > { %682 = vmatpush.bf16.msra.mxu2 %v4625_v7  ;;  %4790 = vmatpush.bf16.msra.mxu3 %v4625_v7  ;;  %v592_v36 = vshrl.u32 %v500_v21, 16  ;;  %v595_v37 = vshll.u32 %v500_v21, 16  ;;  %v514_v38 = vor.u32 %v513_v30, %v510_v29  ;;  %v601_v39 = vshll.u32 %v501_v27, 16  ;;  %v4634_v47 = vld [vmem:[%s6127_s1 + $0x70] sm:$0xff]  ;;  %v4609_v53 = vld [vmem:[%s5027_s20 + $0x14] sm:$0xf0] }
  0x1e   : > { %4786 = vmatpush.bf16.msra.mxu1 %v5032_v8  ;;  %v606_v40 = vshrl.u32 %v502_v28, 16  ;;  %v609_v41 = vshll.u32 %v502_v28, 16  ;;  %v528_v43 = vor.u32 %v527_v34, %v524_v32  ;;  %v615_v46 = vshll.u32 %v503_v33, 16  ;;  %v3717_v48 = vld [vmem:[%s5027_s20 + $0x10] sm:$0xf]  ;;  %v4633_v7 = vld [vmem:[%s6127_s1 + $0x68] sm:$0xff] }
  0x1f   : > { %v594_v44 = vrot.slane %v592_v36, 4  ;;  %v597_v45 = vrot.slane %v595_v37, 5  ;;  %v515_v49 = vrot.slane %v514_v38, 4  ;;  %v603_v50 = vrot.slane %v601_v39, 5  ;;  %v492_v57 = vld [vmem:[%s5027_s20 + $0x10] sm:$0xf] }
  0x20   : > { %381 = vmatpush.bf16.msra.mxu0 %v4620_v9  ;;  %v608_v51 = vrot.slane %v606_v40, 4  ;;  %v611_v52 = vrot.slane %v609_v41, 5  ;;  %v529_v54 = vrot.slane %v528_v43, 4  ;;  %v617_v56 = vrot.slane %v615_v46, 5  ;;  %v493_v58 = vld [vmem:[%s5027_s20 + $0x14] sm:$0x1] }
  0x21   : > { %683 = vmatpush.bf16.msra.mxu2 %v4624_v12  ;;  %4791 = vmatpush.bf16.msra.mxu3 %v4624_v12  ;;  %v598_v55 = vor.u32 %v597_v45, %v594_v44  ;;  %v520_v59 = vsel %vm5062_vm3, %v515_v49, %v519_v31  ;;  %v3718_v61 = vor.u32 %v4609_v53, %v3717_v48  ;;  %v494_v62 = vld [vmem:[%s5027_s20 + $0x18] sm:$0xf]  ;;  %v536_v63 = vshrl.u32 %v492_v57, 16  ;;  %v495_v12 = vld [vmem:[%s5027_s20 + $0x1c] sm:$0x1]  ;;  %s4760_s14 = sshll.u32 %s4970_s28, 5 }
  0x22   : > { %4787 = vmatpush.bf16.msra.mxu1 %v5054_v23  ;;  %v612_v60 = vor.u32 %v611_v52, %v608_v51  ;;  %v534_v0 = vsel %vm5062_vm3, %v529_v54, %v533_v35  ;;  %v628_v1 = vunpack.c.l.b16 %v520_v59  ;;  %v539_v3 = vshll.u32 %v492_v57, 16  ;;  %v4617_v27 = vld [vmem:[%s5027_s20 + $0x5c] sm:$0xf0]  ;;  %v498_v33 = vld [vmem:[%s5027_s20 + $0x28] sm:$0xf]  ;;  %v4663_v34 = vld [vmem:[%s6127_s1 + $0xf8] sm:$0xff]  ;;  %s3586_s18 = scalar_lea.hbm %s6133_s7, %s4760_s14 }
  0x23   : > { %3707 = vmatmul.msk.bf16.vlgmr.msra.gmra.mxu0 %vm361_vm0, %v3678_v24  ;;  %v599_v2 = vrot.slane %v598_v55, 4  ;;  %v538_v9 = vrot.slane %v536_v63, 4  ;;  %v545_v10 = vshll.u32 %v493_v58, 16  ;;  %v550_v14 = vshrl.u32 %v494_v62, 16  ;;  %v4632_v24 = vld [vmem:[%s6127_s1 + $0x60] sm:$0xff]  ;;  %s3589_s17 = sshll.u32 %s3586_s18, 4  ;;  %s3590_s17 = int_to_ptr.hbm [resolvable:$true] %s3589_s17 }
  0x24   : > { %463 = vmatpush.bf16.msrb.mxu0 %v4615_v4  ;;  %v629_v4 = vunpack.c.l.b16 %v534_v0  ;;  %v613_v6 = vrot.slane %v612_v60, 4  ;;  %v541_v13 = vrot.slane %v539_v3, 5  ;;  %v559_v25 = vshll.u32 %v495_v12, 16  ;;  %v496_v31 = vld [vmem:[%s5027_s20 + $0x20] sm:$0xf]  ;;  %v4662_v3 = vld [vmem:[%s6127_s1 + $0xf0] sm:$0xff] }
  0x25   : > { %791 = vmatpush.bf16.msrb.mxu3 %v4635_v22  ;;  %3744 = vmatmul.msk.bf16.vlgmr.msra.gmra.mxu1 %vm361_vm0, %v3718_v61  ;;  %v604_v11 = vsel %vm5062_vm3, %v599_v2, %v603_v50  ;;  %v552_v20 = vrot.slane %v550_v14, 4  ;;  %v3681_v22 = vld [vmem:[%s5027_s20 + $0x58] sm:$0xf]  ;;  %v547_v29 = vrot.slane %v545_v10, 5  ;;  %v564_v36 = vshrl.u32 %v496_v31, 16  ;;  %s3575_s28 = scalar_lea.sflag [#allocation4], %s272_s8 }
  0x26   : > { %v636_v15 = vpack.c.b16 %v629_v4, %v628_v1  ;;  %v618_v16 = vsel %vm5062_vm3, %v613_v6, %v617_v56  ;;  %v634_v17 = vunpack.c.l.b16 %v604_v11  ;;  %v542_v19 = vor.u32 %v541_v13, %v538_v9  ;;  %v3721_v40 = vld [vmem:[%s5027_s20 + $0x20] sm:$0xf]  ;;  %v4610_v41 = vld [vmem:[%s5027_s20 + $0x24] sm:$0xf0]  ;;  %v497_v51 = vld [vmem:[%s5027_s20 + $0x24] sm:$0x1] }
  0x27   : > { %v635_v18 = vunpack.c.l.b16 %v618_v16  ;;  %v561_v32 = vrot.slane %v559_v25, 5  ;;  %v3682_v35 = vor.u32 %v4617_v27, %v3681_v22  ;;  %v567_v37 = vshll.u32 %v496_v31, 16  ;;  %v499_v52 = vld [vmem:[%s5027_s20 + $0x2c] sm:$0x1]  ;;  %v3793_v54 = vld [vmem:[%s5027_s20 + $0x90] sm:$0xf] }
  0x28   : > { %464 = vmatpush.bf16.msrb.mxu0 %v5016_v5  ;;  %v553_v5 = vshll.u32 %v494_v62, 16  ;;  %3771 = vmatmul.msk.bf16.vlgmr.msra.gmra.mxu2 %vm361_vm0, %v636_v15  ;;  %v543_v28 = vrot.slane %v542_v19, 4  ;;  %v578_v43 = vshrl.u32 %v498_v33, 16  ;;  %v581_v44 = vshll.u32 %v498_v33, 16  ;;  %v4628_v55 = vld [vmem:[%s5027_s20 + $0x94] sm:$0xf0] }
  0x29   : > { %792 = vmatpush.bf16.msrb.mxu3 %v4634_v47  ;;  %v639_v26 = vpack.c.b16 %v635_v18, %v634_v17  ;;  %v3722_v46 = vor.u32 %v4610_v41, %v3721_v40  ;;  %v566_v47 = vrot.slane %v564_v36, 4  ;;  %v569_v48 = vrot.slane %v567_v37, 5  ;;  %v3685_v1 = vld [vmem:[%s5027_s20 + $0x68] sm:$0xf]  ;;  %v4618_v2 = vld [vmem:[%s5027_s20 + $0x6c] sm:$0xf0] }
  0x2a   : > { %v555_v21 = vrot.slane %v553_v5, 5  ;;  %v548_v38 = vsel %vm5062_vm3, %v543_v28, %v547_v29  ;;  %v580_v49 = vrot.slane %v578_v43, 4  ;;  %v583_v50 = vrot.slane %v581_v44, 5  ;;  %v4655_v4 = vld [vmem:[%s6127_s1 + $0xd8] sm:$0xff]  ;;  %v3725_v10 = vld [vmem:[%s5027_s20 + $0x30] sm:$0xf] }
  0x2b   : > { %3774 = vmatmul.msk.bf16.vlgmr.msra.gmra.mxu3 %vm361_vm0, %v639_v26  ;;  %v570_v56 = vor.u32 %v569_v48, %v566_v47  ;;  %v573_v57 = vshll.u32 %v497_v51, 16  ;;  %v587_v59 = vshll.u32 %v499_v52, 16  ;;  %v3794_v60 = vor.u32 %v4628_v55, %v3793_v54  ;;  %v4611_v11 = vld [vmem:[%s5027_s20 + $0x34] sm:$0xf0]  ;;  %1235 = vmatpush.bf16.msrb.mxu2 %v4655_v4  ;;  %v4654_v16 = vld [vmem:[%s6127_s1 + $0xd0] sm:$0xff]  ;;  %v4653_v28 = vld [vmem:[%s6127_s1 + $0xc8] sm:$0xff] }
  0x2c   : > { %465 = vmatpush.bf16.msrb.mxu0 %v5032_v8  ;;  %v556_v30 = vor.u32 %v555_v21, %v552_v20  ;;  %v584_v58 = vor.u32 %v583_v50, %v580_v49  ;;  %v3686_v6 = vor.u32 %v4618_v2, %v3685_v1  ;;  %v3726_v14 = vor.u32 %v4611_v11, %v3725_v10  ;;  %v4643_v5 = vld [vmem:[%s6127_s1 + $0x98] sm:$0xff]  ;;  %v3797_v18 = vld [vmem:[%s5027_s20 + $0xa0] sm:$0xf]  ;;  %v4629_v19 = vld [vmem:[%s5027_s20 + $0xa4] sm:$0xf0]  ;;  %s4856_s21 = sshra.s32 %s3590_s17, 4  ;;  %s4857_s21 = int_to_ptr.hbm [resolvable:$true] %s4856_s21 }
  0x2d   : > { %793 = vmatpush.bf16.msrb.mxu3 %v4633_v7  ;;  %v571_v61 = vrot.slane %v570_v56, 4  ;;  %v575_v62 = vrot.slane %v573_v57, 5  ;;  %v589_v0 = vrot.slane %v587_v59, 5  ;;  %v4647_v15 = vld [vmem:[%s6127_s1 + $0xb8] sm:$0xff]  ;;  %v3798_v20 = vor.u32 %v4629_v19, %v3797_v18  ;;  %v4642_v22 = vld [vmem:[%s6127_s1 + $0x90] sm:$0xff]  ;;  %v4641_v29 = vld [vmem:[%s6127_s1 + $0x88] sm:$0xff]  ;;  %p4863_p0 = scmp.lt.s32.totalorder %s4857_s21, %s6133_s7 }
  0x2e   : > { %v557_v8 = vrot.slane %v556_v30, 4  ;;  %v585_v63 = vrot.slane %v584_v58, 4  ;;  %1124 = vmatpush.bf16.msrb.mxu1 %v4647_v15  ;;  %v3689_v21 = vld [vmem:[%s5027_s20 + $0x78] sm:$0xf]  ;;  %v3879_v25 = vld [vmem:[%s5027_s20 + $0x90] sm:$0xf] }
  0x2f   : > { %v576_v7 = vsel %vm5062_vm3, %v571_v61, %v575_v62  ;;  %1236 = vmatpush.bf16.msrb.mxu2 %v4654_v16  ;;  %v3881_v26 = vld [vmem:[%s5027_s20 + $0x98] sm:$0xf]  ;;  %v4646_v27 = vld [vmem:[%s6127_s1 + $0xb0] sm:$0xff]  ;;  %v952_v30 = vshrl.u32 %v3879_v25, 16  ;;  %v955_v31 = vshll.u32 %v3879_v25, 16  ;;  %v4661_v33 = vld [vmem:[%s6127_s1 + $0xe8] sm:$0xff] }
  0x30   : > { %466 = vmatpush.bf16.msrb.mxu0 %v5054_v23  ;;  %v562_v39 = vsel %vm5062_vm3, %v557_v8, %v561_v32  ;;  %v630_v23 = vunpack.c.l.b16 %v548_v38  ;;  %v590_v9 = vsel %vm5062_vm3, %v585_v63, %v589_v0  ;;  %v632_v12 = vunpack.c.l.b16 %v576_v7  ;;  %v4652_v37 = vld [vmem:[%s6127_s1 + $0xc0] sm:$0xff]  ;;  %v3880_v40 = vld [vmem:[%s5027_s20 + $0x94] sm:$0x1]  ;;  %v3882_v41 = vld [vmem:[%s5027_s20 + $0x9c] sm:$0x1] }
  0x31   : > { %794 = vmatpush.bf16.msrb.mxu3 %v4632_v24  ;;  %v631_v45 = vunpack.c.l.b16 %v562_v39  ;;  %v633_v13 = vunpack.c.l.b16 %v590_v9  ;;  %v4619_v24 = vld [vmem:[%s5027_s20 + $0x7c] sm:$0xf0]  ;;  %v966_v32 = vshrl.u32 %v3881_v26, 16  ;;  %v969_v8 = vshll.u32 %v3881_v26, 16  ;;  %v4648_v48 = vld [vmem:[%s5027_s20 + $0xc] sm:$0xf0] }
  0x32   : > { %1125 = vmatpush.bf16.msrb.mxu1 %v4646_v27  ;;  %v954_v36 = vrot.slane %v952_v30, 4  ;;  %v4640_v38 = vld [vmem:[%s6127_s1 + $0x80] sm:$0xff]  ;;  %v957_v39 = vrot.slane %v955_v31, 5  ;;  %v975_v47 = vshll.u32 %v3882_v41, 16  ;;  %v4667_v52 = vld [vmem:[%s6127_s1 + $0x118] sm:$0xff] }
  0x33   : > { %3708 = vmatmul.msk.bf16.gmra.mxu0 %vm361_vm0, %v3682_v35  ;;  %v637_v53 = vpack.c.b16 %v631_v45, %v630_v23  ;;  %v638_v17 = vpack.c.b16 %v633_v13, %v632_v12  ;;  %1237 = vmatpush.bf16.msrb.mxu2 %v4653_v28  ;;  %v4645_v35 = vld [vmem:[%s6127_s1 + $0xa8] sm:$0xff]  ;;  %v968_v43 = vrot.slane %v966_v32, 4  ;;  %v971_v44 = vrot.slane %v969_v8, 5  ;;  %v4644_v49 = vld [vmem:[%s6127_s1 + $0xa0] sm:$0xff]  ;;  %v3801_v57 = vld [vmem:[%s5027_s20 + $0xb0] sm:$0xf] }
  0x34   : > { %902 = vmatpush.bf16.msra.mxu0 %v4643_v5  ;;  %v3941_v23 = vld [vmem:[%s5027_s20 + $0x8] sm:$0xf]  ;;  %v958_v45 = vor.u32 %v957_v39, %v954_v36  ;;  %v4660_v50 = vld [vmem:[%s6127_s1 + $0xe0] sm:$0xff]  ;;  %v977_v55 = vrot.slane %v975_v47, 5  ;;  %v4630_v58 = vld [vmem:[%s5027_s20 + $0xb4] sm:$0xf0] }
  0x35   : > { %1346 = vmatpush.bf16.msra.mxu3 %v4663_v34  ;;  %3745 = vmatmul.msk.bf16.gmra.mxu1 %vm361_vm0, %v3722_v46  ;;  %v3690_v34 = vor.u32 %v4619_v24, %v3689_v21  ;;  %v961_v46 = vshll.u32 %v3880_v40, 16  ;;  %v972_v51 = vor.u32 %v971_v44, %v968_v43  ;;  %v3942_v59 = vor.u32 %v4648_v48, %v3941_v23  ;;  %v3713_v2 = vld [vmem:[%s5027_s20] sm:$0xf]  ;;  %v3884_v13 = vld [vmem:[%s5027_s20 + $0xa4] sm:$0x1]  ;;  %v4666_v24 = vld [vmem:[%s6127_s1 + $0x110] sm:$0xff] }
  0x36   : > { %1126 = vmatpush.bf16.msrb.mxu1 %v4645_v35  ;;  %v3802_v0 = vor.u32 %v4630_v58, %v3801_v57  ;;  %v3883_v4 = vld [vmem:[%s5027_s20 + $0xa0] sm:$0xf]  ;;  %v989_v16 = vshll.u32 %v3884_v13, 16  ;;  %v4631_v31 = vld [vmem:[%s5027_s20 + $0xc4] sm:$0xf0] }
  0x37   : > { %1238 = vmatpush.bf16.msrb.mxu2 %v4652_v37  ;;  %v963_v54 = vrot.slane %v961_v46, 5  ;;  %v973_v56 = vrot.slane %v972_v51, 4  ;;  %v980_v7 = vshrl.u32 %v3883_v4, 16  ;;  %v983_v9 = vshll.u32 %v3883_v4, 16  ;;  %v3805_v30 = vld [vmem:[%s5027_s20 + $0xc0] sm:$0xf] }
  0x38   : > { %3772 = vmatmul.msk.bf16.gmra.mxu2 %vm361_vm0, %v637_v53  ;;  %903 = vmatpush.bf16.msra.mxu0 %v4642_v22  ;;  %v959_v53 = vrot.slane %v958_v45, 4  ;;  %v4649_v22 = vld [vmem:[%s5027_s20 + $0x1c] sm:$0xf0]  ;;  %v991_v25 = vrot.slane %v989_v16, 5  ;;  %v3806_v36 = vor.u32 %v4631_v31, %v3805_v30  ;;  %v3887_v40 = vld [vmem:[%s5027_s20 + $0xb0] sm:$0xf] }
  0x39   : > { %1347 = vmatpush.bf16.msra.mxu3 %v4662_v3  ;;  %v978_v61 = vsel %vm5062_vm3, %v973_v56, %v977_v55  ;;  %v4608_v3 = vld [vmem:[%s5027_s20 + $0x4] sm:$0xf0]  ;;  %v982_v5 = vrot.slane %v980_v7, 4  ;;  %v985_v15 = vrot.slane %v983_v9, 5  ;;  %v4636_v39 = vld [vmem:[%s5027_s20 + $0xdc] sm:$0xf0] }
  0x3a   : > { %1127 = vmatpush.bf16.msrb.mxu1 %v4644_v49  ;;  %v1073_v63 = vunpack.c.l.b16 %v978_v61  ;;  %v3714_v11 = vor.u32 %v4608_v3, %v3713_v2  ;;  %v3889_v41 = vld [vmem:[%s5027_s20 + $0xb8] sm:$0xf]  ;;  %v1008_v43 = vshrl.u32 %v3887_v40, 16  ;;  %v1011_v44 = vshll.u32 %v3887_v40, 16  ;;  %v3888_v47 = vld [vmem:[%s5027_s20 + $0xb4] sm:$0x1] }
  0x3b   : > { %3823 = vmatmul.msk.bf16.vlgmr.msrb.gmra.mxu3 %vm361_vm0, %v3794_v60  ;;  %v964_v60 = vsel %vm5062_vm3, %v959_v53, %v963_v54  ;;  %v986_v21 = vor.u32 %v985_v15, %v982_v5  ;;  %v1022_v23 = vshrl.u32 %v3889_v41, 16  ;;  %v1025_v46 = vshll.u32 %v3889_v41, 16  ;;  %v3890_v48 = vld [vmem:[%s5027_s20 + $0xbc] sm:$0x1]  ;;  %v3949_v55 = vld [vmem:[%s5027_s20 + $0x28] sm:$0xf] }
  0x3c   : > { %904 = vmatpush.bf16.msra.mxu0 %v4641_v29  ;;  %v1072_v62 = vunpack.c.l.b16 %v964_v60  ;;  %v1010_v49 = vrot.slane %v1008_v43, 4  ;;  %v1017_v51 = vshll.u32 %v3888_v47, 16  ;;  %v1031_v54 = vshll.u32 %v3890_v48, 16  ;;  %v4650_v57 = vld [vmem:[%s5027_s20 + $0x2c] sm:$0xf0]  ;;  %v4665_v58 = vld [vmem:[%s6127_s1 + $0x108] sm:$0xff] }
  0x3d   : > { %1348 = vmatpush.bf16.msra.mxu3 %v4661_v33  ;;  %v987_v28 = vrot.slane %v986_v21, 4  ;;  %v1027_v53 = vrot.slane %v1025_v46, 5  ;;  %v3950_v2 = vor.u32 %v4650_v57, %v3949_v55  ;;  %v3891_v13 = vld [vmem:[%s5027_s20 + $0xc0] sm:$0xf]  ;;  %v4027_v48 = vld [vmem:[%s5027_s20 + $0x8] sm:$0xf] }
  0x3e   : > { %v1080_v1 = vpack.c.b16 %v1073_v63, %v1072_v62  ;;  %v1033_v61 = vrot.slane %v1031_v54, 5  ;;  %v1036_v5 = vshrl.u32 %v3891_v13, 16  ;;  %v1039_v15 = vshll.u32 %v3891_v13, 16  ;;  %v4651_v31 = vld [vmem:[%s5027_s20 + $0x3c] sm:$0xf0] }
  0x3f   : > { %v992_v33 = vsel %vm5062_vm3, %v987_v28, %v991_v25  ;;  %v3894_v25 = vld [vmem:[%s5027_s20 + $0xcc] sm:$0x1]  ;;  %v3953_v28 = vld [vmem:[%s5027_s20 + $0x38] sm:$0xf]  ;;  %v4638_v46 = vld [vmem:[%s5027_s20 + $0xfc] sm:$0xf0] }
  0x40   : > { %905 = vmatpush.bf16.msra.mxu0 %v4640_v38  ;;  %v3845_v38 = vld [vmem:[%s5027_s20 + $0xd8] sm:$0xf]  ;;  %v1059_v30 = vshll.u32 %v3894_v25, 16  ;;  %v3857_v57 = vld [vmem:[%s5027_s20 + $0x108] sm:$0xf] }
  0x41   : > { %1349 = vmatpush.bf16.msra.mxu3 %v4660_v50  ;;  %v3846_v45 = vor.u32 %v4636_v39, %v3845_v38  ;;  %v1013_v50 = vrot.slane %v1011_v44, 5  ;;  %v3954_v38 = vor.u32 %v4651_v31, %v3953_v28  ;;  %v4031_v25 = vld [vmem:[%s5027_s20 + $0x18] sm:$0xf]  ;;  %v4659_v28 = vld [vmem:[%s5027_s20 + $0x84] sm:$0xf0] }
  0x43   : > { %3709 = vmatmul.msk.bf16.gmra.mxu0 %vm361_vm0, %v3686_v6  ;;  %v3885_v6 = vld [vmem:[%s5027_s20 + $0xa8] sm:$0xf]  ;;  %v1014_v56 = vor.u32 %v1013_v50, %v1010_v49  ;;  %v4029_v49 = vld [vmem:[%s5027_s20 + $0x10] sm:$0xf] }
  0x44   : > { %v994_v10 = vshrl.u32 %v3885_v6, 16  ;;  %v997_v12 = vshll.u32 %v3885_v6, 16  ;;  %v4001_v50 = vld [vmem:[%s5027_s20 + $0x70] sm:$0xf]  ;;  %v1410_v54 = vshrl.u32 %v4029_v49, 16  ;;  %v1413_v55 = vshll.u32 %v4029_v49, 16 }
  0x45   : > { %3746 = vmatmul.msk.bf16.gmra.mxu1 %vm361_vm0, %v3726_v14  ;;  %4792 = vmatpush.bf16.msrb.mxu3 %v4667_v52  ;;  %v3886_v14 = vld [vmem:[%s5027_s20 + $0xac] sm:$0x1]  ;;  %v1015_v62 = vrot.slane %v1014_v56, 4 }
  0x46   : > { %v999_v18 = vrot.slane %v997_v12, 5  ;;  %v1003_v19 = vshll.u32 %v3886_v14, 16  ;;  %v4637_v12 = vld [vmem:[%s5027_s20 + $0xec] sm:$0xf0]  ;;  %v3893_v14 = vld [vmem:[%s5027_s20 + $0xc8] sm:$0xf] }
  0x47   : > { %v1050_v16 = vshrl.u32 %v3893_v14, 16 }
  0x48   : > { %3773 = vmatmul.msk.bf16.gmra.mxu2 %vm361_vm0, %v638_v17  ;;  %v996_v17 = vrot.slane %v994_v10, 4  ;;  %v1005_v27 = vrot.slane %v1003_v19, 5  ;;  %v1038_v19 = vrot.slane %v1036_v5, 4 }
  0x49   : > { %4793 = vmatpush.bf16.msrb.mxu3 %v4666_v24  ;;  %v1052_v21 = vrot.slane %v1050_v16, 4 }
  0x4a   : > { %v1000_v26 = vor.u32 %v999_v18, %v996_v17  ;;  %v1053_v17 = vshll.u32 %v3893_v14, 16 }
  0x4b   : > { %3824 = vmatmul.msk.bf16.gmra.mxu3 %vm361_vm0, %v3798_v20  ;;  %v3945_v20 = vld [vmem:[%s5027_s20 + $0x18] sm:$0xf] }
  0x4c   : > { %v1001_v29 = vrot.slane %v1000_v26, 4  ;;  %v3946_v32 = vor.u32 %v4649_v22, %v3945_v20  ;;  %v1041_v20 = vrot.slane %v1039_v15, 5  ;;  %v1055_v22 = vrot.slane %v1053_v17, 5 }
  0x4d   : > { %4794 = vmatpush.bf16.msrb.mxu3 %v4665_v58 }
  0x4e   : > { %v1006_v8 = vsel %vm5062_vm3, %v1001_v29, %v1005_v27  ;;  %v1042_v26 = vor.u32 %v1041_v20, %v1038_v19  ;;  %v1056_v27 = vor.u32 %v1055_v22, %v1052_v21  ;;  %v4036_v20 = vld [vmem:[%s5027_s20 + $0x2c] sm:$0x1] }
  0x4f   : > { %v1075_v35 = vunpack.c.l.b16 %v1006_v8 }
  0x50   : > { %v1057_v8 = vrot.slane %v1056_v27, 4  ;;  %v4005_v27 = vld [vmem:[%s5027_s20 + $0x80] sm:$0xf] }
  0x53   : > { %3710 = vmatmul.msk.bf16.gmra.mxu0 %vm361_vm0, %v3690_v34  ;;  %v1074_v34 = vunpack.c.l.b16 %v992_v33  ;;  %v1043_v33 = vrot.slane %v1042_v26, 4  ;;  %v4033_v26 = vld [vmem:[%s5027_s20 + $0x20] sm:$0xf] }
  0x55   : > { %3919 = vmatmul.msk.bf16.vlgmr.msrb.gmra.mxu1 %vm361_vm0, %v1080_v1  ;;  %v1081_v37 = vpack.c.b16 %v1075_v35, %v1074_v34  ;;  %v4656_v1 = vld [vmem:[%s5027_s20 + $0x54] sm:$0xf0]  ;;  %v1061_v35 = vrot.slane %v1059_v30, 5 }
  0x57   : > { %v1062_v40 = vsel %vm5062_vm3, %v1057_v8, %v1061_v35  ;;  %v1427_v35 = vshll.u32 %v4031_v25, 16 }
  0x58   : > { %3971 = vmatmul.msk.bf16.vlgmr.msrb.gmra.mxu2 %vm361_vm0, %v3942_v59  ;;  %v1019_v59 = vrot.slane %v1017_v51, 5  ;;  %v1079_v43 = vunpack.c.l.b16 %v1062_v40  ;;  %v4658_v51 = vld [vmem:[%s5027_s20 + $0x74] sm:$0xf0] }
  0x59   : > { %v4002_v56 = vor.u32 %v4658_v51, %v4001_v50  ;;  %v4032_v51 = vld [vmem:[%s5027_s20 + $0x1c] sm:$0x1] }
  0x5a   : > { %v1020_v3 = vsel %vm5062_vm3, %v1015_v62, %v1019_v59  ;;  %v1412_v62 = vrot.slane %v1410_v54, 4 }
  0x5b   : > { %3825 = vmatmul.msk.bf16.gmra.mxu3 %vm361_vm0, %v3802_v0  ;;  %v3993_v0 = vld [vmem:[%s5027_s20 + $0x50] sm:$0xf]  ;;  %v1076_v6 = vunpack.c.l.b16 %v1020_v3 }
  0x5c   : > { %v3994_v9 = vor.u32 %v4656_v1, %v3993_v0  ;;  %v4030_v0 = vld [vmem:[%s5027_s20 + $0x14] sm:$0x1]  ;;  %v4035_v1 = vld [vmem:[%s5027_s20 + $0x28] sm:$0xf] }
  0x63   : > { %3743 = vmatmul.msk.bf16.vlgmr.msrb.gmra.mxu0 %vm361_vm0, %v3714_v11  ;;  %v3849_v11 = vld [vmem:[%s5027_s20 + $0xe8] sm:$0xf] }
  0x64   : > { %1568 = vmatpush.bf16.msrb.mxu0 %v4667_v52  ;;  %v1024_v52 = vrot.slane %v1022_v23, 4  ;;  %v3850_v18 = vor.u32 %v4637_v12, %v3849_v11  ;;  %v1455_v11 = vshll.u32 %v4035_v1, 16 }
  0x65   : > { %3920 = vmatmul.msk.bf16.gmra.mxu1 %vm361_vm0, %v1081_v37  ;;  %v4657_v37 = vld [vmem:[%s5027_s20 + $0x64] sm:$0xf0] }
  0x66   : > { %v1028_v60 = vor.u32 %v1027_v53, %v1024_v52  ;;  %v1396_v52 = vshrl.u32 %v4027_v48, 16  ;;  %v1399_v53 = vshll.u32 %v4027_v48, 16  ;;  %v1457_v19 = vrot.slane %v1455_v11, 5 }
  0x68   : > { %1569 = vmatpush.bf16.msrb.mxu0 %v4666_v24  ;;  %3972 = vmatmul.msk.bf16.gmra.mxu2 %vm361_vm0, %v3946_v32  ;;  %v1029_v63 = vrot.slane %v1028_v60, 4  ;;  %v3892_v24 = vld [vmem:[%s5027_s20 + $0xc4] sm:$0x1]  ;;  %v1401_v59 = vrot.slane %v1399_v53, 5  ;;  %v4639_v60 = vld [vmem:[%s5027_s20 + $0x10c] sm:$0xf0] }
  0x69   : > { %v1045_v29 = vshll.u32 %v3892_v24, 16  ;;  %v4664_v32 = vld [vmem:[%s6127_s1 + $0x100] sm:$0xff] }
  0x6a   : > { %v1034_v4 = vsel %vm5062_vm3, %v1029_v63, %v1033_v61  ;;  %4795 = vmatpush.bf16.msrb.mxu3 %v4664_v32  ;;  %v4028_v61 = vld [vmem:[%s5027_s20 + $0xc] sm:$0x1]  ;;  %v1415_v63 = vrot.slane %v1413_v55, 5  ;;  %v4039_v55 = vld [vmem:[%s5027_s20 + $0x38] sm:$0xf] }
  0x6b   : > { %3826 = vmatmul.msk.bf16.gmra.mxu3 %vm361_vm0, %v3806_v36  ;;  %v1077_v7 = vunpack.c.l.b16 %v1034_v4  ;;  %v1047_v34 = vrot.slane %v1045_v29, 5  ;;  %v3997_v36 = vld [vmem:[%s5027_s20 + $0x60] sm:$0xf]  ;;  %v1405_v4 = vshll.u32 %v4028_v61, 16  ;;  %v4038_v29 = vld [vmem:[%s5027_s20 + $0x34] sm:$0x1] }
  0x6c   : > { %1570 = vmatpush.bf16.msrb.mxu0 %v4665_v58  ;;  %v3998_v44 = vor.u32 %v4657_v37, %v3997_v36  ;;  %v1398_v58 = vrot.slane %v1396_v52, 4  ;;  %v1438_v36 = vshrl.u32 %v4033_v26, 16  ;;  %v1441_v37 = vshll.u32 %v4033_v26, 16  ;;  %v4034_v52 = vld [vmem:[%s5027_s20 + $0x24] sm:$0x1] }
  0x6d   : > { %v1082_v10 = vpack.c.b16 %v1077_v7, %v1076_v6  ;;  %v1048_v39 = vsel %vm5062_vm3, %v1043_v33, %v1047_v34  ;;  %v4037_v6 = vld [vmem:[%s5027_s20 + $0x30] sm:$0xf]  ;;  %v1416_v7 = vor.u32 %v1415_v63, %v1412_v62  ;;  %v1407_v15 = vrot.slane %v1405_v4, 5 }
  0x6e   : > { %v1078_v41 = vunpack.c.l.b16 %v1048_v39  ;;  %v1402_v3 = vor.u32 %v1401_v59, %v1398_v58  ;;  %v1466_v13 = vshrl.u32 %v4037_v6, 16  ;;  %v1469_v14 = vshll.u32 %v4037_v6, 16 }
  0x6f   : > { %v1417_v16 = vrot.slane %v1416_v7, 4  ;;  %v1461_v33 = vshll.u32 %v4036_v20, 16  ;;  %v1424_v34 = vshrl.u32 %v4031_v25, 16  ;;  %v1475_v40 = vshll.u32 %v4038_v29, 16  ;;  %v4042_v20 = vld [vmem:[%s5027_s20 + $0x44] sm:$0x1] }
  0x70   : > { %1571 = vmatpush.bf16.msrb.mxu0 %v4664_v32  ;;  %v1083_v23 = vpack.c.b16 %v1079_v43, %v1078_v41  ;;  %v1403_v5 = vrot.slane %v1402_v3, 4  ;;  %v1468_v22 = vrot.slane %v1466_v13, 4  ;;  %v1471_v24 = vrot.slane %v1469_v14, 5 }
  0x71   : > { %v1443_v48 = vrot.slane %v1441_v37, 5  ;;  %v1477_v50 = vrot.slane %v1475_v40, 5  ;;  %v1447_v62 = vshll.u32 %v4034_v52, 16  ;;  %v1483_v3 = vshll.u32 %v4039_v55, 16 }
  0x72   : > { %v1408_v30 = vsel %vm5062_vm3, %v1403_v5, %v1407_v15  ;;  %v1472_v39 = vor.u32 %v1471_v24, %v1468_v22 }
  0x73   : > { %3875 = vmatmul.msk.bf16.vlgmr.msra.gmra.mxu0 %vm361_vm0, %v3846_v45  ;;  %v3853_v45 = vld [vmem:[%s5027_s20 + $0xf8] sm:$0xf]  ;;  %v1516_v41 = vunpack.c.l.b16 %v1408_v30  ;;  %v1449_v13 = vrot.slane %v1447_v62, 5 }
  0x74   : > { %v3854_v47 = vor.u32 %v4638_v46, %v3853_v45  ;;  %v1426_v45 = vrot.slane %v1424_v34, 4  ;;  %v1429_v46 = vrot.slane %v1427_v35, 5  ;;  %v1473_v49 = vrot.slane %v1472_v39, 4 }
  0x75   : > { %3921 = vmatmul.msk.bf16.gmra.mxu1 %vm361_vm0, %v1082_v10  ;;  %v1452_v10 = vshrl.u32 %v4035_v1, 16 }
  0x76   : > { %v1430_v59 = vor.u32 %v1429_v46, %v1426_v45  ;;  %v1478_v1 = vsel %vm5062_vm3, %v1473_v49, %v1477_v50 }
  0x77   : > { %v1521_v5 = vunpack.c.l.b16 %v1478_v1 }
  0x78   : > { %3973 = vmatmul.msk.bf16.gmra.mxu2 %vm361_vm0, %v3950_v2  ;;  %v3858_v2 = vor.u32 %v4639_v60, %v3857_v57  ;;  %v1433_v60 = vshll.u32 %v4032_v51, 16 }
  0x7b   : > { %4023 = vmatmul.msk.bf16.vlgmr.msra.gmra.mxu3 %vm361_vm0, %v3994_v9  ;;  %v1419_v9 = vshll.u32 %v4030_v0, 16 }
  0x7d   : > { %v1421_v17 = vrot.slane %v1419_v9, 5  ;;  %v1431_v9 = vrot.slane %v1430_v59, 4 }
  0x7f   : > { %v1422_v31 = vsel %vm5062_vm3, %v1417_v16, %v1421_v17  ;;  %v1485_v16 = vrot.slane %v1483_v3, 5 }
  0x80   : > { %v1517_v43 = vunpack.c.l.b16 %v1422_v31  ;;  %v1503_v31 = vshll.u32 %v4042_v20, 16  ;;  %v4678_v20 = vld [vmem:[%s6129_s3 + $0x30] sm:$0xff] }
  0x82   : > { %v1524_v53 = vpack.c.b16 %v1517_v43, %v1516_v41 }
  0x83   : > { %3876 = vmatmul.msk.bf16.gmra.mxu0 %vm361_vm0, %v3850_v18  ;;  %v1454_v18 = vrot.slane %v1452_v10, 4  ;;  %v1435_v10 = vrot.slane %v1433_v60, 5 }
  0x85   : > { %3922 = vmatmul.msk.bf16.gmra.mxu1 %vm361_vm0, %v1083_v23  ;;  %v1458_v32 = vor.u32 %v1457_v19, %v1454_v18  ;;  %v1463_v23 = vrot.slane %v1461_v33, 5  ;;  %v4040_v19 = vld [vmem:[%s5027_s20 + $0x3c] sm:$0x1]  ;;  %v1436_v24 = vsel %vm5062_vm3, %v1431_v9, %v1435_v10 }
  0x86   : > { %v1489_v29 = vshll.u32 %v4040_v19, 16  ;;  %v4687_v19 = vld [vmem:[%s6129_s3 + $0x78] sm:$0xff] }
  0x87   : > { %2009 = vmatpush.bf16.msra.mxu1 %v4687_v19 }
  0x88   : > { %3974 = vmatmul.msk.bf16.gmra.mxu2 %vm361_vm0, %v3954_v38  ;;  %v4006_v38 = vor.u32 %v4659_v28, %v4005_v27 }
  0x8b   : > { %4024 = vmatmul.msk.bf16.gmra.mxu3 %vm361_vm0, %v3998_v44  ;;  %v1459_v44 = vrot.slane %v1458_v32, 4  ;;  %v1518_v32 = vunpack.c.l.b16 %v1436_v24 }
  0x8d   : > { %v1464_v0 = vsel %vm5062_vm3, %v1459_v44, %v1463_v23 }
  0x8e   : > { %v1520_v14 = vunpack.c.l.b16 %v1464_v0 }
  0x90   : > { %v1526_v26 = vpack.c.b16 %v1521_v5, %v1520_v14 }
  0x93   : > { %3877 = vmatmul.msk.bf16.gmra.mxu0 %vm361_vm0, %v3854_v47  ;;  %v1440_v47 = vrot.slane %v1438_v36, 4  ;;  %v1491_v36 = vrot.slane %v1489_v29, 5 }
  0x95   : > { %v1444_v61 = vor.u32 %v1443_v48, %v1440_v47 }
  0x97   : > { %v1445_v11 = vrot.slane %v1444_v61, 4 }
  0x99   : > { %v1450_v25 = vsel %vm5062_vm3, %v1445_v11, %v1449_v13 }
  0x9a   : > { %v1519_v33 = vunpack.c.l.b16 %v1450_v25 }
  0x9b   : > { %4025 = vmatmul.msk.bf16.gmra.mxu3 %vm361_vm0, %v4002_v56  ;;  %v4041_v56 = vld [vmem:[%s5027_s20 + $0x40] sm:$0xf] }
  0x9c   : > { %v1494_v4 = vshrl.u32 %v4041_v56, 16  ;;  %v1497_v6 = vshll.u32 %v4041_v56, 16  ;;  %v1525_v39 = vpack.c.b16 %v1519_v33, %v1518_v32  ;;  %v4685_v33 = vld [vmem:[%s6129_s3 + $0x68] sm:$0xff] }
  0x9e   : > { %v1496_v17 = vrot.slane %v1494_v4, 4  ;;  %v1499_v18 = vrot.slane %v1497_v6, 5 }
  0xa0   : > { %v5275_v12 = vpop.f32.mrf.mxu0  ;;  %v1500_v30 = vor.u32 %v1499_v18, %v1496_v17 }
  0xa2   : > { %v473_v21 = vpop.f32.mrf.mxu1  ;;  %v1501_v37 = vrot.slane %v1500_v30, 4 }
  0xa3   : > { %3878 = vmatmul.msk.bf16.gmra.mxu0 %vm361_vm0, %v3858_v2  ;;  %v1480_v2 = vshrl.u32 %v4039_v55, 16 }
  0xa5   : > { %v1482_v15 = vrot.slane %v1480_v2, 4 }
  0xa7   : > { %v1486_v28 = vor.u32 %v1485_v16, %v1482_v15  ;;  %v4679_v16 = vld [vmem:[%s6129_s3 + $0x38] sm:$0xff] }
  0xa8   : > { %v5288_v8 = vpop.f32.mrf.mxu0  ;;  %2110 = vmatpush.bf16.msra.mxu2 %v4679_v16 }
  0xa9   : > { %v1487_v35 = vrot.slane %v1486_v28, 4  ;;  %v4677_v28 = vld [vmem:[%s6129_s3 + $0x28] sm:$0xff] }
  0xaa   : > { %v5293_v54 = vpop.f32.mrf.mxu1 }
  0xab   : > { %4026 = vmatmul.msk.bf16.gmra.mxu3 %vm361_vm0, %v4006_v38  ;;  %v5303_v7 = vpop.f32.mrf.mxu2  ;;  %v1505_v38 = vrot.slane %v1503_v31, 5  ;;  %v1492_v43 = vsel %vm5062_vm3, %v1487_v35, %v1491_v36  ;;  %v4676_v35 = vld [vmem:[%s6129_s3 + $0x20] sm:$0xff] }
  0xac   : > { %v1522_v45 = vunpack.c.l.b16 %v1492_v43  ;;  %2111 = vmatpush.bf16.msra.mxu2 %v4678_v20  ;;  %v4906_v43 = vmov 0  }
  0xad   : > { %v1506_v44 = vsel %vm5062_vm3, %v1501_v37, %v1505_v38  ;;  %1623 = vst [vmem:[#allocation2 + $0x8] sm:$0xf] %v4906_v43 }
  0xae   : > { %v5297_v57 = vpop.f32.mrf.mxu3  ;;  %v1523_v46 = vunpack.c.l.b16 %v1506_v44  ;;  %v4707_v44 = vld [vmem:[%s6129_s3 + $0xf8] sm:$0xff]  ;;  %1624 = vst [vmem:[#allocation2 + $0xc] sm:$0x1] %v4906_v43 }
  0xaf   : > { %1621 = vst [vmem:[#allocation2] sm:$0xf] %v4906_v43  ;;  %2413 = vmatpush.bf16.msra.mxu0 %v4707_v44 }
  0xb0   : > { %v388_v58 = vpop.f32.mrf.mxu0  ;;  %v1527_v50 = vpack.c.b16 %v1523_v46, %v1522_v45  ;;  %2112 = vmatpush.bf16.msra.mxu2 %v4677_v28  ;;  %v4694_v46 = vld [vmem:[%s6129_s3 + $0xb0] sm:$0xff]  ;;  %1622 = vst [vmem:[#allocation2 + $0x4] sm:$0x1] %v4906_v43 }
  0xb1   : > { %v474_v63 = vadd.f32 %v473_v21, %v388_v58  ;;  %1625 = vst [vmem:[#allocation2 + $0x10] sm:$0xf] %v4906_v43 }
  0xb2   : > { %v478_v27 = vpop.f32.mrf.mxu1  ;;  %1626 = vst [vmem:[#allocation2 + $0x14] sm:$0x1] %v4906_v43 }
  0xb3   : > { %4067 = vmatmul.msk.bf16.vlgmr.msrb.gmra.mxu0 %vm361_vm0, %v1524_v53  ;;  %v5316_v34 = vpop.f32.mrf.mxu2  ;;  %1627 = vst [vmem:[#allocation2 + $0x18] sm:$0xf] %v4906_v43 }
  0xb4   : > { %2113 = vmatpush.bf16.msra.mxu2 %v4676_v35  ;;  %1628 = vst [vmem:[#allocation2 + $0x1c] sm:$0x1] %v4906_v43 }
  0xb5   : > { %1629 = vst [vmem:[#allocation2 + $0x20] sm:$0xf] %v4906_v43 }
  0xb6   : > { %v5308_v21 = vpop.f32.mrf.mxu3  ;;  %1630 = vst [vmem:[#allocation2 + $0x24] sm:$0x1] %v4906_v43 }
  0xb7   : > { %1631 = vst [vmem:[#allocation2 + $0x28] sm:$0xf] %v4906_v43 }
  0xb8   : > { %v5310_v22 = vpop.f32.mrf.mxu0  ;;  %1632 = vst [vmem:[#allocation2 + $0x2c] sm:$0x1] %v4906_v43 }
  0xb9   : > { %1633 = vst [vmem:[#allocation2 + $0x30] sm:$0xf] %v4906_v43  ;;  %v476_v35 = vadd.f32 %v5293_v54, %v5310_v22  ;;  %v4682_v54 = vld [vmem:[%s6129_s3 + $0x50] sm:$0xff] }
  0xba   : > { %v5324_v23 = vpop.f32.mrf.mxu1  ;;  %1634 = vst [vmem:[#allocation2 + $0x34] sm:$0x1] %v4906_v43 }
  0xbb   : > { %4069 = vmatmul.msk.bf16.vlgmr.msrb.gmra.mxu3 %vm361_vm0, %v1526_v26  ;;  %v690_v47 = vpop.f32.mrf.mxu2  ;;  %1635 = vst [vmem:[#allocation2 + $0x38] sm:$0xf] %v4906_v43 }
  0xbc   : > { %v707_v52 = vadd.f32 %v690_v47, %v474_v63  ;;  %1636 = vst [vmem:[#allocation2 + $0x3c] sm:$0x1] %v4906_v43 }
  0xbd   : > { %1637 = vst [vmem:[#allocation2 + $0x40] sm:$0xf] %v4906_v43 }
  0xbe   : > { %v796_v40 = vpop.f32.mrf.mxu3  ;;  %1638 = vst [vmem:[#allocation2 + $0x44] sm:$0x1] %v4906_v43 }
  0xbf   : > { %1639 = vst [vmem:[#allocation2 + $0x48] sm:$0xf] %v4906_v43 }
  0xc0   : > { %v393_v41 = vpop.f32.mrf.mxu0  ;;  %1640 = vst [vmem:[#allocation2 + $0x4c] sm:$0x1] %v4906_v43 }
  0xc1   : > { %v479_v1 = vadd.f32 %v478_v27, %v393_v41  ;;  %v4686_v27 = vld [vmem:[%s6129_s3 + $0x70] sm:$0xff]  ;;  %v4695_v41 = vld [vmem:[%s6129_s3 + $0xb8] sm:$0xff] }
  0xc2   : > { %v483_v51 = vpop.f32.mrf.mxu1  ;;  %2010 = vmatpush.bf16.msra.mxu1 %v4686_v27  ;;  %2279 = vmatpush.bf16.msra.mxu3 %v4695_v41 }
  0xc3   : > { %4068 = vmatmul.msk.bf16.gmra.mxu0 %vm361_vm0, %v1525_v39  ;;  %v5333_v59 = vpop.f32.mrf.mxu2 }
  0xc4   : > { %v708_v43 = vadd.f32 %v5333_v59, %v476_v35  ;;  %v4739_v35 = vld [vmem:[%s6129_s3 + $0x1d8] sm:$0xff] }
  0xc6   : > { %v5326_v48 = vpop.f32.mrf.mxu3  ;;  %2011 = vmatpush.bf16.msra.mxu1 %v4685_v33  ;;  %2280 = vmatpush.bf16.msra.mxu3 %v4694_v46 }
  0xc8   : > { %v5328_v49 = vpop.f32.mrf.mxu0 }
  0xca   : > { %v5352_v5 = vpop.f32.mrf.mxu1 }
  0xcb   : > { %4070 = vmatmul.msk.bf16.gmra.mxu3 %vm361_vm0, %v1527_v50  ;;  %v695_v0 = vpop.f32.mrf.mxu2 }
  0xcc   : > { %v709_v2 = vadd.f32 %v695_v0, %v479_v1  ;;  %v4692_v1 = vld [vmem:[%s6129_s3 + $0xa0] sm:$0xff] }
  0xce   : > { %v801_v53 = vpop.f32.mrf.mxu3 }
  0xcf   : > { %v5331_v56 = vadd.f32 %v801_v53, %v707_v52  ;;  %v4693_v53 = vld [vmem:[%s6129_s3 + $0xa8] sm:$0xff] }
  0xd0   : > { %v398_v55 = vpop.f32.mrf.mxu0  ;;  %2281 = vmatpush.bf16.msra.mxu3 %v4693_v53  ;;  %v4701_v53 = vld [vmem:[%s6129_s3 + $0xc8] sm:$0xff] }
  0xd1   : > { %v484_v58 = vadd.f32 %v483_v51, %v398_v55  ;;  %v4706_v51 = vld [vmem:[%s6129_s3 + $0xf0] sm:$0xff]  ;;  %v4675_v55 = vld [vmem:[%s6129_s3 + $0x18] sm:$0xff] }
  0xd2   : > { %v5365_v18 = vpop.f32.mrf.mxu1  ;;  %2414 = vmatpush.bf16.msra.mxu0 %v4706_v51  ;;  %2114 = vmatpush.bf16.msra.mxu2 %v4675_v55 }
  0xd3   : > { %v711_v60 = vadd.f32 %v5297_v57, %v484_v58  ;;  %v4705_v58 = vld [vmem:[%s6129_s3 + $0xe8] sm:$0xff] }
  0xd4   : > { %2282 = vmatpush.bf16.msra.mxu3 %v4692_v1  ;;  %v481_v1 = vadd.f32 %v5324_v23, %v5328_v49  ;;  %v4700_v49 = vld [vmem:[%s6129_s3 + $0xc0] sm:$0xff] }
  0xd6   : > { %v5336_v61 = vpop.f32.mrf.mxu3  ;;  %2415 = vmatpush.bf16.msra.mxu0 %v4705_v58  ;;  %v4688_v58 = vld [vmem:[%s6129_s3 + $0x80] sm:$0xff] }
  0xd8   : > { %v5338_v62 = vpop.f32.mrf.mxu0 }
  0xda   : > { %v5385_v29 = vpop.f32.mrf.mxu1 }
  0xde   : > { %v806_v3 = vpop.f32.mrf.mxu3 }
  0xdf   : > { %v5340_v6 = vadd.f32 %v806_v3, %v709_v2  ;;  %v4683_v3 = vld [vmem:[%s6129_s3 + $0x58] sm:$0xff] }
  0xe0   : > { %v468_v4 = vpop.f32.mrf.mxu0 }
  0xe1   : > { %v469_v63 = vadd.f32 %v468_v4, %v5275_v12  ;;  %v5359_v12 = vpop.f32.mrf.mxu2  ;;  %v4674_v4 = vld [vmem:[%s6129_s3 + $0x10] sm:$0xff] }
  0xe2   : > { %v5399_v36 = vpop.f32.mrf.mxu1  ;;  %2115 = vmatpush.bf16.msra.mxu2 %v4674_v4  ;;  %v486_v4 = vadd.f32 %v5352_v5, %v5338_v62 }
  0xe3   : > { %v705_v9 = vadd.f32 %v5303_v7, %v469_v63 }
  0xe5   : > { %v5344_v10 = vadd.f32 %v796_v40, %v705_v9  ;;  %v4684_v40 = vld [vmem:[%s6129_s3 + $0x60] sm:$0xff] }
  0xe6   : > { %v5346_v11 = vpop.f32.mrf.mxu3  ;;  %2012 = vmatpush.bf16.msra.mxu1 %v4684_v40  ;;  %v4704_v9 = vld [vmem:[%s6129_s3 + $0xe0] sm:$0xff]  ;;  %v4702_v40 = vld [vmem:[%s6129_s3 + $0xd0] sm:$0xff] }
  0xe7   : > { %2416 = vmatpush.bf16.msra.mxu0 %v4704_v9  ;;  %v710_v9 = vadd.f32 %v5359_v12, %v481_v1  ;;  %v712_v12 = vadd.f32 %v5308_v21, %v486_v4 }
  0xe8   : > { %v5348_v57 = vpop.f32.mrf.mxu0 }
  0xe9   : > { %v5373_v24 = vpop.f32.mrf.mxu2  ;;  %v471_v63 = vadd.f32 %v5348_v57, %v5288_v8  ;;  %v4673_v57 = vld [vmem:[%s6129_s3 + $0x8] sm:$0xff]  ;;  %v821_v5 = vadd.f32 %v5346_v11, %v710_v9 }
  0xea   : > { %v5416_v45 = vpop.f32.mrf.mxu1  ;;  %2013 = vmatpush.bf16.msra.mxu1 %v4683_v3  ;;  %2116 = vmatpush.bf16.msra.mxu2 %v4673_v57 }
  0xeb   : > { %v706_v8 = vadd.f32 %v5316_v34, %v471_v63  ;;  %v4690_v34 = vld [vmem:[%s6129_s3 + $0x90] sm:$0xff] }
  0xed   : > { %v817_v28 = vadd.f32 %v5326_v48, %v706_v8  ;;  %v4689_v48 = vld [vmem:[%s6129_s3 + $0x88] sm:$0xff] }
  0xee   : > { %v811_v13 = vpop.f32.mrf.mxu3  ;;  %2014 = vmatpush.bf16.msra.mxu1 %v4682_v54 }
  0xef   : > { %v5354_v15 = vadd.f32 %v811_v13, %v711_v60  ;;  %v4691_v13 = vld [vmem:[%s6129_s3 + $0x98] sm:$0xff] }
  0xf0   : > { %v5350_v14 = vpop.f32.mrf.mxu0  ;;  %2283 = vmatpush.bf16.msra.mxu3 %v4691_v13 }
  0xf1   : > { %v5387_v30 = vpop.f32.mrf.mxu2  ;;  %v927_v16 = vadd.f32 %v5350_v14, %v5344_v10  ;;  %v4703_v10 = vld [vmem:[%s6129_s3 + $0xd8] sm:$0xff] }
  0xf2   : > { %v5446_v2 = vpop.f32.mrf.mxu1  ;;  %2417 = vmatpush.bf16.msra.mxu0 %v4703_v10 }
  0xf3   : > { %v1149_v14 = vadd.f32 %v5365_v18, %v927_v16  ;;  %v4672_v18 = vld [vmem:[%s6129_s3] sm:$0xff] }
  0xf4   : > { %2284 = vmatpush.bf16.msra.mxu3 %v4690_v34  ;;  %2117 = vmatpush.bf16.msra.mxu2 %v4672_v18  ;;  %v4680_v16 = vld [vmem:[%s6129_s3 + $0x40] sm:$0xff] }
  0xf5   : > { %v1260_v41 = vadd.f32 %v5373_v24, %v1149_v14  ;;  %v819_v24 = vadd.f32 %v5336_v61, %v708_v43 }
  0xf6   : > { %v5361_v7 = vpop.f32.mrf.mxu3  ;;  %2418 = vmatpush.bf16.msra.mxu0 %v4702_v40 }
  0xf7   : > { %v823_v10 = vadd.f32 %v5361_v7, %v712_v12 }
  0xf8   : > { %v5363_v17 = vpop.f32.mrf.mxu0  ;;  %2285 = vmatpush.bf16.msra.mxu3 %v4689_v48 }
  0xf9   : > { %v5405_v39 = vpop.f32.mrf.mxu2  ;;  %v928_v44 = vadd.f32 %v5363_v17, %v817_v28  ;;  %v5507_v17 = vld [vmem:[%s6128_s2] ss:$0 sm:$0xff] }
  0xfa   : > { %v5482_v33 = vpop.f32.mrf.mxu1  ;;  %2419 = vmatpush.bf16.msra.mxu0 %v4701_v53 }
  0xfc   : > { %2286 = vmatpush.bf16.msra.mxu3 %v4688_v58 }
  0xfe   : > { %v5375_v25 = vpop.f32.mrf.mxu3  ;;  %2420 = vmatpush.bf16.msra.mxu0 %v4700_v49 }
  0xff   : > { %v1371_v22 = vadd.f32 %v5375_v25, %v1260_v41  ;;  %v1150_v25 = vadd.f32 %v5385_v29, %v928_v44  ;;  %v4681_v29 = vld [vmem:[%s6129_s3 + $0x48] sm:$0xff] }
 0x100   : > { %v5377_v26 = vpop.f32.mrf.mxu0  ;;  %2015 = vmatpush.bf16.msra.mxu1 %v4681_v29 }
 0x101   : > { %v5428_v52 = vpop.f32.mrf.mxu2  ;;  %v929_v61 = vadd.f32 %v5377_v26, %v5331_v56  ;;  %v1261_v56 = vadd.f32 %v5387_v30, %v1150_v25 }
 0x102   : > { %v1144_v26 = vpop.f32.mrf.mxu1 }
 0x104   : > { %2016 = vmatpush.bf16.msra.mxu1 %v4680_v16  ;;  %v1742_v16 = vld [vmem:[#allocation2 + $0x10] sm:$0xf] }
 0x106   : > { %v5389_v31 = vpop.f32.mrf.mxu3 }
 0x108   : > { %v5391_v32 = vpop.f32.mrf.mxu0 }
 0x109   : > { %v5464_v19 = vpop.f32.mrf.mxu2  ;;  %v930_v3 = vadd.f32 %v5391_v32, %v819_v24  ;;  %v1151_v32 = vadd.f32 %v5399_v36, %v929_v61  ;;  %v2139_v24 = vld [vmem:[#allocation2] sm:$0xe] }
 0x10a   : > { %v1146_v53 = vpop.f32.mrf.mxu1  ;;  %v4167_v61 = vrot.slane %v2139_v24, 9  ;;  %v1760_v24 = vld [vmem:[#allocation2 + $0x28] sm:$0xf] }
 0x10b   : > { %v1152_v13 = vadd.f32 %v5416_v45, %v930_v3  ;;  %v1262_v14 = vadd.f32 %v5405_v39, %v1151_v32  ;;  %v1733_v39 = vld [vmem:[#allocation2 + $0x8] sm:$0xf] }
 0x10e   : > { %v5401_v37 = vpop.f32.mrf.mxu3 }
 0x10f   : > { %v1373_v40 = vadd.f32 %v5401_v37, %v1262_v14 }
 0x110   : > { %v5403_v38 = vpop.f32.mrf.mxu0 }
 0x111   : > { %v5502_v46 = vpop.f32.mrf.mxu2  ;;  %v931_v23 = vadd.f32 %v5403_v38, %v5340_v6  ;;  %v1372_v6 = vadd.f32 %v5389_v31, %v1261_v56  ;;  %v1784_v31 = vld [vmem:[#allocation2] sm:$0xf] }
 0x112   : > { %v1820_v41 = vshll.u32 %v1784_v31, 16 }
 0x113   : > { %v1153_v30 = vadd.f32 %v5446_v2, %v931_v23  ;;  %v1263_v2 = vadd.f32 %v5428_v52, %v1152_v13  ;;  %v4723_v23 = vld [vmem:[%s6129_s3 + $0x178] sm:$0xff] }
 0x114   : > { %2833 = vmatpush.bf16.msrb.mxu2 %v4723_v23 }
 0x115   : > { %v1264_v7 = vadd.f32 %v5464_v19, %v1153_v30  ;;  %v1745_v30 = vld [vmem:[#allocation2 + $0x14] sm:$0x1] }
 0x116   : > { %v5421_v47 = vpop.f32.mrf.mxu3 }
 0x117   : > { %v1374_v49 = vadd.f32 %v5421_v47, %v1263_v2 }
 0x118   : > { %v5423_v50 = vpop.f32.mrf.mxu0 }
 0x119   : > { %v932_v8 = vadd.f32 %v5423_v50, %v821_v5  ;;  %v1255_v45 = vpop.f32.mrf.mxu2 }
 0x11b   : > { %v1154_v44 = vadd.f32 %v5482_v33, %v932_v8 }
 0x11e   : > { %v5439_v60 = vpop.f32.mrf.mxu3 }
 0x11f   : > { %v1375_v37 = vadd.f32 %v5439_v60, %v1264_v7  ;;  %v1822_v60 = vrot.slane %v1820_v41, 5 }
 0x120   : > { %v5441_v0 = vpop.f32.mrf.mxu0 }
 0x121   : > { %v933_v50 = vadd.f32 %v5441_v0, %v5354_v15  ;;  %v1739_v15 = vld [vmem:[#allocation2 + $0xc] sm:$0x1]  ;;  %v1817_v0 = vshrl.u32 %v1784_v31, 16 }
 0x123   : > { %v1819_v4 = vrot.slane %v1817_v0, 4 }
 0x125   : > { %v1823_v47 = vor.u32 %v1822_v60, %v1819_v4  ;;  %v1748_v4 = vld [vmem:[#allocation2 + $0x18] sm:$0xf]  ;;  %v1751_v60 = vld [vmem:[#allocation2 + $0x1c] sm:$0x1] }
 0x126   : > { %v5470_v20 = vpop.f32.mrf.mxu3 }
 0x128   : > { %v5472_v27 = vpop.f32.mrf.mxu0 }
 0x129   : > { %v934_v19 = vadd.f32 %v5472_v27, %v823_v10  ;;  %v4121_v10 = vld [vmem:[#allocation2] sm:$0xf] }
 0x12b   : > { %v1156_v56 = vadd.f32 %v1146_v53, %v934_v19 }
 0x12e   : > { %v5510_v51 = vpop.f32.mrf.mxu3 }
 0x130   : > { %v1573_v59 = vpop.f32.mrf.mxu0 }
 0x131   : > { %v1593_v55 = vadd.f32 %v1573_v59, %v1371_v22  ;;  %v1808_v22 = vld [vmem:[#allocation2 + $0x4] sm:$0x1]  ;;  %v1155_v59 = vadd.f32 %v1144_v26, %v933_v50 }
 0x132   : > { %v2168_v3 = vrot.slane %v1808_v22, 5  ;;  %v1826_v26 = vshll.u32 %v1808_v22, 16 }
 0x133   : > { %v1605_v63 = vadd.f32 %v5507_v17, %v1593_v55 }
 0x134   : > { %v5591_v8 = vsel %vm5578_vm12, %v4167_v61, %v2168_v3  ;;  %v4722_v3 = vld [vmem:[%s6129_s3 + $0x170] sm:$0xff] }
 0x135   : > { %v1613_v62 = vmax.f32 %v1605_v63, 0.0  ;;  %v2215_v41 = vunpack.c.l.b16 %v5591_v8  ;;  %2834 = vmatpush.bf16.msrb.mxu2 %v4722_v3  ;;  %v4712_v3 = vld [vmem:[%s6129_s3 + $0x120] sm:$0xff] }
 0x136   : > { %v5547_v11 = vpop.f32.mrf.mxu3 }
 0x137   : > { %v1641_v38 = vpack.c.bf16 %v1613_v62, %v1613_v62  ;;  %v1257_v62 = vpop.f32.mrf.mxu2 }
 0x138   : > { %v1575_v36 = vpop.f32.mrf.mxu0  ;;  %v1267_v50 = vadd.f32 %v1257_v62, %v1156_v56 }
 0x139   : > { %v1650_v57 = vshrl.u32 %v1641_v38, 16  ;;  %v1594_v21 = vadd.f32 %v1575_v36, %v1372_v6  ;;  %v1653_v28 = vshll.u32 %v1641_v38, 16  ;;  %v1265_v6 = vadd.f32 %v5502_v46, %v1154_v44 }
 0x13a   : > { %v1266_v38 = vadd.f32 %v1255_v45, %v1155_v59  ;;  %v5597_v46 = vrot.slane %v1826_v26, 5  ;;  %v5604_v44 = vrot.slane %v1823_v47, 4 }
 0x13b   : > { %v1652_v34 = vrot.slane %v1650_v57, 7  ;;  %v1606_v18 = vadd.f32 %v5507_v17, %v1594_v21  ;;  %v1376_v14 = vadd.f32 %v5470_v20, %v1265_v6 }
 0x13c   : > { %v5595_v2 = vadd.f32 %v5510_v51, %v1266_v38 }
 0x13d   : > { %v1655_v48 = vor.u32 %v1653_v28, %v1652_v34  ;;  %v1656_v43 = vrot.slane %v1652_v34, 4  ;;  %v1614_v54 = vmax.f32 %v1606_v18, 0.0 }
 0x13e   : > { %v1583_v58 = vpop.f32.mrf.mxu3 }
 0x13f   : > { %v1734_v25 = vsel %vm5556_vm8, %v1655_v48, %v1733_v39  ;;  %v1740_v55 = vsel %vm5565_vm9, %v1656_v43, %v1739_v15  ;;  %v1642_v33 = vpack.c.bf16 %v1614_v54, %v1614_v54  ;;  %v1597_v63 = vadd.f32 %v1583_v58, %v1375_v37  ;;  %v1763_v37 = vld [vmem:[#allocation2 + $0x2c] sm:$0x1] }
 0x140   : > { %1735 = vst [vmem:[#allocation2 + $0x8] sm:$0xf] %v1734_v25  ;;  %v1578_v1 = vpop.f32.mrf.mxu0  ;;  %v5607_v48 = vadd.f32 %v5547_v11, %v1267_v50  ;;  %v4715_v11 = vld [vmem:[%s6129_s3 + $0x138] sm:$0xff] }
 0x141   : > { %1741 = vst [vmem:[#allocation2 + $0xc] sm:$0x1] %v1740_v55  ;;  %v1658_v27 = vshrl.u32 %v1642_v33, 16  ;;  %v1595_v29 = vadd.f32 %v1578_v1, %v1373_v40  ;;  %v1661_v32 = vshll.u32 %v1642_v33, 16  ;;  %v1609_v13 = vadd.f32 %v5507_v17, %v1597_v63  ;;  %2659 = vmatpush.bf16.msrb.mxu1 %v4715_v11 }
 0x143   : > { %v1660_v5 = vrot.slane %v1658_v27, 7  ;;  %v1607_v12 = vadd.f32 %v5507_v17, %v1595_v29  ;;  %v1617_v21 = vmax.f32 %v1609_v13, 0.0 }
 0x145   : > { %v1663_v36 = vor.u32 %v1661_v32, %v1660_v5  ;;  %v1664_v57 = vrot.slane %v1660_v5, 4  ;;  %v1615_v31 = vmax.f32 %v1607_v12, 0.0  ;;  %v1645_v28 = vpack.c.bf16 %v1617_v21, %v1617_v21  ;;  %v4714_v5 = vld [vmem:[%s6129_s3 + $0x130] sm:$0xff]  ;;  %v4721_v32 = vld [vmem:[%s6129_s3 + $0x168] sm:$0xff] }
 0x146   : > { %v1585_v39 = vpop.f32.mrf.mxu3  ;;  %2660 = vmatpush.bf16.msrb.mxu1 %v4714_v5  ;;  %2835 = vmatpush.bf16.msrb.mxu2 %v4721_v32 }
 0x147   : > { %v1743_v45 = vsel %vm5556_vm8, %v1663_v36, %v1742_v16  ;;  %v1746_v34 = vsel %vm5565_vm9, %v1664_v57, %v1745_v30  ;;  %v1643_v18 = vpack.c.bf16 %v1615_v31, %v1615_v31  ;;  %v4668_v40 = vld [vmem:[#allocation2 + $0x4] sm:$0xf0]  ;;  %v1682_v43 = vshrl.u32 %v1645_v28, 16 }
 0x148   : > { %v2140_v7 = vld [vmem:[#allocation2 + $0x8] sm:$0xe]  ;;  %1744 = vst [vmem:[#allocation2 + $0x10] sm:$0xf] %v1743_v45  ;;  %v1580_v15 = vpop.f32.mrf.mxu0  ;;  %v4122_v20 = vor.u32 %v4668_v40, %v4121_v10  ;;  %v1809_v0 = vld [vmem:[#allocation2 + $0xc] sm:$0x1]  ;;  %v1598_v59 = vadd.f32 %v1585_v39, %v1376_v14  ;;  %v1829_v40 = vsel %vm5062_vm3, %v5604_v44, %v5597_v46 }
 0x149   : > { %v4168_v51 = vrot.slane %v2140_v7, 9  ;;  %1747 = vst [vmem:[#allocation2 + $0x14] sm:$0x1] %v1746_v34  ;;  %v1685_v54 = vshll.u32 %v1645_v28, 16  ;;  %v1666_v22 = vshrl.u32 %v1643_v18, 16  ;;  %v1669_v19 = vshll.u32 %v1643_v18, 16 }
 0x14a   : > { %v1596_v53 = vadd.f32 %v1580_v15, %v1374_v49  ;;  %2118 = vmatmul.bf16.vlgmr.msra.gmra.mxu2 %v4122_v20  ;;  %v2172_v25 = vrot.slane %v1809_v0, 5  ;;  %v1785_v55 = vld [vmem:[#allocation2 + $0x8] sm:$0xf]  ;;  %v1684_v33 = vrot.slane %v1682_v43, 7  ;;  %v1840_v61 = vshll.u32 %v1809_v0, 16  ;;  %v4720_v20 = vld [vmem:[%s6129_s3 + $0x160] sm:$0xff] }
 0x14b   : > { %v1668_v58 = vrot.slane %v1666_v22, 7  ;;  %v1831_v1 = vshrl.u32 %v1785_v55, 16  ;;  %v1610_v27 = vadd.f32 %v5507_v17, %v1598_v59  ;;  %v1834_v23 = vshll.u32 %v1785_v55, 16  ;;  %v4241_v36 = vld [vmem:[#allocation2 + $0x8] sm:$0xf]  ;;  %2836 = vmatpush.bf16.msrb.mxu2 %v4720_v20 }
 0x14c   : > { %v1608_v63 = vadd.f32 %v5507_v17, %v1596_v53  ;;  %v2173_v29 = vsel %vm5578_vm12, %v4168_v51, %v2172_v25  ;;  %v1687_v49 = vor.u32 %v1685_v54, %v1684_v33  ;;  %v1688_v56 = vrot.slane %v1684_v33, 4  ;;  %v4713_v15 = vld [vmem:[%s6129_s3 + $0x128] sm:$0xff]  ;;  %v1766_v44 = vld [vmem:[#allocation2 + $0x30] sm:$0xf]  ;;  %v1769_v43 = vld [vmem:[#allocation2 + $0x34] sm:$0x1] }
 0x14d   : > { %v1671_v26 = vor.u32 %v1669_v19, %v1668_v58  ;;  %v1672_v62 = vrot.slane %v1668_v58, 4  ;;  %v1618_v13 = vmax.f32 %v1610_v27, 0.0  ;;  %v2216_v6 = vunpack.c.l.b16 %v2173_v29  ;;  %v1754_v54 = vld [vmem:[#allocation2 + $0x20] sm:$0xf]  ;;  %v4735_v19 = vld [vmem:[%s6129_s3 + $0x1b8] sm:$0xff]  ;;  %2661 = vmatpush.bf16.msrb.mxu1 %v4713_v15 }
 0x14e   : > { %v1616_v12 = vmax.f32 %v1608_v63, 0.0  ;;  %v1833_v38 = vrot.slane %v1831_v1, 4  ;;  %v1761_v16 = vsel %vm5556_vm8, %v1687_v49, %v1760_v24  ;;  %v1764_v30 = vsel %vm5565_vm9, %v1688_v56, %v1763_v37  ;;  %v1588_v14 = vpop.f32.mrf.mxu3  ;;  %v1757_v55 = vld [vmem:[#allocation2 + $0x24] sm:$0x1]  ;;  %2968 = vmatpush.bf16.msrb.mxu3 %v4735_v19  ;;  %v4734_v49 = vld [vmem:[%s6129_s3 + $0x1b0] sm:$0xff] }
 0x14f   : > { %v1749_v8 = vsel %vm5556_vm8, %v1671_v26, %v1748_v4  ;;  %v1752_v47 = vsel %vm5565_vm9, %v1672_v62, %v1751_v60  ;;  %v4696_v57 = vld [vmem:[#allocation2 + $0xc] sm:$0xf0]  ;;  %1762 = vst [vmem:[#allocation2 + $0x28] sm:$0xf] %v1761_v16  ;;  %v1646_v31 = vpack.c.bf16 %v1618_v13, %v1618_v13  ;;  %v2223_v50 = vpack.c.b16 %v2216_v6, %v2215_v41  ;;  %v4719_v4 = vld [vmem:[%s6129_s3 + $0x158] sm:$0xff] }
 0x150   : > { %v2141_v21 = vld [vmem:[#allocation2 + $0x10] sm:$0xe]  ;;  %v1644_v10 = vpack.c.bf16 %v1616_v12, %v1616_v12  ;;  %v4242_v45 = vor.u32 %v4696_v57, %v4241_v36  ;;  %v5633_v34 = vld [vmem:[#allocation2 + $0x14] sm:$0x1]  ;;  %1765 = vst [vmem:[#allocation2 + $0x2c] sm:$0x1] %v1764_v30  ;;  %v1599_v18 = vadd.f32 %v1588_v14, %v5595_v2  ;;  %2837 = vmatpush.bf16.msrb.mxu2 %v4719_v4 }
 0x151   : > { %v1786_v28 = vld [vmem:[#allocation2 + $0x10] sm:$0xf]  ;;  %v1836_v7 = vrot.slane %v1834_v23, 5  ;;  %v1842_v39 = vrot.slane %v1840_v61, 5  ;;  %1750 = vst [vmem:[#allocation2 + $0x18] sm:$0xf] %v1749_v8  ;;  %2287 = vmatmul.bf16.vlgmr.msra.gmra.mxu3 %v2223_v50  ;;  %v1945_v61 = vunpack.c.l.b16 %v1829_v40  ;;  %2662 = vmatpush.bf16.msrb.mxu1 %v4712_v3 }
 0x152   : > { %v1690_v0 = vshrl.u32 %v1646_v31, 16  ;;  %v1674_v2 = vshrl.u32 %v1644_v10, 16  ;;  %2421 = vmatmul.bf16.vlgmr.msra.gmra.mxu0 %v4242_v45  ;;  %v4169_v51 = vrot.slane %v2141_v21, 9  ;;  %v2176_v46 = vrot.slane %v5633_v34, 5  ;;  %1753 = vst [vmem:[#allocation2 + $0x1c] sm:$0x1] %v1752_v47  ;;  %2969 = vmatpush.bf16.msrb.mxu3 %v4734_v49 }
 0x153   : > { %v1693_v41 = vshll.u32 %v1646_v31, 16  ;;  %v1611_v22 = vadd.f32 %v5507_v17, %v1599_v18  ;;  %v1837_v24 = vor.u32 %v1836_v7, %v1833_v38  ;;  %v1845_v37 = vshrl.u32 %v1786_v28, 16  ;;  %v4743_v60 = vld [vmem:[%s6129_s3 + $0x1f8] sm:$0xff]  ;;  %v4125_v16 = vld [vmem:[#allocation2 + $0x10] sm:$0xf] }
 0x154   : > { %v1692_v59 = vrot.slane %v1690_v0, 7  ;;  %v1676_v53 = vrot.slane %v1674_v2, 7  ;;  %v1677_v25 = vshll.u32 %v1644_v10, 16  ;;  %v1848_v33 = vshll.u32 %v1786_v28, 16  ;;  %3214 = vmatpush.bf16.msrb.mxu0 %v4743_v60  ;;  %v1772_v21 = vld [vmem:[#allocation2 + $0x38] sm:$0xf] }
 0x155   : > { %v1619_v58 = vmax.f32 %v1611_v22, 0.0  ;;  %v1838_v1 = vrot.slane %v1837_v24, 4  ;;  %v1847_v11 = vrot.slane %v1845_v37, 4  ;;  %v5667_v62 = vsel %vm5578_vm12, %v4169_v51, %v2176_v46  ;;  %v1775_v28 = vld [vmem:[#allocation2 + $0x3c] sm:$0x1]  ;;  %v4718_v24 = vld [vmem:[%s6129_s3 + $0x150] sm:$0xff] }
 0x156   : > { %v1695_v27 = vor.u32 %v1693_v41, %v1692_v59  ;;  %v1696_v63 = vrot.slane %v1692_v59, 4  ;;  %v1679_v29 = vor.u32 %v1677_v25, %v1676_v53  ;;  %v1680_v23 = vrot.slane %v1676_v53, 4  ;;  %v1590_v38 = vpop.f32.mrf.mxu3  ;;  %v4711_v41 = vld [vmem:[%s6129_s3 + $0x118] sm:$0xff]  ;;  %v4741_v25 = vld [vmem:[%s6129_s3 + $0x1e8] sm:$0xff]  ;;  %2838 = vmatpush.bf16.msrb.mxu2 %v4718_v24  ;;  %v1778_v4 = vld [vmem:[#allocation2 + $0x40] sm:$0xf] }
 0x157   : > { %v1647_v56 = vpack.c.bf16 %v1619_v58, %v1619_v58  ;;  %v1843_v26 = vsel %vm5062_vm3, %v1838_v1, %v1842_v39  ;;  %v1850_v5 = vrot.slane %v1848_v33, 5  ;;  %v1600_v47 = vadd.f32 %v1590_v38, %v5607_v48  ;;  %2663 = vmatpush.bf16.msrb.mxu1 %v4711_v41  ;;  %v4732_v58 = vld [vmem:[%s6129_s3 + $0x1a0] sm:$0xff]  ;;  %v4710_v1 = vld [vmem:[%s6129_s3 + $0x110] sm:$0xff]  ;;  %v4709_v24 = vld [vmem:[%s6129_s3 + $0x108] sm:$0xff] }
 0x158   : > { %v1767_v32 = vsel %vm5556_vm8, %v1695_v27, %v1766_v44  ;;  %v1770_v13 = vsel %vm5565_vm9, %v1696_v63, %v1769_v43  ;;  %v1755_v12 = vsel %vm5556_vm8, %v1679_v29, %v1754_v54  ;;  %v1758_v6 = vsel %vm5565_vm9, %v1680_v23, %v1757_v55  ;;  %v4669_v57 = vld [vmem:[#allocation2 + $0x14] sm:$0xf0]  ;;  %v4733_v44 = vld [vmem:[%s6129_s3 + $0x1a8] sm:$0xff]  ;;  %v1781_v60 = vld [vmem:[#allocation2 + $0x44] sm:$0x1] }
 0x159   : > { %1768 = vst [vmem:[#allocation2 + $0x30] sm:$0xf] %v1767_v32  ;;  %v1698_v30 = vshrl.u32 %v1647_v56, 16  ;;  %v1701_v8 = vshll.u32 %v1647_v56, 16  ;;  %v1946_v36 = vunpack.c.l.b16 %v1843_v26  ;;  %v4126_v31 = vor.u32 %v4669_v57, %v4125_v16  ;;  %v1811_v10 = vld [vmem:[#allocation2 + $0x1c] sm:$0x1]  ;;  %2970 = vmatpush.bf16.msrb.mxu3 %v4733_v44 }
 0x15a   : > { %1771 = vst [vmem:[#allocation2 + $0x34] sm:$0x1] %v1770_v13  ;;  %v2142_v14 = vld [vmem:[#allocation2 + $0x18] sm:$0xe]  ;;  %v1851_v50 = vor.u32 %v1850_v5, %v1847_v11  ;;  %v1612_v18 = vadd.f32 %v5507_v17, %v1600_v47  ;;  %v2180_v48 = vrot.slane %v1811_v10, 5  ;;  %v2217_v39 = vunpack.c.l.b16 %v5667_v62  ;;  %v4742_v17 = vld [vmem:[%s6129_s3 + $0x1f0] sm:$0xff] }
 0x15b   : > { %1756 = vst [vmem:[#allocation2 + $0x20] sm:$0xf] %v1755_v12  ;;  %v1700_v45 = vrot.slane %v1698_v30, 7  ;;  %v1953_v40 = vpack.c.b16 %v1946_v36, %v1945_v61  ;;  %v4170_v7 = vrot.slane %v2142_v14, 9  ;;  %2123 = vmatmul.bf16.gmra.mxu2 %v4126_v31  ;;  %v1787_v15 = vld [vmem:[#allocation2 + $0x18] sm:$0xf]  ;;  %3215 = vmatpush.bf16.msrb.mxu0 %v4742_v17 }
 0x15c   : > { %1759 = vst [vmem:[#allocation2 + $0x24] sm:$0x1] %v1758_v6  ;;  %v1854_v20 = vshll.u32 %v5633_v34, 16  ;;  %v1620_v51 = vmax.f32 %v1612_v18, 0.0  ;;  %v1859_v46 = vshrl.u32 %v1787_v15, 16  ;;  %v1852_v43 = vrot.slane %v1851_v50, 4  ;;  %2664 = vmatpush.bf16.msrb.mxu1 %v4710_v1 }
 0x15d   : > { %v1703_v0 = vor.u32 %v1701_v8, %v1700_v45  ;;  %v1704_v2 = vrot.slane %v1700_v45, 4  ;;  %2017 = vmatmul.bf16.vlgmr.msra.gmra.mxu1 %v1953_v40  ;;  %v2181_v34 = vsel %vm5578_vm12, %v4170_v7, %v2180_v48  ;;  %v1862_v54 = vshll.u32 %v1787_v15, 16  ;;  %v4245_v27 = vld [vmem:[#allocation2 + $0x18] sm:$0xf]  ;;  %v2144_v23 = vld [vmem:[#allocation2 + $0x28] sm:$0xe]  ;;  %2971 = vmatpush.bf16.msrb.mxu3 %v4732_v58 }
 0x15e   : > { %v1868_v22 = vshll.u32 %v1811_v10, 16  ;;  %v1648_v59 = vpack.c.bf16 %v1620_v51, %v1620_v51  ;;  %v2218_v53 = vunpack.c.l.b16 %v2181_v34  ;;  %v1861_v55 = vrot.slane %v1859_v46, 4  ;;  %v4740_v38 = vld [vmem:[%s6129_s3 + $0x1e0] sm:$0xff]  ;;  %v5715_v8 = vld [vmem:[#allocation2 + $0x2c] sm:$0x1]  ;;  %v4731_v57 = vld [vmem:[%s6129_s3 + $0x198] sm:$0xff] }
 0x15f   : > { %v1773_v37 = vsel %vm5556_vm8, %v1703_v0, %v1772_v21  ;;  %v1776_v19 = vsel %vm5565_vm9, %v1704_v2, %v1775_v28  ;;  %v1864_v33 = vrot.slane %v1862_v54, 5  ;;  %v1856_v3 = vrot.slane %v1854_v20, 5  ;;  %3216 = vmatpush.bf16.msrb.mxu0 %v4741_v25  ;;  %v1789_v50 = vld [vmem:[#allocation2 + $0x28] sm:$0xf]  ;;  %v4730_v46 = vld [vmem:[%s6129_s3 + $0x190] sm:$0xff]  ;;  %v4708_v1 = vld [vmem:[%s6129_s3 + $0x100] sm:$0xff] }
 0x160   : > { %1774 = vst [vmem:[#allocation2 + $0x38] sm:$0xf] %v1773_v37  ;;  %v1706_v61 = vshrl.u32 %v1648_v59, 16  ;;  %v2224_v11 = vpack.c.b16 %v2218_v53, %v2217_v39  ;;  %v1709_v56 = vshll.u32 %v1648_v59, 16  ;;  %v1870_v12 = vrot.slane %v1868_v22, 5  ;;  %v4717_v45 = vld [vmem:[%s6129_s3 + $0x148] sm:$0xff]  ;;  %2665 = vmatpush.bf16.msrb.mxu1 %v4709_v24 }
 0x161   : > { %1777 = vst [vmem:[#allocation2 + $0x3c] sm:$0x1] %v1776_v19  ;;  %v1865_v29 = vor.u32 %v1864_v33, %v1861_v55  ;;  %v1857_v62 = vsel %vm5062_vm3, %v1852_v43, %v1856_v3  ;;  %v4670_v48 = vld [vmem:[#allocation2 + $0x24] sm:$0xf0]  ;;  %v4172_v39 = vrot.slane %v2144_v23, 9  ;;  %v2188_v15 = vrot.slane %v5715_v8, 5  ;;  %2972 = vmatpush.bf16.msrb.mxu3 %v4731_v57  ;;  %2839 = vmatpush.bf16.msrb.mxu2 %v4717_v45 }
 0x162   : > { %v4697_v63 = vld [vmem:[#allocation2 + $0x1c] sm:$0xf0]  ;;  %v1708_v49 = vrot.slane %v1706_v61, 7  ;;  %2292 = vmatmul.bf16.gmra.mxu3 %v2224_v11  ;;  %v1947_v31 = vunpack.c.l.b16 %v1857_v62  ;;  %v1887_v52 = vshrl.u32 %v1789_v50, 16  ;;  %v1890_v51 = vshll.u32 %v1789_v50, 16  ;;  %v4738_v19 = vld [vmem:[%s6129_s3 + $0x1d0] sm:$0xff] }
 0x163   : > { %v4246_v26 = vor.u32 %v4697_v63, %v4245_v27  ;;  %v5710_v5 = vld [vmem:[#allocation2 + $0x24] sm:$0x1]  ;;  %v2143_v32 = vld [vmem:[#allocation2 + $0x20] sm:$0xe]  ;;  %v1866_v13 = vrot.slane %v1865_v29, 4  ;;  %3217 = vmatpush.bf16.msrb.mxu0 %v4740_v38  ;;  %v2189_v43 = vsel %vm5578_vm12, %v4172_v39, %v2188_v15  ;;  %v4729_v55 = vld [vmem:[%s6129_s3 + $0x188] sm:$0xff] }
 0x164   : > { %v1788_v6 = vld [vmem:[#allocation2 + $0x20] sm:$0xf]  ;;  %v1711_v16 = vor.u32 %v1709_v56, %v1708_v49  ;;  %v1712_v30 = vrot.slane %v1708_v49, 4  ;;  %v4171_v10 = vrot.slane %v2143_v32, 9  ;;  %v2184_v14 = vrot.slane %v5710_v5, 5  ;;  %2666 = vmatpush.bf16.msrb.mxu1 %v4708_v1  ;;  %v4759_v38 = vld [vmem:[%s6131_s5 + $0x18] sm:$0xff] }
 0x165   : > { %2426 = vmatmul.bf16.gmra.mxu0 %v4246_v26  ;;  %v1873_v47 = vshrl.u32 %v1788_v6, 16  ;;  %v1876_v36 = vshll.u32 %v1788_v6, 16  ;;  %v1871_v21 = vsel %vm5062_vm3, %v1866_v13, %v1870_v12  ;;  %v4129_v7 = vld [vmem:[#allocation2 + $0x20] sm:$0xf]  ;;  %v1889_v44 = vrot.slane %v1887_v52, 4  ;;  %2973 = vmatpush.bf16.msrb.mxu3 %v4730_v46 }
 0x166   : > { %v1779_v28 = vsel %vm5556_vm8, %v1711_v16, %v1778_v4  ;;  %v1782_v18 = vsel %vm5565_vm9, %v1712_v30, %v1781_v60  ;;  %v1948_v40 = vunpack.c.l.b16 %v1871_v21  ;;  %v4130_v41 = vor.u32 %v4670_v48, %v4129_v7  ;;  %v4716_v37 = vld [vmem:[%s6129_s3 + $0x140] sm:$0xff]  ;;  %v1790_v25 = vld [vmem:[#allocation2 + $0x30] sm:$0xf]  ;;  %v4737_v4 = vld [vmem:[%s6129_s3 + $0x1c8] sm:$0xff] }
 0x167   : > { %1780 = vst [vmem:[#allocation2 + $0x40] sm:$0xf] %v1779_v28  ;;  %v1875_v20 = vrot.slane %v1873_v47, 4  ;;  %v1878_v0 = vrot.slane %v1876_v36, 5  ;;  %v2185_v17 = vsel %vm5578_vm12, %v4171_v10, %v2184_v14  ;;  %v1892_v34 = vrot.slane %v1890_v51, 5  ;;  %3218 = vmatpush.bf16.msrb.mxu0 %v4739_v35  ;;  %2840 = vmatpush.bf16.msrb.mxu2 %v4716_v37  ;;  %v4728_v60 = vld [vmem:[%s6129_s3 + $0x180] sm:$0xff] }
 0x168   : > { %1783 = vst [vmem:[#allocation2 + $0x44] sm:$0x1] %v1782_v18  ;;  %v1954_v2 = vpack.c.b16 %v1948_v40, %v1947_v31  ;;  %v2219_v22 = vunpack.c.l.b16 %v2185_v17  ;;  %v1882_v59 = vshll.u32 %v5710_v5, 16  ;;  %v2220_v33 = vunpack.c.l.b16 %v2189_v43  ;;  %v4698_v58 = vld [vmem:[#allocation2 + $0x2c] sm:$0xf0] }
 0x169   : > { %v1879_v54 = vor.u32 %v1878_v0, %v1875_v20  ;;  %v1893_v53 = vor.u32 %v1892_v34, %v1889_v44  ;;  %v1896_v11 = vshll.u32 %v5715_v8, 16  ;;  %v1791_v3 = vld [vmem:[#allocation2 + $0x38] sm:$0xf]  ;;  %2974 = vmatpush.bf16.msrb.mxu3 %v4729_v55  ;;  %v4249_v63 = vld [vmem:[#allocation2 + $0x28] sm:$0xf]  ;;  %v1901_v23 = vshrl.u32 %v1790_v25, 16 }
 0x16a   : > { %v2225_v27 = vpack.c.b16 %v2220_v33, %v2219_v22  ;;  %v1814_v29 = vld [vmem:[#allocation2 + $0x34] sm:$0x1]  ;;  %v1904_v49 = vshll.u32 %v1790_v25, 16  ;;  %v1884_v56 = vrot.slane %v1882_v59, 5  ;;  %v2145_v62 = vld [vmem:[#allocation2 + $0x30] sm:$0xe]  ;;  %v4250_v32 = vor.u32 %v4698_v58, %v4249_v63 }
 0x16b   : > { %2128 = vmatmul.bf16.gmra.mxu2 %v4130_v41  ;;  %v1880_v61 = vrot.slane %v1879_v54, 4  ;;  %3219 = vmatpush.bf16.msrb.mxu0 %v4738_v19  ;;  %v1894_v26 = vrot.slane %v1893_v53, 4  ;;  %v2146_v5 = vld [vmem:[#allocation2 + $0x38] sm:$0xe]  ;;  %v5764_v13 = vld [vmem:[#allocation2 + $0x3c] sm:$0x1] }
 0x16c   : > { %v1915_v12 = vshrl.u32 %v1791_v3, 16  ;;  %v1918_v6 = vshll.u32 %v1791_v3, 16  ;;  %v1898_v30 = vrot.slane %v1896_v11, 5  ;;  %v4736_v8 = vld [vmem:[%s6129_s3 + $0x1c0] sm:$0xff]  ;;  %v4173_v47 = vrot.slane %v2145_v62, 9  ;;  %3517 = vmatpush.bf16.msra.mxu2 %v4759_v38  ;;  %v4751_v58 = vld [vmem:[%s6129_s3 + $0x238] sm:$0xff] }
 0x16d   : > { %2022 = vmatmul.bf16.gmra.mxu1 %v1954_v2  ;;  %v1885_v16 = vsel %vm5062_vm3, %v1880_v61, %v1884_v56  ;;  %2975 = vmatpush.bf16.msrb.mxu3 %v4728_v60  ;;  %v2192_v36 = vrot.slane %v1814_v29, 5  ;;  %v1903_v57 = vrot.slane %v1901_v23, 4  ;;  %v1906_v21 = vrot.slane %v1904_v49, 5  ;;  %v4671_v45 = vld [vmem:[#allocation2 + $0x34] sm:$0xf0]  ;;  %v4750_v23 = vld [vmem:[%s6129_s3 + $0x230] sm:$0xff] }
 0x16e   : > { %v1899_v31 = vsel %vm5062_vm3, %v1894_v26, %v1898_v30  ;;  %v4174_v10 = vrot.slane %v2146_v5, 9  ;;  %v2196_v14 = vrot.slane %v5764_v13, 5  ;;  %v1949_v50 = vunpack.c.l.b16 %v1885_v16  ;;  %v3005_v40 = vld [vmem:[#allocation2 + $0x10] sm:$0xf]  ;;  %v3007_v48 = vld [vmem:[#allocation2 + $0x18] sm:$0xf]  ;;  %3388 = vmatpush.bf16.msra.mxu1 %v4751_v58 }
 0x16f   : > { %3220 = vmatpush.bf16.msrb.mxu0 %v4737_v4  ;;  %v1917_v28 = vrot.slane %v1915_v12, 4  ;;  %v1920_v18 = vrot.slane %v1918_v6, 5  ;;  %v1910_v7 = vshll.u32 %v1814_v29, 16  ;;  %v1950_v39 = vunpack.c.l.b16 %v1899_v31  ;;  %v4133_v15 = vld [vmem:[#allocation2 + $0x30] sm:$0xf] }
 0x170   : > { %v2193_v20 = vsel %vm5578_vm12, %v4173_v47, %v2192_v36  ;;  %v1907_v0 = vor.u32 %v1906_v21, %v1903_v57  ;;  %v4134_v35 = vor.u32 %v4671_v45, %v4133_v15  ;;  %v2197_v2 = vsel %vm5578_vm12, %v4174_v10, %v2196_v14  ;;  %v2696_v52 = vld [vmem:[#allocation2 + $0x8] sm:$0xe]  ;;  %v5781_v44 = vld [vmem:[#allocation2 + $0xc] sm:$0x1]  ;;  %v2697_v34 = vld [vmem:[#allocation2 + $0x10] sm:$0xe] }
 0x171   : > { %v3022_v51 = vshrl.u32 %v3005_v40, 16  ;;  %v3025_v46 = vshll.u32 %v3005_v40, 16  ;;  %v1955_v41 = vpack.c.b16 %v1950_v39, %v1949_v50  ;;  %v1921_v17 = vor.u32 %v1920_v18, %v1917_v28  ;;  %v5783_v37 = vld [vmem:[#allocation2 + $0x14] sm:$0x1]  ;;  %v2450_v19 = vld [vmem:[#allocation2 + $0x8] sm:$0xf] }
 0x172   : > { %2297 = vmatmul.bf16.gmra.mxu3 %v2225_v27  ;;  %v3036_v43 = vshrl.u32 %v3007_v48, 16  ;;  %v3039_v54 = vshll.u32 %v3007_v48, 16  ;;  %v2221_v22 = vunpack.c.l.b16 %v2193_v20  ;;  %v1912_v24 = vrot.slane %v1910_v7, 5  ;;  %v2452_v33 = vld [vmem:[#allocation2 + $0x10] sm:$0xf]  ;;  %3389 = vmatpush.bf16.msra.mxu1 %v4750_v23 }
 0x173   : > { %3221 = vmatpush.bf16.msrb.mxu0 %v4736_v8  ;;  %v2222_v59 = vunpack.c.l.b16 %v2197_v2  ;;  %v1908_v53 = vrot.slane %v1907_v0, 4  ;;  %v1924_v25 = vshll.u32 %v5764_v13, 16  ;;  %v4335_v55 = vrot.slane %v2696_v52, 9  ;;  %v4699_v1 = vld [vmem:[#allocation2 + $0x3c] sm:$0xf0]  ;;  %v4758_v31 = vld [vmem:[%s6131_s5 + $0x10] sm:$0xff] }
 0x174   : > { %v2722_v61 = vrot.slane %v5781_v44, 5  ;;  %v4336_v11 = vrot.slane %v2697_v34, 9  ;;  %v3024_v3 = vrot.slane %v3022_v51, 4  ;;  %v3027_v4 = vrot.slane %v3025_v46, 5  ;;  %v5794_v49 = vld [vmem:[#allocation2 + $0x14] sm:$0x1]  ;;  %3518 = vmatpush.bf16.msra.mxu2 %v4758_v31 }
 0x175   : > { %2431 = vmatmul.bf16.gmra.mxu0 %v4250_v32  ;;  %v1922_v60 = vrot.slane %v1921_v17, 4  ;;  %v2726_v27 = vrot.slane %v5783_v37, 5  ;;  %v3038_v63 = vrot.slane %v3036_v43, 4  ;;  %v3041_v29 = vrot.slane %v3039_v54, 5  ;;  %v4253_v13 = vld [vmem:[#allocation2 + $0x38] sm:$0xf] }
 0x176   : > { %v2467_v56 = vshrl.u32 %v2450_v19, 16  ;;  %v2470_v26 = vshll.u32 %v2450_v19, 16  ;;  %v2481_v62 = vshrl.u32 %v2452_v33, 16  ;;  %v2484_v5 = vshll.u32 %v2452_v33, 16  ;;  %v5804_v36 = vld [vmem:[#allocation2 + $0x1c] sm:$0x1] }
 0x177   : > { %v2226_v32 = vpack.c.b16 %v2222_v59, %v2221_v22  ;;  %v1926_v12 = vrot.slane %v1924_v25, 5  ;;  %v4254_v6 = vor.u32 %v4699_v1, %v4253_v13  ;;  %v1913_v38 = vsel %vm5062_vm3, %v1908_v53, %v1912_v24  ;;  %v5810_v18 = vld [vmem:[#allocation2 + $0x24] sm:$0x1]  ;;  %v2699_v40 = vld [vmem:[#allocation2 + $0x20] sm:$0xe] }
 0x178   : > { %v2723_v16 = vsel %vm5578_vm12, %v4335_v55, %v2722_v61  ;;  %v3028_v30 = vor.u32 %v3027_v4, %v3024_v3  ;;  %v2727_v47 = vsel %vm5578_vm12, %v4336_v11, %v2726_v27  ;;  %v3031_v57 = vshll.u32 %v5794_v49, 16  ;;  %v3009_v20 = vld [vmem:[#allocation2 + $0x20] sm:$0xf]  ;;  %v2698_v17 = vld [vmem:[#allocation2 + $0x18] sm:$0xe] }
 0x179   : > { %v1927_v8 = vsel %vm5062_vm3, %v1922_v60, %v1926_v12  ;;  %v3042_v21 = vor.u32 %v3041_v29, %v3038_v63  ;;  %v2469_v10 = vrot.slane %v2467_v56, 4  ;;  %v2472_v14 = vrot.slane %v2470_v26, 5  ;;  %v3011_v25 = vld [vmem:[#allocation2 + $0x28] sm:$0xf]  ;;  %v2454_v55 = vld [vmem:[#allocation2 + $0x18] sm:$0xf] }
 0x17a   : > { %v2483_v50 = vrot.slane %v2481_v62, 4  ;;  %v2486_v45 = vrot.slane %v2484_v5, 5  ;;  %v1951_v28 = vunpack.c.l.b16 %v1913_v38  ;;  %v1952_v7 = vunpack.c.l.b16 %v1927_v8  ;;  %v2456_v61 = vld [vmem:[#allocation2 + $0x20] sm:$0xf]  ;;  %v4724_v11 = vld [vmem:[#allocation2 + $0x14] sm:$0xf0] }
 0x17b   : > { %2133 = vmatmul.bf16.gmra.mxu2 %v4134_v35  ;;  %v2770_v48 = vunpack.c.l.b16 %v2727_v47  ;;  %v3029_v39 = vrot.slane %v3028_v30, 4  ;;  %v3045_v15 = vshll.u32 %v5804_v36, 16  ;;  %v2769_v0 = vunpack.c.l.b16 %v2723_v16  ;;  %v4409_v26 = vld [vmem:[#allocation2 + $0x10] sm:$0xf]  ;;  %v4748_v16 = vld [vmem:[%s6129_s3 + $0x220] sm:$0xff] }
 0x17c   : > { %v3033_v35 = vrot.slane %v3031_v57, 5  ;;  %v3043_v2 = vrot.slane %v3042_v21, 4  ;;  %v2476_v52 = vshll.u32 %v5781_v44, 16  ;;  %v2473_v51 = vor.u32 %v2472_v14, %v2469_v10  ;;  %v5835_v21 = vld [vmem:[#allocation2 + $0x24] sm:$0x1] }
 0x17d   : > { %2027 = vmatmul.bf16.gmra.mxu1 %v1955_v41  ;;  %v2487_v46 = vor.u32 %v2486_v45, %v2483_v50  ;;  %v5814_v41 = vld [vmem:[#allocation2 + $0x1c] sm:$0x1]  ;;  %v4338_v34 = vrot.slane %v2699_v40, 9  ;;  %v2734_v43 = vrot.slane %v5810_v18, 5  ;;  %v3050_v54 = vshrl.u32 %v3009_v20, 16 }
 0x17e   : > { %v3053_v22 = vshll.u32 %v3009_v20, 16  ;;  %v1956_v24 = vpack.c.b16 %v1952_v7, %v1951_v28  ;;  %v2777_v19 = vpack.c.b16 %v2770_v48, %v2769_v0  ;;  %v3034_v59 = vsel %vm5062_vm3, %v3029_v39, %v3033_v35  ;;  %v3013_v45 = vld [vmem:[#allocation2 + $0x30] sm:$0xf]  ;;  %v3015_v39 = vld [vmem:[#allocation2 + $0x38] sm:$0xf]  ;;  %v4757_v0 = vld [vmem:[%s6131_s5 + $0x8] sm:$0xff] }
 0x17f   : > { %v3047_v53 = vrot.slane %v3045_v15, 5  ;;  %v2478_v33 = vrot.slane %v2476_v52, 5  ;;  %v2490_v44 = vshll.u32 %v5783_v37, 16  ;;  %v4337_v58 = vrot.slane %v2698_v17, 9  ;;  %v4749_v37 = vld [vmem:[%s6129_s3 + $0x228] sm:$0xff]  ;;  %3519 = vmatpush.bf16.msra.mxu2 %v4757_v0 }
 0x180   : > { %v2730_v1 = vrot.slane %v5814_v41, 5  ;;  %v2474_v4 = vrot.slane %v2473_v51, 4  ;;  %v2488_v60 = vrot.slane %v2487_v46, 4  ;;  %v2735_v27 = vsel %vm5578_vm12, %v4338_v34, %v2734_v43  ;;  %3390 = vmatpush.bf16.msra.mxu1 %v4749_v37  ;;  %v5843_v52 = vld [vmem:[#allocation2 + $0x2c] sm:$0x1] }
 0x181   : > { %v3048_v3 = vsel %vm5062_vm3, %v3043_v2, %v3047_v53  ;;  %v3052_v63 = vrot.slane %v3050_v54, 4  ;;  %v3055_v29 = vrot.slane %v3053_v22, 5  ;;  %v3064_v23 = vshrl.u32 %v3011_v25, 16  ;;  %v5845_v43 = vld [vmem:[#allocation2 + $0x34] sm:$0x1] }
 0x182   : > { %2302 = vmatmul.bf16.gmra.mxu3 %v2226_v32  ;;  %v3067_v56 = vshll.u32 %v3011_v25, 16  ;;  %v2495_v62 = vshrl.u32 %v2454_v55, 16  ;;  %v2498_v5 = vshll.u32 %v2454_v55, 16  ;;  %v2509_v32 = vshrl.u32 %v2456_v61, 16  ;;  %v2701_v54 = vld [vmem:[#allocation2 + $0x30] sm:$0xe] }
 0x183   : > { %v2512_v13 = vshll.u32 %v2456_v61, 16  ;;  %v4410_v12 = vor.u32 %v4724_v11, %v4409_v26  ;;  %v2492_v38 = vrot.slane %v2490_v44, 5  ;;  %v3150_v30 = vunpack.c.l.b16 %v3034_v59  ;;  %v2700_v55 = vld [vmem:[#allocation2 + $0x28] sm:$0xe]  ;;  %v5850_v61 = vld [vmem:[#allocation2 + $0x2c] sm:$0x1] }
 0x184   : > { %v2479_v8 = vsel %vm5062_vm3, %v2474_v4, %v2478_v33  ;;  %v2731_v47 = vsel %vm5578_vm12, %v4337_v58, %v2730_v1  ;;  %v2772_v57 = vunpack.c.l.b16 %v2735_v27  ;;  %v3056_v10 = vor.u32 %v3055_v29, %v3052_v63  ;;  %3391 = vmatpush.bf16.msra.mxu1 %v4748_v16  ;;  %v2458_v27 = vld [vmem:[#allocation2 + $0x28] sm:$0xf]  ;;  %v4413_v37 = vld [vmem:[#allocation2 + $0x20] sm:$0xf] }
 0x185   : > { %2436 = vmatmul.bf16.gmra.mxu0 %v4254_v6  ;;  %v3151_v6 = vunpack.c.l.b16 %v3048_v3  ;;  %v2493_v31 = vsel %vm5062_vm3, %v2488_v60, %v2492_v38  ;;  %v3066_v14 = vrot.slane %v3064_v23, 4  ;;  %v3069_v50 = vrot.slane %v3067_v56, 5  ;;  %v4725_v38 = vld [vmem:[#allocation2 + $0x24] sm:$0xf0] }
 0x186   : > { %v2497_v28 = vrot.slane %v2495_v62, 4  ;;  %v2500_v40 = vrot.slane %v2498_v5, 5  ;;  %v2511_v7 = vrot.slane %v2509_v32, 4  ;;  %v2514_v48 = vrot.slane %v2512_v13, 5  ;;  %v5856_v13 = vld [vmem:[#allocation2 + $0x34] sm:$0x1] }
 0x187   : > { %v3158_v15 = vpack.c.b16 %v3151_v6, %v3150_v30  ;;  %v3059_v20 = vshll.u32 %v5835_v21, 16  ;;  %v2595_v35 = vunpack.c.l.b16 %v2479_v8  ;;  %v2771_v2 = vunpack.c.l.b16 %v2731_v47  ;;  %v5860_v47 = vld [vmem:[#allocation2 + $0x3c] sm:$0x1] }
 0x188   : > { %v3078_v51 = vshrl.u32 %v3013_v45, 16  ;;  %v3081_v46 = vshll.u32 %v3013_v45, 16  ;;  %v2596_v17 = vunpack.c.l.b16 %v2493_v31  ;;  %v3070_v34 = vor.u32 %v3069_v50, %v3066_v14  ;;  %v2460_v45 = vld [vmem:[#allocation2 + $0x30] sm:$0xf] }
 0x189   : > { %v3092_v22 = vshrl.u32 %v3015_v39, 16  ;;  %v3057_v59 = vrot.slane %v3056_v10, 4  ;;  %v2501_v53 = vor.u32 %v2500_v40, %v2497_v28  ;;  %v2515_v25 = vor.u32 %v2514_v48, %v2511_v7  ;;  %v4747_v28 = vld [vmem:[%s6129_s3 + $0x218] sm:$0xff] }
 0x18a   : > { %v3061_v33 = vrot.slane %v3059_v20, 5  ;;  %v3073_v44 = vshll.u32 %v5843_v52, 16  ;;  %v2504_v58 = vshll.u32 %v5814_v41, 16  ;;  %v2518_v1 = vshll.u32 %v5810_v18, 16  ;;  %v5874_v20 = vld [vmem:[#allocation2 + $0x34] sm:$0xf0]  ;;  %3392 = vmatpush.bf16.msra.mxu1 %v4747_v28 }
 0x18b   : > { %2841 = vmatmul.bf16.vlgmr.msrb.gmra.mxu2 %v2777_v19  ;;  %v2778_v19 = vpack.c.b16 %v2772_v57, %v2771_v2  ;;  %v4340_v11 = vrot.slane %v2701_v54, 9  ;;  %v2742_v3 = vrot.slane %v5845_v43, 5  ;;  %v3080_v4 = vrot.slane %v3078_v51, 4  ;;  %v4746_v51 = vld [vmem:[%s6129_s3 + $0x210] sm:$0xff]  ;;  %v5917_v28 = vld [vmem:[#allocation2 + $0x44] sm:$0x1] }
 0x18c   : > { %v3083_v60 = vrot.slane %v3081_v46, 5  ;;  %v3071_v63 = vrot.slane %v3070_v34, 4  ;;  %v4339_v29 = vrot.slane %v2700_v55, 9  ;;  %v3094_v23 = vrot.slane %v3092_v22, 4 }
 0x18d   : > { %2032 = vmatmul.bf16.gmra.mxu1 %v1956_v24  ;;  %v3095_v24 = vshll.u32 %v3015_v39, 16  ;;  %v3062_v26 = vsel %vm5062_vm3, %v3057_v59, %v3061_v33  ;;  %v2502_v62 = vrot.slane %v2501_v53, 4  ;;  %v2516_v41 = vrot.slane %v2515_v25, 4  ;;  %v3251_v25 = vld [vmem:[#allocation2 + $0x10] sm:$0xe] }
 0x18e   : > { %v2738_v18 = vrot.slane %v5850_v61, 5  ;;  %v2603_v5 = vpack.c.b16 %v2596_v17, %v2595_v35  ;;  %v3075_v32 = vrot.slane %v3073_v44, 5  ;;  %v2526_v6 = vshll.u32 %v2458_v27, 16  ;;  %3393 = vmatpush.bf16.msra.mxu1 %v4746_v51 }
 0x18f   : > { %v3097_v56 = vrot.slane %v3095_v24, 5  ;;  %v2506_v16 = vrot.slane %v2504_v58, 5  ;;  %v2520_v30 = vrot.slane %v2518_v1, 5  ;;  %v2743_v8 = vsel %vm5578_vm12, %v4340_v11, %v2742_v3  ;;  %v2702_v1 = vld [vmem:[#allocation2 + $0x38] sm:$0xe] }
 0x190   : > { %v3084_v57 = vor.u32 %v3083_v60, %v3080_v4  ;;  %v4414_v31 = vor.u32 %v4725_v38, %v4413_v37  ;;  %v3076_v10 = vsel %vm5062_vm3, %v3071_v63, %v3075_v32  ;;  %v3152_v14 = vunpack.c.l.b16 %v3062_v26  ;;  %v5892_v63 = vld [vmem:[#allocation2 + $0x40] sm:$0xe]  ;;  %v3254_v32 = vld [vmem:[#allocation2 + $0x28] sm:$0xe] }
 0x191   : > { %v3098_v50 = vor.u32 %v3097_v56, %v3094_v23  ;;  %v2507_v40 = vsel %vm5062_vm3, %v2502_v62, %v2506_v16  ;;  %v2521_v7 = vsel %vm5062_vm3, %v2516_v41, %v2520_v30  ;;  %v2739_v48 = vsel %vm5578_vm12, %v4339_v29, %v2738_v18  ;;  %v3252_v56 = vld [vmem:[#allocation2 + $0x18] sm:$0xe]  ;;  %v3017_v16 = vld [vmem:[#allocation2 + $0x40] sm:$0xf] }
 0x192   : > { %2976 = vmatmul.bf16.vlgmr.msrb.gmra.mxu3 %v4410_v12  ;;  %v2523_v12 = vshrl.u32 %v2458_v27, 16  ;;  %v3087_v39 = vshll.u32 %v5856_v13, 16  ;;  %v3101_v0 = vshll.u32 %v5860_v47, 16  ;;  %v2528_v2 = vrot.slane %v2526_v6, 5  ;;  %v5890_v27 = vld [vmem:[#allocation2 + $0x3c] sm:$0x1] }
 0x193   : > { %v3153_v46 = vunpack.c.l.b16 %v3076_v10  ;;  %v3085_v17 = vrot.slane %v3084_v57, 4  ;;  %v2537_v34 = vshrl.u32 %v2460_v45, 16  ;;  %v2540_v54 = vshll.u32 %v2460_v45, 16 }
 0x194   : > { %v2525_v35 = vrot.slane %v2523_v12, 4  ;;  %v5880_v22 = vunpack.c.l.b16 %v2521_v7  ;;  %v2773_v24 = vunpack.c.l.b16 %v2739_v48  ;;  %v3099_v59 = vrot.slane %v3098_v50, 4 }
 0x195   : > { %3222 = vmatmul.bf16.vlgmr.msrb.gmra.mxu0 %v3158_v15  ;;  %v2774_v15 = vunpack.c.l.b16 %v2743_v8  ;;  %v2532_v53 = vshll.u32 %v5850_v61, 16  ;;  %v5885_v55 = vunpack.c.l.b16 %v2507_v40  ;;  %v3089_v44 = vrot.slane %v3087_v39, 5  ;;  %v4756_v61 = vld [vmem:[%s6131_s5] sm:$0xff] }
 0x196   : > { %v2546_v58 = vshll.u32 %v5845_v43, 16  ;;  %v3159_v11 = vpack.c.b16 %v3153_v46, %v3152_v14  ;;  %v3103_v4 = vrot.slane %v3101_v0, 5  ;;  %v2529_v60 = vor.u32 %v2528_v2, %v2525_v35  ;;  %3520 = vmatpush.bf16.msra.mxu2 %v4756_v61  ;;  %v3255_v0 = vld [vmem:[#allocation2 + $0x30] sm:$0xe] }
 0x197   : > { %v2779_v3 = vpack.c.b16 %v2774_v15, %v2773_v24  ;;  %v3090_v29 = vsel %vm5062_vm3, %v3085_v17, %v3089_v44  ;;  %v2539_v23 = vrot.slane %v2537_v34, 4  ;;  %v2542_v43 = vrot.slane %v2540_v54, 5  ;;  %v5929_v34 = vld [vmem:[#allocation2 + $0x44] sm:$0x1]  ;;  %v3256_v24 = vld [vmem:[#allocation2 + $0x38] sm:$0xe] }
 0x198   : > { %v4503_v37 = vrot.slane %v3251_v25, 9  ;;  %v2604_v26 = vpack.c.b16 %v5880_v22, %v5885_v55  ;;  %v3104_v62 = vsel %vm5062_vm3, %v3099_v59, %v3103_v4  ;;  %v5903_v41 = vrot.slane %v2532_v53, 5  ;;  %v3257_v44 = vld [vmem:[#allocation2 + $0x40] sm:$0xe] }
 0x199   : > { %v4341_v18 = vrot.slane %v2702_v1, 9  ;;  %v5905_v12 = vrot.slane %v2546_v58, 5  ;;  %v2746_v6 = vrot.slane %v5890_v27, 5  ;;  %v4342_v38 = vrot.slane %v5892_v63, 9 }
 0x19a   : > { %v3277_v30 = vrot.slane %v5794_v49, 5  ;;  %v5910_v8 = vunpack.c.l.b16 %v3090_v29  ;;  %v5912_v57 = vrot.slane %v2529_v60, 4  ;;  %v4504_v10 = vrot.slane %v3252_v56, 9 }
 0x19b   : > { %2846 = vmatmul.bf16.gmra.mxu2 %v2778_v19  ;;  %v5882_v19 = vld [vmem:[#allocation2 + $0x30] sm:$0xf]  ;;  %v3281_v14 = vrot.slane %v5804_v36, 5  ;;  %v5915_v50 = vunpack.c.l.b16 %v3104_v62  ;;  %v2543_v45 = vor.u32 %v2542_v43, %v2539_v23  ;;  %v3106_v48 = vshrl.u32 %v3017_v16, 16  ;;  %v4744_v23 = vld [vmem:[%s6129_s3 + $0x200] sm:$0xff] }
 0x19c   : > { %v4418_v33 = vor.u32 %v5874_v20, %v5882_v19  ;;  %v3278_v40 = vsel %vm5578_vm12, %v4503_v37, %v3277_v30  ;;  %v3109_v39 = vshll.u32 %v3017_v16, 16  ;;  %v3285_v15 = vrot.slane %v5835_v21, 5  ;;  %v3020_v21 = vld [vmem:[#allocation2 + $0x4c] sm:$0x1]  ;;  %v2464_v16 = vld [vmem:[#allocation2 + $0x40] sm:$0xf] }
 0x19d   : > { %2667 = vmatmul.bf16.vlgmr.msrb.gmra.mxu1 %v2603_v5  ;;  %v3253_v5 = vld [vmem:[#allocation2 + $0x20] sm:$0xe]  ;;  %v3282_v49 = vsel %vm5578_vm12, %v4504_v10, %v3281_v14  ;;  %v3324_v2 = vunpack.c.l.b16 %v3278_v40  ;;  %v4506_v51 = vrot.slane %v3254_v32, 9  ;;  %v5926_v46 = vsel %vm5578_vm12, %v4341_v18, %v2746_v6  ;;  %v2462_v40 = vld [vmem:[#allocation2 + $0x38] sm:$0xf] }
 0x19e   : > { %v4505_v7 = vrot.slane %v3253_v5, 9  ;;  %v3325_v36 = vunpack.c.l.b16 %v3282_v49  ;;  %v2750_v17 = vrot.slane %v5917_v28, 5  ;;  %v3289_v22 = vrot.slane %v5843_v52, 5 }
 0x19f   : > { %v4507_v55 = vrot.slane %v3255_v0, 9  ;;  %v2544_v58 = vrot.slane %v2543_v45, 4  ;;  %v3108_v1 = vrot.slane %v3106_v48, 4  ;;  %v3293_v52 = vrot.slane %v5856_v13, 5 }
 0x1a0   : > { %v3286_v54 = vsel %vm5578_vm12, %v4505_v7, %v3285_v15  ;;  %v5934_v53 = vpack.c.b16 %v3325_v36, %v3324_v2  ;;  %v3290_v4 = vsel %vm5578_vm12, %v4506_v51, %v3289_v22  ;;  %v3111_v60 = vrot.slane %v3109_v39, 5 }
 0x1a1   : > { %v3326_v25 = vunpack.c.l.b16 %v3286_v54  ;;  %v3327_v61 = vunpack.c.l.b16 %v3290_v4  ;;  %v4508_v29 = vrot.slane %v3256_v24, 9  ;;  %v3294_v43 = vsel %vm5578_vm12, %v4507_v55, %v3293_v52 }
 0x1a2   : > { %2981 = vmatmul.bf16.gmra.mxu3 %v4414_v31  ;;  %v3019_v31 = vld [vmem:[#allocation2 + $0x48] sm:$0xf]  ;;  %v3297_v56 = vrot.slane %v5860_v47, 5  ;;  %v4509_v37 = vrot.slane %v3257_v44, 9  ;;  %v3305_v5 = vrot.slane %v3020_v21, 5  ;;  %v3160_v32 = vpack.c.b16 %v5915_v50, %v5910_v8 }
 0x1a3   : > { %v3120_v35 = vshrl.u32 %v3019_v31, 16  ;;  %v3123_v59 = vshll.u32 %v3019_v31, 16  ;;  %v5949_v13 = vpack.c.b16 %v3327_v61, %v3326_v25  ;;  %v2751_v6 = vsel %vm5578_vm12, %v4342_v38, %v2750_v17 }
 0x1a4   : > { %v3298_v30 = vsel %vm5578_vm12, %v4508_v29, %v3297_v56  ;;  %v3328_v31 = vunpack.c.l.b16 %v3294_v43  ;;  %v2549_v38 = vsel %vm5062_vm3, %v2544_v58, %v5905_v12  ;;  %v3112_v8 = vor.u32 %v3111_v60, %v3108_v1  ;;  %v4727_v58 = vld [vmem:[#allocation2 + $0x44] sm:$0xf0] }
 0x1a5   : > { %3227 = vmatmul.bf16.gmra.mxu0 %v3159_v11  ;;  %v4745_v11 = vld [vmem:[%s6129_s3 + $0x208] sm:$0xff]  ;;  %v3122_v63 = vrot.slane %v3120_v35, 4  ;;  %v3125_v62 = vrot.slane %v3123_v59, 5  ;;  %v3329_v10 = vunpack.c.l.b16 %v3298_v30  ;;  %v3129_v50 = vshll.u32 %v3020_v21, 16 }
 0x1a6   : > { %3394 = vmatpush.bf16.msra.mxu1 %v4745_v11  ;;  %v2565_v39 = vshrl.u32 %v2464_v16, 16  ;;  %v2568_v49 = vshll.u32 %v2464_v16, 16  ;;  %v2535_v9 = vsel %vm5062_vm3, %v5912_v57, %v5903_v41  ;;  %v2776_v19 = vunpack.c.l.b16 %v2751_v6  ;;  %v4573_v30 = vld [vmem:[%s5027_s20 + $0xe8] sm:$0xf] }
 0x1a7   : > { %v3126_v48 = vor.u32 %v3125_v62, %v3122_v63  ;;  %v5967_v15 = vpack.c.b16 %v3329_v10, %v3328_v31  ;;  %v2551_v12 = vshrl.u32 %v2462_v40, 16  ;;  %v2554_v0 = vshll.u32 %v2462_v40, 16  ;;  %v4577_v40 = vld [vmem:[%s5027_s20 + $0xf8] sm:$0xf] }
 0x1a8   : > { %v2600_v35 = vunpack.c.l.b16 %v2549_v38  ;;  %v2775_v2 = vunpack.c.l.b16 %v5926_v46  ;;  %v3131_v36 = vrot.slane %v3129_v50, 5  ;;  %v3113_v51 = vrot.slane %v3112_v8, 4  ;;  %v4421_v46 = vld [vmem:[#allocation2 + $0x40] sm:$0xf] }
 0x1a9   : > { %v3127_v17 = vrot.slane %v3126_v48, 4  ;;  %v2567_v54 = vrot.slane %v2565_v39, 4  ;;  %v2570_v22 = vrot.slane %v2568_v49, 5  ;;  %v2599_v24 = vunpack.c.l.b16 %v2535_v9 }
 0x1aa   : > { %3395 = vmatpush.bf16.msra.mxu1 %v4744_v23  ;;  %v2780_v21 = vpack.c.b16 %v2776_v19, %v2775_v2  ;;  %v2553_v25 = vrot.slane %v2551_v12, 4  ;;  %v2556_v41 = vrot.slane %v2554_v0, 5  ;;  %v2574_v11 = vshll.u32 %v5917_v28, 16 }
 0x1ab   : > { %2851 = vmatmul.bf16.gmra.mxu2 %v2779_v3  ;;  %v3258_v3 = vld [vmem:[#allocation2 + $0x48] sm:$0xe]  ;;  %v2605_v57 = vpack.c.b16 %v2600_v35, %v2599_v24  ;;  %v3132_v55 = vsel %vm5062_vm3, %v3127_v17, %v3131_v36  ;;  %v2571_v44 = vor.u32 %v2570_v22, %v2567_v54  ;;  %v4422_v63 = vor.u32 %v4727_v58, %v4421_v46  ;;  %v4755_v17 = vld [vmem:[%s5027_s20 + $0x10c] sm:$0xf0] }
 0x1ac   : > { %v4510_v18 = vrot.slane %v3258_v3, 9  ;;  %v2557_v1 = vor.u32 %v2556_v41, %v2553_v25  ;;  %v3157_v52 = vunpack.c.l.b16 %v3132_v55  ;;  %v2560_v3 = vshll.u32 %v5890_v27, 16 }
 0x1ad   : > { %2672 = vmatmul.bf16.gmra.mxu1 %v2604_v26  ;;  %v3301_v26 = vrot.slane %v5929_v34, 5  ;;  %v2572_v60 = vrot.slane %v2571_v44, 4  ;;  %v2576_v29 = vrot.slane %v2574_v11, 5 }
 0x1ae   : > { %v3306_v14 = vsel %vm5578_vm12, %v4510_v18, %v3305_v5  ;;  %v2558_v61 = vrot.slane %v2557_v1, 4  ;;  %v2562_v43 = vrot.slane %v2560_v3, 5 }
 0x1af   : > { %v3302_v47 = vsel %vm5578_vm12, %v4509_v37, %v3301_v26  ;;  %v3331_v7 = vunpack.c.l.b16 %v3306_v14  ;;  %v2577_v56 = vsel %vm5062_vm3, %v2572_v60, %v2576_v29  ;;  %v4569_v37 = vld [vmem:[%s5027_s20 + $0xd8] sm:$0xf]  ;;  %v4752_v26 = vld [vmem:[%s5027_s20 + $0xdc] sm:$0xf0] }
 0x1b0   : > { %v3330_v45 = vunpack.c.l.b16 %v3302_v47  ;;  %v2563_v28 = vsel %vm5062_vm3, %v2558_v61, %v2562_v43  ;;  %v2602_v62 = vunpack.c.l.b16 %v2577_v56  ;;  %v4570_v27 = vor.u32 %v4752_v26, %v4569_v37  ;;  %v4753_v47 = vld [vmem:[%s5027_s20 + $0xec] sm:$0xf0] }
 0x1b1   : > { %v2601_v18 = vunpack.c.l.b16 %v2563_v28  ;;  %v4574_v31 = vor.u32 %v4753_v47, %v4573_v30 }
 0x1b2   : > { %2986 = vmatmul.bf16.gmra.mxu3 %v4418_v33  ;;  %v5973_v20 = vpack.c.b16 %v3331_v7, %v3330_v45  ;;  %v3115_v33 = vshll.u32 %v5929_v34, 16  ;;  %v4754_v7 = vld [vmem:[%s5027_s20 + $0xfc] sm:$0xf0] }
 0x1b3   : > { %v2606_v5 = vpack.c.b16 %v2602_v62, %v2601_v18  ;;  %v4578_v49 = vor.u32 %v4754_v7, %v4577_v40 }
 0x1b4   : > { %v3117_v59 = vrot.slane %v3115_v33, 5 }
 0x1b5   : > { %3232 = vmatmul.bf16.gmra.mxu0 %v3160_v32 }
 0x1b6   : > { %v3118_v34 = vsel %vm5062_vm3, %v3113_v51, %v3117_v59  ;;  %v4581_v51 = vld [vmem:[%s5027_s20 + $0x108] sm:$0xf]  ;;  %s4858_s20 = scalar_lea.hbm %s4857_s21, 32 }
 0x1b7   : > { %v3156_v4 = vunpack.c.l.b16 %v3118_v34  ;;  %p4859_p11 = scmp.ne.s32.totalorder %s4857_s21, %s4858_s20  ;;  %p4864_p1 = scmp.lt.s32.totalorder %s4862_s29, %s4858_s20 }
 0x1b9   : > { %v3161_v23 = vpack.c.b16 %v3157_v52, %v3156_v4  ;;  %p4860_p12 = pnand %p4859_p11, %p4987_p5  ;;  %p4865_p2 = por %p4864_p1, %p4863_p0 }
 0x1bb   : > { %2856 = vmatmul.bf16.gmra.mxu2 %v2780_v21  ;;  %v4582_v21 = vor.u32 %v4755_v17, %v4581_v51  ;;  %p4861_p13 = pneg %p4860_p12 }
 0x1bd   : > { %2677 = vmatmul.bf16.gmra.mxu1 %v2605_v57  ;;  %p4866_p3 = pnand %p4865_p2, %p4861_p13 }
 0x1c2   : > { %2991 = vmatmul.bf16.gmra.mxu3 %v4422_v63 }
 0x1c5   : > { %3237 = vmatmul.bf16.gmra.mxu0 %v3161_v23 }
 0x1cb   : > { %4599 = vmatmul.msk.bf16.vlgmr.msra.gmra.mxu2 %vm361_vm0, %v4570_v27 }
 0x1cd   : > { %2682 = vmatmul.bf16.gmra.mxu1 %v2606_v5  ;;  %v2119_v32 = vpop.f32.mrf.mxu2 }
 0x1cf   : > { %v2422_v9 = vpop.f32.mrf.mxu0 }
 0x1d4   : > { %v2288_v6 = vpop.f32.mrf.mxu3 }
 0x1d5   : > { %v2121_v16 = vpop.f32.mrf.mxu2 }
 0x1d7   : > { %v6006_v36 = vpop.f32.mrf.mxu0 }
 0x1da   : > { %v2018_v10 = vpop.f32.mrf.mxu1 }
 0x1db   : > { %v2120_v14 = vadd.f32 %v2119_v32, %v2018_v10  ;;  %4600 = vmatmul.msk.bf16.gmra.mxu2 %vm361_vm0, %v4574_v31 }
 0x1dc   : > { %v5994_v45 = vpop.f32.mrf.mxu3 }
 0x1dd   : > { %v2308_v42 = vadd.f32 %v2288_v6, %v2120_v14  ;;  %3396 = vmatmul.bf16.vlgmr.msra.gmra.mxu1 %v5934_v53 }
 0x1de   : > { %v2124_v38 = vpop.f32.mrf.mxu2 }
 0x1df   : > { %v2442_v54 = vadd.f32 %v2422_v9, %v2308_v42 }
 0x1e2   : > { %v2020_v8 = vpop.f32.mrf.mxu1 }
 0x1e3   : > { %v5996_v50 = vadd.f32 %v2121_v16, %v2020_v8 }
 0x1e5   : > { %v2293_v48 = vpop.f32.mrf.mxu3 }
 0x1e6   : > { %v2126_v39 = vpop.f32.mrf.mxu2 }
 0x1ea   : > { %v2023_v19 = vpop.f32.mrf.mxu1 }
 0x1eb   : > { %v2125_v33 = vadd.f32 %v2124_v38, %v2023_v19  ;;  %4601 = vmatmul.msk.bf16.gmra.mxu2 %vm361_vm0, %v4578_v49 }
 0x1ed   : > { %v2310_v12 = vadd.f32 %v2293_v48, %v2125_v33  ;;  %3401 = vmatmul.bf16.gmra.mxu1 %v5949_v13  ;;  %v6002_v53 = vpop.f32.mrf.mxu3  ;;  %v2427_v13 = vpop.f32.mrf.mxu0  ;;  %v2309_v33 = vadd.f32 %v5994_v45, %v5996_v50  ;;  %v6045_v45 = vld [vmem:[%s6132_s6] ss:$0 sm:$0xff] }
 0x1ee   : > { %v2129_v0 = vpop.f32.mrf.mxu2 }
 0x1ef   : > { %v2444_v58 = vadd.f32 %v2427_v13, %v2310_v12  ;;  %v2443_v51 = vadd.f32 %v6006_v36, %v2309_v33  ;;  %v6050_v36 = vld [vmem:[%s6130_s4] ss:$0 sm:$0xff] }
 0x1f2   : > { %v2025_v35 = vpop.f32.mrf.mxu1 }
 0x1f3   : > { %v6004_v2 = vadd.f32 %v2126_v39, %v2025_v35 }
 0x1f5   : > { %v2298_v24 = vpop.f32.mrf.mxu3  ;;  %v6016_v1 = vpop.f32.mrf.mxu0 }
 0x1f6   : > { %v2131_v22 = vpop.f32.mrf.mxu2 }
 0x1fa   : > { %v2028_v59 = vpop.f32.mrf.mxu1 }
 0x1fb   : > { %v2130_v25 = vadd.f32 %v2129_v0, %v2028_v59  ;;  %4602 = vmatmul.msk.bf16.gmra.mxu2 %vm361_vm0, %v4582_v21 }
 0x1fd   : > { %v2312_v41 = vadd.f32 %v2298_v24, %v2130_v25  ;;  %3406 = vmatmul.bf16.gmra.mxu1 %v5967_v15  ;;  %v6012_v55 = vpop.f32.mrf.mxu3  ;;  %v2432_v63 = vpop.f32.mrf.mxu0 }
 0x1fe   : > { %v2134_v57 = vpop.f32.mrf.mxu2 }
 0x1ff   : > { %v2446_v23 = vadd.f32 %v2432_v63, %v2312_v41 }
 0x202   : > { %v2030_v34 = vpop.f32.mrf.mxu1 }
 0x203   : > { %v6014_v44 = vadd.f32 %v2131_v22, %v2030_v34  ;;  %v2311_v34 = vadd.f32 %v6002_v53, %v6004_v2 }
 0x205   : > { %v2303_v52 = vpop.f32.mrf.mxu3  ;;  %v6021_v37 = vpop.f32.mrf.mxu0 }
 0x206   : > { %v2136_v46 = vpop.f32.mrf.mxu2 }
 0x20a   : > { %v2033_v11 = vpop.f32.mrf.mxu1 }
 0x20b   : > { %v2135_v4 = vadd.f32 %v2134_v57, %v2033_v11 }
 0x20d   : > { %v2314_v3 = vadd.f32 %v2303_v52, %v2135_v4  ;;  %3411 = vmatmul.bf16.gmra.mxu1 %v5973_v20  ;;  %v2437_v27 = vpop.f32.mrf.mxu0  ;;  %v6025_v14 = vpop.f32.mrf.mxu3 }
 0x20e   : > { %v2842_v60 = vpop.f32.mrf.mxu2 }
 0x20f   : > { %v2448_v5 = vadd.f32 %v2437_v27, %v2314_v3  ;;  %v2445_v3 = vadd.f32 %v6016_v1, %v2311_v34 }
 0x212   : > { %v2035_v15 = vpop.f32.mrf.mxu1 }
 0x213   : > { %v6019_v61 = vadd.f32 %v2136_v46, %v2035_v15 }
 0x215   : > { %v6029_v8 = vpop.f32.mrf.mxu0  ;;  %v2977_v7 = vpop.f32.mrf.mxu3 }
 0x216   : > { %v2844_v29 = vpop.f32.mrf.mxu2 }
 0x21a   : > { %v2668_v43 = vpop.f32.mrf.mxu1 }
 0x21b   : > { %v2688_v56 = vadd.f32 %v2668_v43, %v2442_v54 }
 0x21d   : > { %v2862_v26 = vadd.f32 %v2842_v60, %v2688_v56  ;;  %v3223_v39 = vpop.f32.mrf.mxu0  ;;  %v2979_v0 = vpop.f32.mrf.mxu3 }
 0x21e   : > { %v2847_v28 = vpop.f32.mrf.mxu2 }
 0x21f   : > { %v2997_v22 = vadd.f32 %v2977_v7, %v2862_v26 }
 0x221   : > { %v3243_v41 = vadd.f32 %v3223_v39, %v2997_v22 }
 0x222   : > { %v2670_v62 = vpop.f32.mrf.mxu1 }
 0x223   : > { %v2689_v54 = vadd.f32 %v2670_v62, %v2443_v51 }
 0x225   : > { %v3225_v17 = vpop.f32.mrf.mxu0  ;;  %v2863_v21 = vadd.f32 %v2844_v29, %v2689_v54  ;;  %v2982_v59 = vpop.f32.mrf.mxu3 }
 0x226   : > { %v2849_v18 = vpop.f32.mrf.mxu2 }
 0x227   : > { %v2998_v13 = vadd.f32 %v2979_v0, %v2863_v21 }
 0x229   : > { %v3244_v4 = vadd.f32 %v3225_v17, %v2998_v13 }
 0x22a   : > { %v2673_v32 = vpop.f32.mrf.mxu1 }
 0x22b   : > { %v2690_v6 = vadd.f32 %v2673_v32, %v2444_v58 }
 0x22d   : > { %v2864_v20 = vadd.f32 %v2847_v28, %v2690_v6  ;;  %v3228_v57 = vpop.f32.mrf.mxu0  ;;  %v2984_v63 = vpop.f32.mrf.mxu3 }
 0x22e   : > { %v2852_v16 = vpop.f32.mrf.mxu2 }
 0x22f   : > { %v2999_v56 = vadd.f32 %v2982_v59, %v2864_v20  ;;  %v2313_v20 = vadd.f32 %v6012_v55, %v6014_v44 }
 0x231   : > { %v3245_v32 = vadd.f32 %v3228_v57, %v2999_v56  ;;  %v2447_v39 = vadd.f32 %v6021_v37, %v2313_v20 }
 0x232   : > { %v2675_v30 = vpop.f32.mrf.mxu1 }
 0x233   : > { %v2691_v15 = vadd.f32 %v2675_v30, %v2445_v3 }
 0x235   : > { %v3230_v2 = vpop.f32.mrf.mxu0  ;;  %v2865_v26 = vadd.f32 %v2849_v18, %v2691_v15  ;;  %v2987_v30 = vpop.f32.mrf.mxu3 }
 0x236   : > { %v6023_v47 = vpop.f32.mrf.mxu2 }
 0x237   : > { %v3000_v6 = vadd.f32 %v2984_v63, %v2865_v26 }
 0x23a   : > { %v2678_v31 = vpop.f32.mrf.mxu1 }
 0x23b   : > { %v2692_v10 = vadd.f32 %v2678_v31, %v2446_v23 }
 0x23d   : > { %v6027_v42 = vadd.f32 %v2852_v16, %v2692_v10  ;;  %v3246_v10 = vadd.f32 %v3230_v2, %v3000_v6  ;;  %v2989_v17 = vpop.f32.mrf.mxu3 }
 0x23e   : > { %v2857_v38 = vpop.f32.mrf.mxu2 }
 0x23f   : > { %v3001_v55 = vadd.f32 %v2987_v30, %v6027_v42 }
 0x242   : > { %v6031_v40 = vpop.f32.mrf.mxu1 }
 0x243   : > { %v2693_v33 = vadd.f32 %v6031_v40, %v2447_v39 }
 0x245   : > { %v2867_v54 = vadd.f32 %v6023_v47, %v2693_v33 }
 0x246   : > { %v6033_v48 = vpop.f32.mrf.mxu2 }
 0x24a   : > { %v2683_v49 = vpop.f32.mrf.mxu1 }
 0x24b   : > { %v2694_v9 = vadd.f32 %v2683_v49, %v2448_v5 }
 0x24d   : > { %v6035_v19 = vadd.f32 %v2857_v38, %v2694_v9  ;;  %v3233_v38 = vpop.f32.mrf.mxu0 }
 0x24e   : > { %v3522_v12 = vpop.f32.mrf.mxu2  ;;  %v3247_v59 = vadd.f32 %v3233_v38, %v3001_v55 }
 0x24f   : > { %v3523_v58 = vadd.f32 %v6045_v45, %v3522_v12 }
 0x252   : > { %v6039_v35 = vpop.f32.mrf.mxu1 }
 0x256   : > { %v3524_v24 = vpop.f32.mrf.mxu2 }
 0x257   : > { %v3525_v23 = vadd.f32 %v6045_v45, %v3524_v24 }
 0x25a   : > { %v3397_v25 = vpop.f32.mrf.mxu1 }
 0x25b   : > { %v3417_v50 = vadd.f32 %v3397_v25, %v3243_v41  ;;  %v3235_v25 = vpop.f32.mrf.mxu0  ;;  %v3002_v41 = vadd.f32 %v2989_v17, %v2867_v54 }
 0x25d   : > { %v3429_v11 = vadd.f32 %v6050_v36, %v3417_v50  ;;  %v2315_v50 = vadd.f32 %v6025_v14, %v6019_v61  ;;  %v3248_v34 = vadd.f32 %v3235_v25, %v3002_v41 }
 0x25e   : > { %v3527_v46 = vpop.f32.mrf.mxu2 }
 0x25f   : > { %v3542_v29 = vadd.f32 %v3523_v58, %v3429_v11  ;;  %v3528_v31 = vadd.f32 %v6045_v45, %v3527_v46  ;;  %v2992_v46 = vpop.f32.mrf.mxu3  ;;  %v2449_v58 = vadd.f32 %v6029_v8, %v2315_v50 }
 0x260   : > { %v3003_v61 = vadd.f32 %v2992_v46, %v6035_v19 }
 0x261   : > { %v3550_v28 = vmax.f32 %v3542_v29, 0.0 }
 0x262   : > { %v3399_v52 = vpop.f32.mrf.mxu1 }
 0x263   : > { %v3418_v60 = vadd.f32 %v3399_v52, %v3244_v4  ;;  %v2695_v4 = vadd.f32 %v6039_v35, %v2449_v58  ;;  %v3238_v63 = vpop.f32.mrf.mxu0 }
 0x265   : > { %v3430_v43 = vadd.f32 %v6050_v36, %v3418_v60  ;;  %v2869_v29 = vadd.f32 %v6033_v48, %v2695_v4 }
 0x266   : > { %v3529_v5 = vpop.f32.mrf.mxu2 }
 0x267   : > { %v3543_v53 = vadd.f32 %v3525_v23, %v3430_v43  ;;  %v3530_v0 = vadd.f32 %v6045_v45, %v3529_v5  ;;  %v2994_v35 = vpop.f32.mrf.mxu3 }
 0x268   : > { %v3004_v2 = vadd.f32 %v2994_v35, %v2869_v29 }
 0x269   : > { %v3551_v62 = vmax.f32 %v3543_v53, 0.0  ;;  %v3249_v53 = vadd.f32 %v3238_v63, %v3003_v61 }
 0x26a   : > { %v3402_v27 = vpop.f32.mrf.mxu1 }
 0x26b   : > { %v4764_v1 = vpack.c.bf16 %v3551_v62, %v3550_v28  ;;  %v3419_v16 = vadd.f32 %v3402_v27, %v3245_v32  ;;  %v3240_v28 = vpop.f32.mrf.mxu0 }
 0x26c   : > { %v3250_v27 = vadd.f32 %v3240_v28, %v3004_v2 }
 0x26d   : > { %4765 = vst [vmem:[%s6062_s13] sm:$0xff] %v4764_v1   ;;  %v3431_v18 = vadd.f32 %v6050_v36, %v3419_v16 }
 0x26e   : > { %v3532_v9 = vpop.f32.mrf.mxu2 }
 0x26f   : > { %v3544_v12 = vadd.f32 %v3528_v31, %v3431_v18  ;;  %v3533_v57 = vadd.f32 %v6045_v45, %v3532_v9 }
 0x271   : > { %v3552_v22 = vmax.f32 %v3544_v12, 0.0 }
 0x272   : > { %v3404_v7 = vpop.f32.mrf.mxu1 }
 0x273   : > { %v3420_v49 = vadd.f32 %v3404_v7, %v3246_v10 }
 0x275   : > { %v3432_v51 = vadd.f32 %v6050_v36, %v3420_v49 }
 0x276   : > { %v3534_v13 = vpop.f32.mrf.mxu2 }
 0x277   : > { %v3545_v44 = vadd.f32 %v3530_v0, %v3432_v51  ;;  %v3535_v3 = vadd.f32 %v6045_v45, %v3534_v13 }
 0x279   : > { %v3553_v24 = vmax.f32 %v3545_v44, 0.0 }
 0x27a   : > { %v3407_v21 = vpop.f32.mrf.mxu1 }
 0x27b   : > { %v4769_v37 = vpack.c.bf16 %v3553_v24, %v3552_v22  ;;  %v3421_v40 = vadd.f32 %v3407_v21, %v3247_v59 }
 0x27d   : > { %4781 = vst [vmem:[%s6062_s13 + $0x8] sm:$0xff] %v4769_v37   ;;  %v3433_v42 = vadd.f32 %v6050_v36, %v3421_v40 }
 0x27e   : > { %v3537_v15 = vpop.f32.mrf.mxu2 }
 0x27f   : > { %v3546_v52 = vadd.f32 %v3533_v57, %v3433_v42  ;;  %v3538_v62 = vadd.f32 %v6045_v45, %v3537_v15 }
 0x281   : > { %v3554_v23 = vmax.f32 %v3546_v52, 0.0 }
 0x282   : > { %v3409_v47 = vpop.f32.mrf.mxu1 }
 0x283   : > { %v3422_v11 = vadd.f32 %v3409_v47, %v3248_v34 }
 0x285   : > { %v3434_v60 = vadd.f32 %v6050_v36, %v3422_v11 }
 0x286   : > { %v3539_v5 = vpop.f32.mrf.mxu2 }
 0x287   : > { %v3547_v14 = vadd.f32 %v3535_v3, %v3434_v60  ;;  %v3540_v6 = vadd.f32 %v6045_v45, %v3539_v5 }
 0x289   : > { %v3555_v43 = vmax.f32 %v3547_v14, 0.0 }
 0x28a   : > { %v3412_v8 = vpop.f32.mrf.mxu1 }
 0x28b   : > { %v4774_v56 = vpack.c.bf16 %v3555_v43, %v3554_v23  ;;  %v3423_v26 = vadd.f32 %v3412_v8, %v3249_v53 }
 0x28d   : > { %4782 = vst [vmem:[%s6062_s13 + $0x10] sm:$0xff] %v4774_v56   ;;  %v3435_v19 = vadd.f32 %v6050_v36, %v3423_v26 }
 0x28f   : > { %v3548_v32 = vadd.f32 %v3538_v62, %v3435_v19 }
 0x291   : > { %v3556_v20 = vmax.f32 %v3548_v32, 0.0 }
 0x292   : > { %v3414_v48 = vpop.f32.mrf.mxu1 }
 0x293   : > { %v3424_v1 = vadd.f32 %v3414_v48, %v3250_v27 }
 0x295   : > { %v3436_v16 = vadd.f32 %v6050_v36, %v3424_v1 }
 0x297   : > { %v3549_v30 = vadd.f32 %v3540_v6, %v3436_v16 }
 0x299   : > { %v3557_v31 = vmax.f32 %v3549_v30, 0.0 }
 0x29b   : > { %v4779_v18 = vpack.c.bf16 %v3557_v31, %v3556_v20 }
 0x29d   : > { %4783 = vst [vmem:[%s6062_s13 + $0x18] sm:$0xff] %v4779_v18  }
 0x29e   : > { %4869 = shalt.err (!%p4866_p3)
}
 0x29f   : > { %s4907_s8 = smov 64   ;;  %s4908_s13 = smov 4  }
 0x2a0   : > { %4797 = dma.vmem_to_hbm [thread:$0]  (%p4987_p5), %s3588_s19, 512, %s3590_s17, %s3575_s28, %s4907_s8, %s4907_s8, %s4908_s13  }
 0x2a1 PF: > { %p4803_p4 = scmp.ge.s32.totalorder %s4904_s27, 2  ;;  %s3604_s15 = sand.u32 1, %s4892_s24  }
 0x2a2   : > { %s3605_s16 = scalar_lea.sflag [#allocation4], %s3604_s15 }
 0x2a3   : > { %p4800_p7 = pnand %p4803_p4, %p4991_p6 }
 0x2a5   : > { %p4801_p8 = pneg %p4800_p7 }
 0x2a7   : > { %4887 = dma.done.wait (%p4801_p8), %s3605_s16, 512  }
 0x2a8   : > { %4889 = vsyncadd (%p4801_p8), %s3605_s16, 4294966784  ;;  %p17_p9 = scmp.ge.s32.totalorder %s4974_s30, 4   ;;  %s6144_s24 = smov %s4896_s25 }
 0x2a9   : > { %s6145_s25 = smov %s4900_s26  ;;  %s6146_s26 = smov %s4985_s10 }
 0x2aa   : > { %s6147_s27 = smov %s4974_s30  ;;  %19 = sbr.rel (!%p17_p9) target bundleno = 3 (0x3), region = 106 }
 0x2af   :  { %3611 = vsyncpa [#allocation4], 1 }
 0x2b0   :  { %3613 = vsyncpa [#allocation4 + $0x1], 1 }

</bundles_post_ra>
